<compile_context>
chip_gen: v6e
topology: v6e:2x2x1
jax: 0.10.0
libtpu: 0.0.40
codegen_flags: <defaults>
</compile_context>

<pallas_src>
import functools

import jax
import jax.numpy as jnp
from jax.experimental import pallas as pl
from jax.experimental.pallas import tpu as pltpu

N_EMBED = 384
NUM_HEADS = 6
HEAD_SIZE = N_EMBED // NUM_HEADS   # 64
BLOCK_SIZE = 256                   # causal tril buffer size (T must be <= BLOCK_SIZE)
LN_EPS = 1e-5


# ---------------------------------------------------------------------------
# Fused Block kernel: one grid step = one tile of `batch_tile` batch items
# (M = batch_tile * T flattened rows for the QKV / proj / FFN matmuls; attention
# itself runs per batch item on (H, T, T) scores).
# ---------------------------------------------------------------------------
def _block_kernel(x_ref, xr_ref, wqkv_ref, wp_ref, bp_ref, g2_ref, b2_ref,
                  w1_ref, b1_ref, w2_ref, b2b_ref, o_ref, cat_ref, *, seq_len):
    M, C = x_ref.shape                 # (batch_tile*T, n_embed)
    H = wqkv_ref.shape[0]              # num heads
    hs = wqkv_ref.shape[2] // 3        # head size
    T = seq_len
    bt = M // T                        # batch items in this tile

    x = x_ref[...]                     # (M, C) f32 original rows (residual path only)

    # ---- fused Q|K|V projection for all heads: one batched bf16 matmul, N = 3*hs ----
    # (C**-0.5 attention scale already folded into the Q weights in the wrapper)
    qkv = jnp.einsum('hmc,hcd->hmd', xr_ref[...], wqkv_ref[...],
                     preferred_element_type=jnp.float32)          # (H, M, 3*hs) f32
    q = qkv[:, :, 0:hs].astype(jnp.bfloat16)
    k = qkv[:, :, hs:2 * hs].astype(jnp.bfloat16)
    v = qkv[:, :, 2 * hs:3 * hs].astype(jnp.bfloat16)

    # ---- causal additive bias built in-kernel (replaces the (M,M) HBM mask) ----
    row = jax.lax.broadcasted_iota(jnp.int32, (T, T), 0)
    col = jax.lax.broadcasted_iota(jnp.int32, (T, T), 1)
    causal_bias = jnp.where(row >= col, 0.0, -1e30).astype(jnp.float32)   # (T, T)

    # ---- per-batch-item attention: (H, T, T) scores, softmax, (H, T, hs) outputs ----
    for b in range(bt):                # static unrolled; bt is small (usually 1)
        lo, hi = b * T, (b + 1) * T
        qb = q[:, lo:hi, :]            # (H, T, hs)
        kb = k[:, lo:hi, :]
        vb = v[:, lo:hi, :]

        wei = jnp.einsum('hqd,hkd->hqk', qb, kb,
                         preferred_element_type=jnp.float32)      # (H, T, T)
        wei = wei + causal_bias[None, :, :]
        wei = wei - jnp.max(wei, axis=-1, keepdims=True)          # stable softmax
        p = jnp.exp(wei)
        p = p * pl.reciprocal(jnp.sum(p, axis=-1, keepdims=True), approx=True)
        # TODO(synk): attention-weight dropout (p=0.2) not implemented — eval-mode identity.

        attn = jnp.einsum('hqk,hkd->hqd', p.astype(jnp.bfloat16), vb,
                          preferred_element_type=jnp.float32)     # (H, T, hs)

        # head concat: write each head into its 64-lane column slot of the (M, C) buffer
        for h in range(H):
            cat_ref[lo:hi, h * hs:(h + 1) * hs] = attn[h].astype(cat_ref.dtype)

    # ---- output projection: one dense (M, C)@(C, C) matmul (K = 384) ----
    sa = jnp.dot(cat_ref[...], wp_ref[...],
                 preferred_element_type=jnp.float32) + bp_ref[...]
    # TODO(synk): projection dropout (p=0.2) not implemented — eval-mode identity.

    x1 = x + sa                        # first residual (f32)

    # ---- LayerNorm2 (f32) ----
    mu = jnp.mean(x1, axis=-1, keepdims=True)
    xc = x1 - mu
    var = jnp.mean(xc * xc, axis=-1, keepdims=True)
    hn = xc * jax.lax.rsqrt(var + LN_EPS) * g2_ref[...] + b2_ref[...]

    # ---- FeedForward: (M,C)@(C,4C) -> ReLU -> (M,4C)@(4C,C), bf16 operands / f32 acc ----
    h1 = jnp.dot(hn.astype(jnp.bfloat16), w1_ref[...],
                 preferred_element_type=jnp.float32) + b1_ref[...]
    h1 = jnp.maximum(h1, 0.0)
    ff = jnp.dot(h1.astype(jnp.bfloat16), w2_ref[...],
                 preferred_element_type=jnp.float32) + b2b_ref[...]
    # TODO(synk): FFN dropout (p=0.2) not implemented — eval-mode identity.

    o_ref[...] = (x1 + ff).astype(o_ref.dtype)   # second residual


# ---------------------------------------------------------------------------
# Wrapper
# ---------------------------------------------------------------------------
def block_forward(x, x_rand, params, *, batch_tile=None):
    """Block forward.  x: (B,T,C); x_rand: (H,B,T,C) deterministic per-head randn."""
    B, T, C = x.shape
    H = x_rand.shape[0]
    hs = C // H

    if batch_tile is None:
        # small activation tile; prefer >= 2 grid steps so work shards across both
        # TensorCores on v7x and the xr DMA pipelines against compute.
        cap = max(1, min(B, max(1, 128 // T)))
        batch_tile = 1
        for bt in range(1, cap + 1):
            if B % bt == 0 and (B == 1 or B // bt >= 2):
                batch_tile = bt
    assert B % batch_tile == 0, (B, batch_tile)
    M = batch_tile * T
    n_steps = B // batch_tile
    assert (M % 8 == 0) or n_steps == 1, "batch_tile * T must be a multiple of 8"

    # Fold the attention scale into Wq; stack Q|K|V weights -> (H, C, 3*hs); bf16 operands.
    wq_scaled = params['wq'] * (C ** -0.5)
    wqkv = jnp.concatenate([wq_scaled, params['wk'], params['wv']],
                           axis=-1).astype(jnp.bfloat16)
    wp = params['wp'].astype(jnp.bfloat16)
    w1 = params['w1'].astype(jnp.bfloat16)
    w2 = params['w2'].astype(jnp.bfloat16)

    # Collapse batch into matmul rows (wrapper-side layout ops are free / contiguous).
    x2 = x.reshape(B * T, C)                               # f32 residual path
    xr2 = x_rand.reshape(H, B * T, C).astype(jnp.bfloat16)

    # Weights / biases: whole-array VMEM-resident (single-buffered, loaded once).
    resident = pl.BlockSpec(memory_space=pltpu.MemorySpace.VMEM)

    kernel = functools.partial(_block_kernel, seq_len=T)

    out = pl.pallas_call(
        kernel,
        out_shape=jax.ShapeDtypeStruct((B * T, C), jnp.float32),
        grid=(n_steps,),
        in_specs=[
            pl.BlockSpec((M, C), lambda i: (i, 0)),            # x rows of this batch tile
            pl.BlockSpec((H, M, C), lambda i: (0, i, 0)),      # per-head randn rows (bf16)
            resident,                                          # fused QKV weights (H,C,3hs)
            resident,                                          # proj weight (C,C)
            resident,                                          # proj bias (1,C)
            resident,                                          # ln2 gamma (1,C)
            resident,                                          # ln2 beta (1,C)
            resident,                                          # ffn w1 (C,4C)
            resident,                                          # ffn b1 (1,4C)
            resident,                                          # ffn w2 (4C,C)
            resident,                                          # ffn b2 (1,C)
        ],
        out_specs=pl.BlockSpec((M, C), lambda i: (i, 0)),      # lane-dense (C = 3*128) output
        scratch_shapes=[pltpu.VMEM((M, C), jnp.bfloat16)],     # head-concat buffer
        compiler_params=pltpu.CompilerParams(
            dimension_semantics=("parallel",),                 # batch tiles are independent
            vmem_limit_bytes=32 * 1024 * 1024,                 # explicit, fits v5e/v6e/v7x
        ),
    )(x2, xr2, wqkv, wp,
      params['bp'].reshape(1, C),
      params['ln2_g'].reshape(1, C), params['ln2_b'].reshape(1, C),
      w1, params['b1'].reshape(1, 4 * C), w2, params['b2'].reshape(1, C))
    return out.reshape(B, T, C)


# ---------------------------------------------------------------------------
# Pure-JAX (non-Pallas) reference for validation
# ---------------------------------------------------------------------------
def _reference_block(x, x_rand, p):
    HI = jax.lax.Precision.HIGHEST
    B, T, C = x.shape
    H = x_rand.shape[0]
    tri = jnp.tril(jnp.ones((T, T), dtype=bool))
    outs = []
    for h in range(H):
        xh = x_rand[h]
        q = jnp.einsum('btc,cd->btd', xh, p['wq'][h], precision=HI)
        k = jnp.einsum('btc,cd->btd', xh, p['wk'][h], precision=HI)
        v = jnp.einsum('btc,cd->btd', xh, p['wv'][h], precision=HI)
        wei = jnp.einsum('bqd,bkd->bqk', q, k, precision=HI) * (C ** -0.5)
        wei = jnp.where(tri[None], wei, -jnp.inf)
        wei = jax.nn.softmax(wei, axis=-1)
        outs.append(jnp.einsum('bqk,bkd->bqd', wei, v, precision=HI))
    cat = jnp.concatenate(outs, axis=-1)
    sa = jnp.einsum('btc,cd->btd', cat, p['wp'], precision=HI) + p['bp']
    x1 = x + sa
    mu = x1.mean(-1, keepdims=True)
    var = ((x1 - mu) ** 2).mean(-1, keepdims=True)
    hn = (x1 - mu) / jnp.sqrt(var + LN_EPS) * p['ln2_g'] + p['ln2_b']
    h1 = jnp.maximum(jnp.einsum('btc,cf->btf', hn, p['w1'], precision=HI) + p['b1'], 0.0)
    ff = jnp.einsum('btf,fc->btc', h1, p['w2'], precision=HI) + p['b2']
    return x1 + ff


if __name__ == "__main__":
    B, T, C = 2, 16, N_EMBED
    assert T <= BLOCK_SIZE

    key = jax.random.PRNGKey(0)
    ks = jax.random.split(key, 12)

    x = jax.random.normal(ks[0], (B, T, C), jnp.float32)
    # Head.forward replaces its input with torch.randn(B,T,C): reproduced deterministically,
    # one independent draw per head.
    x_rand = jax.random.normal(ks[1], (NUM_HEADS, B, T, C), jnp.float32)

    def lin_init(k, fan_in, shape):  # nn.Linear-style U(-1/sqrt(fan_in), 1/sqrt(fan_in))
        bound = 1.0 / (fan_in ** 0.5)
        return jax.random.uniform(k, shape, jnp.float32, -bound, bound)

    params = dict(
        wk=lin_init(ks[2], C, (NUM_HEADS, C, HEAD_SIZE)),
        wq=lin_init(ks[3], C, (NUM_HEADS, C, HEAD_SIZE)),
        wv=lin_init(ks[4], C, (NUM_HEADS, C, HEAD_SIZE)),
        wp=lin_init(ks[5], C, (C, C)),
        bp=lin_init(ks[6], C, (C,)),
        w1=lin_init(ks[7], C, (C, 4 * C)),
        b1=lin_init(ks[8], C, (4 * C,)),
        w2=lin_init(ks[9], 4 * C, (4 * C, C)),
        b2=lin_init(ks[10], 4 * C, (C,)),
        ln2_g=jnp.ones((C,), jnp.float32),   # nn.LayerNorm default weight
        ln2_b=jnp.zeros((C,), jnp.float32),  # nn.LayerNorm default bias
    )

    out = block_forward(x, x_rand, params)
    out = jax.block_until_ready(out)

    assert out.shape == (B, T, C), out.shape
    assert bool(jnp.all(jnp.isfinite(out)))

    ref = _reference_block(x, x_rand, params)
    max_err = float(jnp.max(jnp.abs(out - ref)))
    assert bool(jnp.allclose(out, ref, rtol=3e-2, atol=3e-2)), max_err

    print("KERNEL_OK")
</pallas_src>

<mosaic_0001>
module attributes {stable_mosaic.version = 11 : i64} {
  func.func @_block_kernel(%arg0: i32, %arg1: memref<16x384xf32, #tpu.memory_space<vmem>>, %arg2: memref<6x16x384xbf16, #tpu.memory_space<vmem>>, %arg3: memref<6x384x192xbf16, #tpu.memory_space<vmem>>, %arg4: memref<384x384xbf16, #tpu.memory_space<vmem>>, %arg5: memref<1x384xf32, #tpu.memory_space<vmem>>, %arg6: memref<1x384xf32, #tpu.memory_space<vmem>>, %arg7: memref<1x384xf32, #tpu.memory_space<vmem>>, %arg8: memref<384x1536xbf16, #tpu.memory_space<vmem>>, %arg9: memref<1x1536xf32, #tpu.memory_space<vmem>>, %arg10: memref<1536x384xbf16, #tpu.memory_space<vmem>>, %arg11: memref<1x384xf32, #tpu.memory_space<vmem>>, %arg12: memref<16x384xf32, #tpu.memory_space<vmem>>, %arg13: memref<16x384xbf16, #tpu.memory_space<vmem>>) attributes {dimension_semantics = [#tpu.dimension_semantics<parallel>], iteration_bounds = array<i64: 2>, scalar_prefetch = 0 : i64, scratch_operands = 1 : i64, tpu.core_type = #tpu.core_type<tc>, window_params = [{transform_indices = @transform_0, window_bounds = array<i64: 16, 384>}, {transform_indices = @transform_1, window_bounds = array<i64: 6, 16, 384>}, {pipeline_mode = #tpu.pipeline_mode<synchronous>, transform_indices = @transform_2, window_bounds = array<i64: 6, 384, 192>}, {pipeline_mode = #tpu.pipeline_mode<synchronous>, transform_indices = @transform_3, window_bounds = array<i64: 384, 384>}, {pipeline_mode = #tpu.pipeline_mode<synchronous>, transform_indices = @transform_4, window_bounds = array<i64: 1, 384>}, {pipeline_mode = #tpu.pipeline_mode<synchronous>, transform_indices = @transform_5, window_bounds = array<i64: 1, 384>}, {pipeline_mode = #tpu.pipeline_mode<synchronous>, transform_indices = @transform_6, window_bounds = array<i64: 1, 384>}, {pipeline_mode = #tpu.pipeline_mode<synchronous>, transform_indices = @transform_7, window_bounds = array<i64: 384, 1536>}, {pipeline_mode = #tpu.pipeline_mode<synchronous>, transform_indices = @transform_8, window_bounds = array<i64: 1, 1536>}, {pipeline_mode = #tpu.pipeline_mode<synchronous>, transform_indices = @transform_9, window_bounds = array<i64: 1536, 384>}, {pipeline_mode = #tpu.pipeline_mode<synchronous>, transform_indices = @transform_10, window_bounds = array<i64: 1, 384>}, {transform_indices = @transform_11, window_bounds = array<i64: 16, 384>}]} {
    %c0 = arith.constant 0 : index
    %c0_0 = arith.constant 0 : index
    %0 = vector.load %arg1[%c0, %c0_0] : memref<16x384xf32, #tpu.memory_space<vmem>>, vector<16x384xf32>
    %c0_1 = arith.constant 0 : index
    %c0_2 = arith.constant 0 : index
    %c0_3 = arith.constant 0 : index
    %1 = vector.load %arg2[%c0_1, %c0_2, %c0_3] : memref<6x16x384xbf16, #tpu.memory_space<vmem>>, vector<6x16x384xbf16>
    %c0_4 = arith.constant 0 : index
    %c0_5 = arith.constant 0 : index
    %c0_6 = arith.constant 0 : index
    %2 = vector.load %arg3[%c0_4, %c0_5, %c0_6] : memref<6x384x192xbf16, #tpu.memory_space<vmem>>, vector<6x384x192xbf16>
    "tpu.trace_start"() <{level = 10 : i32, message = "hmc,hcd->hmd"}> : () -> ()
    %cst = arith.constant dense<0.000000e+00> : vector<6x16x192xf32>
    %3 = tpu.matmul %1, %2, %cst {dimension_numbers = #tpu.dot_dimension_numbers<[2], [1], [1], [2], [0, 0, 0, 1, 1, 2], [0], [0]>} : vector<6x16x384xbf16>, vector<6x384x192xbf16>, vector<6x16x192xf32> -> vector<6x16x192xf32>
    "tpu.trace_stop"() : () -> ()
    %4 = vector.extract_strided_slice %3 {offsets = [0, 0, 0], sizes = [6, 16, 64], strides = [1, 1, 1]} : vector<6x16x192xf32> to vector<6x16x64xf32>
    %5 = arith.truncf %4 : vector<6x16x64xf32> to vector<6x16x64xbf16>
    %6 = vector.extract_strided_slice %3 {offsets = [0, 0, 64], sizes = [6, 16, 64], strides = [1, 1, 1]} : vector<6x16x192xf32> to vector<6x16x64xf32>
    %7 = arith.truncf %6 : vector<6x16x64xf32> to vector<6x16x64xbf16>
    %8 = vector.extract_strided_slice %3 {offsets = [0, 0, 128], sizes = [6, 16, 64], strides = [1, 1, 1]} : vector<6x16x192xf32> to vector<6x16x64xf32>
    %9 = arith.truncf %8 : vector<6x16x64xf32> to vector<6x16x64xbf16>
    %10 = tpu.iota {dimensions = array<i32: 0>} : vector<16x16xi32>
    %11 = tpu.iota {dimensions = array<i32: 1>} : vector<16x16xi32>
    %12 = arith.cmpi sge, %10, %11 : vector<16x16xi32>
    %cst_7 = arith.constant 0.000000e+00 : f32
    %cst_8 = arith.constant -1.000000e+30 : f32
    %13 = vector.broadcast %cst_7 : f32 to vector<16x16xf32>
    %14 = vector.broadcast %cst_8 : f32 to vector<16x16xf32>
    %15 = arith.select %12, %13, %14 : vector<16x16xi1>, vector<16x16xf32>
    "tpu.trace_start"() <{level = 10 : i32, message = "hqd,hkd->hqk"}> : () -> ()
    %cst_9 = arith.constant dense<0.000000e+00> : vector<6x16x16xf32>
    %16 = tpu.matmul %5, %7, %cst_9 {dimension_numbers = #tpu.dot_dimension_numbers<[2], [2], [1], [1], [0, 0, 0, 1, 1, 1], [0], [0]>} : vector<6x16x64xbf16>, vector<6x16x64xbf16>, vector<6x16x16xf32> -> vector<6x16x16xf32>
    "tpu.trace_stop"() : () -> ()
    %17 = vector.shape_cast %15 : vector<16x16xf32> to vector<1x16x16xf32>
    %18 = vector.broadcast %17 : vector<1x16x16xf32> to vector<6x16x16xf32>
    %19 = arith.addf %16, %18 : vector<6x16x16xf32>
    %cst_10 = arith.constant dense<0xFF800000> : vector<6x16xf32>
    %20 = vector.multi_reduction <maximumf>, %19, %cst_10 [2] : vector<6x16x16xf32> to vector<6x16xf32>
    %21 = vector.shape_cast %20 : vector<6x16xf32> to vector<6x16x1xf32>
    %22 = vector.broadcast %21 : vector<6x16x1xf32> to vector<6x16x16xf32>
    %23 = arith.subf %19, %22 : vector<6x16x16xf32>
    %24 = math.exp %23 : vector<6x16x16xf32>
    %cst_11 = arith.constant dense<0.000000e+00> : vector<6x16xf32>
    %25 = vector.multi_reduction <add>, %24, %cst_11 [2] : vector<6x16x16xf32> to vector<6x16xf32>
    %26 = vector.shape_cast %25 : vector<6x16xf32> to vector<6x16x1xf32>
    %27 = tpu.reciprocal %26 {approx = true} : vector<6x16x1xf32> -> vector<6x16x1xf32>
    %28 = vector.broadcast %27 : vector<6x16x1xf32> to vector<6x16x16xf32>
    %29 = arith.mulf %24, %28 : vector<6x16x16xf32>
    %30 = arith.truncf %29 : vector<6x16x16xf32> to vector<6x16x16xbf16>
    "tpu.trace_start"() <{level = 10 : i32, message = "hqk,hkd->hqd"}> : () -> ()
    %cst_12 = arith.constant dense<0.000000e+00> : vector<6x16x64xf32>
    %31 = tpu.matmul %30, %9, %cst_12 {dimension_numbers = #tpu.dot_dimension_numbers<[2], [1], [1], [2], [0, 0, 0, 1, 1, 2], [0], [0]>} : vector<6x16x16xbf16>, vector<6x16x64xbf16>, vector<6x16x64xf32> -> vector<6x16x64xf32>
    "tpu.trace_stop"() : () -> ()
    %32 = vector.extract_strided_slice %31 {offsets = [0, 0, 0], sizes = [1, 16, 64], strides = [1, 1, 1]} : vector<6x16x64xf32> to vector<1x16x64xf32>
    %33 = vector.shape_cast %32 : vector<1x16x64xf32> to vector<16x64xf32>
    %34 = arith.truncf %33 : vector<16x64xf32> to vector<16x64xbf16>
    %c0_13 = arith.constant 0 : index
    %c0_14 = arith.constant 0 : index
    %35 = vector.load %arg13[%c0_13, %c0_14] : memref<16x384xbf16, #tpu.memory_space<vmem>>, vector<16x64xbf16>
    tpu.vector_store %arg13[%c0_13, %c0_14], %34 {strides = array<i32>} : memref<16x384xbf16, #tpu.memory_space<vmem>>, vector<16x64xbf16>,
    %36 = vector.extract_strided_slice %31 {offsets = [1, 0, 0], sizes = [1, 16, 64], strides = [1, 1, 1]} : vector<6x16x64xf32> to vector<1x16x64xf32>
    %37 = vector.shape_cast %36 : vector<1x16x64xf32> to vector<16x64xf32>
    %38 = arith.truncf %37 : vector<16x64xf32> to vector<16x64xbf16>
    %c0_15 = arith.constant 0 : index
    %c64 = arith.constant 64 : index
    %39 = vector.load %arg13[%c0_15, %c64] : memref<16x384xbf16, #tpu.memory_space<vmem>>, vector<16x64xbf16>
    tpu.vector_store %arg13[%c0_15, %c64], %38 {strides = array<i32>} : memref<16x384xbf16, #tpu.memory_space<vmem>>, vector<16x64xbf16>,
    %40 = vector.extract_strided_slice %31 {offsets = [2, 0, 0], sizes = [1, 16, 64], strides = [1, 1, 1]} : vector<6x16x64xf32> to vector<1x16x64xf32>
    %41 = vector.shape_cast %40 : vector<1x16x64xf32> to vector<16x64xf32>
    %42 = arith.truncf %41 : vector<16x64xf32> to vector<16x64xbf16>
    %c0_16 = arith.constant 0 : index
    %c128 = arith.constant 128 : index
    %43 = vector.load %arg13[%c0_16, %c128] : memref<16x384xbf16, #tpu.memory_space<vmem>>, vector<16x64xbf16>
    tpu.vector_store %arg13[%c0_16, %c128], %42 {strides = array<i32>} : memref<16x384xbf16, #tpu.memory_space<vmem>>, vector<16x64xbf16>,
    %44 = vector.extract_strided_slice %31 {offsets = [3, 0, 0], sizes = [1, 16, 64], strides = [1, 1, 1]} : vector<6x16x64xf32> to vector<1x16x64xf32>
    %45 = vector.shape_cast %44 : vector<1x16x64xf32> to vector<16x64xf32>
    %46 = arith.truncf %45 : vector<16x64xf32> to vector<16x64xbf16>
    %c0_17 = arith.constant 0 : index
    %c192 = arith.constant 192 : index
    %47 = vector.load %arg13[%c0_17, %c192] : memref<16x384xbf16, #tpu.memory_space<vmem>>, vector<16x64xbf16>
    tpu.vector_store %arg13[%c0_17, %c192], %46 {strides = array<i32>} : memref<16x384xbf16, #tpu.memory_space<vmem>>, vector<16x64xbf16>,
    %48 = vector.extract_strided_slice %31 {offsets = [4, 0, 0], sizes = [1, 16, 64], strides = [1, 1, 1]} : vector<6x16x64xf32> to vector<1x16x64xf32>
    %49 = vector.shape_cast %48 : vector<1x16x64xf32> to vector<16x64xf32>
    %50 = arith.truncf %49 : vector<16x64xf32> to vector<16x64xbf16>
    %c0_18 = arith.constant 0 : index
    %c256 = arith.constant 256 : index
    %51 = vector.load %arg13[%c0_18, %c256] : memref<16x384xbf16, #tpu.memory_space<vmem>>, vector<16x64xbf16>
    tpu.vector_store %arg13[%c0_18, %c256], %50 {strides = array<i32>} : memref<16x384xbf16, #tpu.memory_space<vmem>>, vector<16x64xbf16>,
    %52 = vector.extract_strided_slice %31 {offsets = [5, 0, 0], sizes = [1, 16, 64], strides = [1, 1, 1]} : vector<6x16x64xf32> to vector<1x16x64xf32>
    %53 = vector.shape_cast %52 : vector<1x16x64xf32> to vector<16x64xf32>
    %54 = arith.truncf %53 : vector<16x64xf32> to vector<16x64xbf16>
    %c0_19 = arith.constant 0 : index
    %c320 = arith.constant 320 : index
    %55 = vector.load %arg13[%c0_19, %c320] : memref<16x384xbf16, #tpu.memory_space<vmem>>, vector<16x64xbf16>
    tpu.vector_store %arg13[%c0_19, %c320], %54 {strides = array<i32>} : memref<16x384xbf16, #tpu.memory_space<vmem>>, vector<16x64xbf16>,
    %c0_20 = arith.constant 0 : index
    %c0_21 = arith.constant 0 : index
    %56 = vector.load %arg13[%c0_20, %c0_21] : memref<16x384xbf16, #tpu.memory_space<vmem>>, vector<16x384xbf16>
    %c0_22 = arith.constant 0 : index
    %c0_23 = arith.constant 0 : index
    %57 = vector.load %arg4[%c0_22, %c0_23] : memref<384x384xbf16, #tpu.memory_space<vmem>>, vector<384x384xbf16>
    %cst_24 = arith.constant dense<0.000000e+00> : vector<16x384xf32>
    %58 = tpu.matmul %56, %57, %cst_24 {dimension_numbers = #tpu.dot_dimension_numbers<[1], [0], [0], [1], [0, 0, 1, 1], [], []>} : vector<16x384xbf16>, vector<384x384xbf16>, vector<16x384xf32> -> vector<16x384xf32>
    %c0_25 = arith.constant 0 : index
    %c0_26 = arith.constant 0 : index
    %59 = vector.load %arg5[%c0_25, %c0_26] : memref<1x384xf32, #tpu.memory_space<vmem>>, vector<1x384xf32>
    %60 = vector.broadcast %59 : vector<1x384xf32> to vector<16x384xf32>
    %61 = arith.addf %58, %60 : vector<16x384xf32>
    %62 = arith.addf %0, %61 : vector<16x384xf32>
    %cst_27 = arith.constant dense<0.000000e+00> : vector<16xf32>
    %63 = vector.multi_reduction <add>, %62, %cst_27 [1] : vector<16x384xf32> to vector<16xf32>
    %64 = vector.shape_cast %63 : vector<16xf32> to vector<16x1xf32>
    %cst_28 = arith.constant 3.840000e+02 : f32
    %65 = vector.broadcast %cst_28 : f32 to vector<16x1xf32>
    %66 = arith.divf %64, %65 : vector<16x1xf32>
    %67 = vector.broadcast %66 : vector<16x1xf32> to vector<16x384xf32>
    %68 = arith.subf %62, %67 : vector<16x384xf32>
    %69 = arith.mulf %68, %68 : vector<16x384xf32>
    %cst_29 = arith.constant dense<0.000000e+00> : vector<16xf32>
    %70 = vector.multi_reduction <add>, %69, %cst_29 [1] : vector<16x384xf32> to vector<16xf32>
    %71 = vector.shape_cast %70 : vector<16xf32> to vector<16x1xf32>
    %cst_30 = arith.constant 3.840000e+02 : f32
    %72 = vector.broadcast %cst_30 : f32 to vector<16x1xf32>
    %73 = arith.divf %71, %72 : vector<16x1xf32>
    %cst_31 = arith.constant 9.99999974E-6 : f32
    %74 = vector.broadcast %cst_31 : f32 to vector<16x1xf32>
    %75 = arith.addf %73, %74 : vector<16x1xf32>
    %76 = math.rsqrt %75 : vector<16x1xf32>
    %77 = vector.broadcast %76 : vector<16x1xf32> to vector<16x384xf32>
    %78 = arith.mulf %68, %77 : vector<16x384xf32>
    %c0_32 = arith.constant 0 : index
    %c0_33 = arith.constant 0 : index
    %79 = vector.load %arg6[%c0_32, %c0_33] : memref<1x384xf32, #tpu.memory_space<vmem>>, vector<1x384xf32>
    %80 = vector.broadcast %79 : vector<1x384xf32> to vector<16x384xf32>
    %81 = arith.mulf %78, %80 : vector<16x384xf32>
    %c0_34 = arith.constant 0 : index
    %c0_35 = arith.constant 0 : index
    %82 = vector.load %arg7[%c0_34, %c0_35] : memref<1x384xf32, #tpu.memory_space<vmem>>, vector<1x384xf32>
    %83 = vector.broadcast %82 : vector<1x384xf32> to vector<16x384xf32>
    %84 = arith.addf %81, %83 : vector<16x384xf32>
    %85 = arith.truncf %84 : vector<16x384xf32> to vector<16x384xbf16>
    %c0_36 = arith.constant 0 : index
    %c0_37 = arith.constant 0 : index
    %86 = vector.load %arg8[%c0_36, %c0_37] : memref<384x1536xbf16, #tpu.memory_space<vmem>>, vector<384x1536xbf16>
    %cst_38 = arith.constant dense<0.000000e+00> : vector<16x1536xf32>
    %87 = tpu.matmul %85, %86, %cst_38 {dimension_numbers = #tpu.dot_dimension_numbers<[1], [0], [0], [1], [0, 0, 1, 1], [], []>} : vector<16x384xbf16>, vector<384x1536xbf16>, vector<16x1536xf32> -> vector<16x1536xf32>
    %c0_39 = arith.constant 0 : index
    %c0_40 = arith.constant 0 : index
    %88 = vector.load %arg9[%c0_39, %c0_40] : memref<1x1536xf32, #tpu.memory_space<vmem>>, vector<1x1536xf32>
    %89 = vector.broadcast %88 : vector<1x1536xf32> to vector<16x1536xf32>
    %90 = arith.addf %87, %89 : vector<16x1536xf32>
    %cst_41 = arith.constant 0.000000e+00 : f32
    %91 = vector.broadcast %cst_41 : f32 to vector<16x1536xf32>
    %92 = arith.maximumf %90, %91 : vector<16x1536xf32>
    %93 = arith.truncf %92 : vector<16x1536xf32> to vector<16x1536xbf16>
    %c0_42 = arith.constant 0 : index
    %c0_43 = arith.constant 0 : index
    %94 = vector.load %arg10[%c0_42, %c0_43] : memref<1536x384xbf16, #tpu.memory_space<vmem>>, vector<1536x384xbf16>
    %cst_44 = arith.constant dense<0.000000e+00> : vector<16x384xf32>
    %95 = tpu.matmul %93, %94, %cst_44 {dimension_numbers = #tpu.dot_dimension_numbers<[1], [0], [0], [1], [0, 0, 1, 1], [], []>} : vector<16x1536xbf16>, vector<1536x384xbf16>, vector<16x384xf32> -> vector<16x384xf32>
    %c0_45 = arith.constant 0 : index
    %c0_46 = arith.constant 0 : index
    %96 = vector.load %arg11[%c0_45, %c0_46] : memref<1x384xf32, #tpu.memory_space<vmem>>, vector<1x384xf32>
    %97 = vector.broadcast %96 : vector<1x384xf32> to vector<16x384xf32>
    %98 = arith.addf %95, %97 : vector<16x384xf32>
    %99 = arith.addf %62, %98 : vector<16x384xf32>
    %c0_47 = arith.constant 0 : index
    %c0_48 = arith.constant 0 : index
    %100 = vector.load %arg12[%c0_47, %c0_48] : memref<16x384xf32, #tpu.memory_space<vmem>>, vector<16x384xf32>
    tpu.vector_store %arg12[%c0_47, %c0_48], %99 {strides = array<i32>} : memref<16x384xf32, #tpu.memory_space<vmem>>, vector<16x384xf32>,
    return
  }
  func.func @transform_0(%arg0: i32) -> (i32, i32) {
    %c0_i32 = arith.constant 0 : i32
    %c0_i32_0 = arith.constant 0 : i32
    return %arg0, %c0_i32 : i32, i32
  }
  func.func @transform_1(%arg0: i32) -> (i32, i32, i32) {
    %c0_i32 = arith.constant 0 : i32
    %c0_i32_0 = arith.constant 0 : i32
    %c0_i32_1 = arith.constant 0 : i32
    return %c0_i32, %arg0, %c0_i32_0 : i32, i32, i32
  }
  func.func @transform_2(%arg0: i32) -> (i32, i32, i32) {
    %c0_i32 = arith.constant 0 : i32
    %c0_i32_0 = arith.constant 0 : i32
    %c0_i32_1 = arith.constant 0 : i32
    %c0_i32_2 = arith.constant 0 : i32
    return %c0_i32, %c0_i32_0, %c0_i32_1 : i32, i32, i32
  }
  func.func @transform_3(%arg0: i32) -> (i32, i32) {
    %c0_i32 = arith.constant 0 : i32
    %c0_i32_0 = arith.constant 0 : i32
    %c0_i32_1 = arith.constant 0 : i32
    return %c0_i32, %c0_i32_0 : i32, i32
  }
  func.func @transform_4(%arg0: i32) -> (i32, i32) {
    %c0_i32 = arith.constant 0 : i32
    %c0_i32_0 = arith.constant 0 : i32
    %c0_i32_1 = arith.constant 0 : i32
    return %c0_i32, %c0_i32_0 : i32, i32
  }
  func.func @transform_5(%arg0: i32) -> (i32, i32) {
    %c0_i32 = arith.constant 0 : i32
    %c0_i32_0 = arith.constant 0 : i32
    %c0_i32_1 = arith.constant 0 : i32
    return %c0_i32, %c0_i32_0 : i32, i32
  }
  func.func @transform_6(%arg0: i32) -> (i32, i32) {
    %c0_i32 = arith.constant 0 : i32
    %c0_i32_0 = arith.constant 0 : i32
    %c0_i32_1 = arith.constant 0 : i32
    return %c0_i32, %c0_i32_0 : i32, i32
  }
  func.func @transform_7(%arg0: i32) -> (i32, i32) {
    %c0_i32 = arith.constant 0 : i32
    %c0_i32_0 = arith.constant 0 : i32
    %c0_i32_1 = arith.constant 0 : i32
    return %c0_i32, %c0_i32_0 : i32, i32
  }
  func.func @transform_8(%arg0: i32) -> (i32, i32) {
    %c0_i32 = arith.constant 0 : i32
    %c0_i32_0 = arith.constant 0 : i32
    %c0_i32_1 = arith.constant 0 : i32
    return %c0_i32, %c0_i32_0 : i32, i32
  }
  func.func @transform_9(%arg0: i32) -> (i32, i32) {
    %c0_i32 = arith.constant 0 : i32
    %c0_i32_0 = arith.constant 0 : i32
    %c0_i32_1 = arith.constant 0 : i32
    return %c0_i32, %c0_i32_0 : i32, i32
  }
  func.func @transform_10(%arg0: i32) -> (i32, i32) {
    %c0_i32 = arith.constant 0 : i32
    %c0_i32_0 = arith.constant 0 : i32
    %c0_i32_1 = arith.constant 0 : i32
    return %c0_i32, %c0_i32_0 : i32, i32
  }
  func.func @transform_11(%arg0: i32) -> (i32, i32) {
    %c0_i32 = arith.constant 0 : i32
    %c0_i32_0 = arith.constant 0 : i32
    return %arg0, %c0_i32 : i32, i32
  }
}

</mosaic_0001>

<bundles_post_ra>
// kernel: tpu_custom_call.1
= control target key start
LH: loop header
LB: loop body
LE: loop exit
PB: predicated region body
PF: predicated region fallthrough
CT: control target
= control target key end

     0   :  { %16 = vsyncpa [#allocation5], 0  ;;  %s14970_s0 = inlined_call_operand.vmem [shape: f32[32,384], index: 0, kind: input, shape index: {}]   ;;  %s14971_s1 = inlined_call_operand.vmem [shape: bf16[6,32,384], index: 1, kind: input, shape index: {}]   ;;  %s14972_s2 = inlined_call_operand.vmem [shape: bf16[6,384,192], index: 2, kind: input, shape index: {}]   ;;  %s14973_s3 = inlined_call_operand.vmem [shape: bf16[384,384], index: 3, kind: input, shape index: {}]   ;;  %s14974_s4 = inlined_call_operand.vmem [shape: f32[1,384], index: 4, kind: input, shape index: {}]   ;;  %s14975_s5 = inlined_call_operand.vmem [shape: f32[1,384], index: 5, kind: input, shape index: {}]   ;;  %s14976_s6 = inlined_call_operand.vmem [shape: f32[1,384], index: 6, kind: input, shape index: {}]   ;;  %s14977_s7 = inlined_call_operand.vmem [shape: bf16[384,1536], index: 7, kind: input, shape index: {}]   ;;  %s14978_s8 = inlined_call_operand.vmem [shape: f32[1,1536], index: 8, kind: input, shape index: {}]   ;;  %s14979_s9 = inlined_call_operand.hbm [shape: bf16[1536,384], index: 9, kind: input, shape index: {}]   ;;  %s14980_s10 = inlined_call_operand.vmem [shape: f32[1,384], index: 10, kind: input, shape index: {}]   ;;  %s14981_s11 = inlined_call_operand.hbm [shape: f32[32,384], index: 11, kind: output, shape index: {}]  }
   0x1   :  { %17 = vsyncpa [#allocation6], 0 }
   0x2   :  { %19 = vsyncpa [#allocation6 + $0x1], 0  ;;  %s12329_s17 = smov 0   ;;  %s12331_s18 = smov 0  }
   0x3   :  { %s12333_s19 = smov 0   ;;  %s12335_s20 = smov 0  }
   0x4 LB: > { %s12350_s21 = sadd.s32 4294967295, %s12256_s20   ;;  %s9365_s22 = sadd.s32 4294967294, %s12256_s20   ;;  %s12256_s20 = sphi %s12335_s20, %s14996_s20   ;;  %s12252_s19 = sphi %s12333_s19, %s15000_s19   ;;  %s12248_s18 = sphi %s12331_s18, %s14999_s18   ;;  %s12244_s17 = sphi %s12329_s17, %s14998_s17  }
   0x5   : > { %s12354_s23 = sadd.s32 1, %s12256_s20   ;;  %s58_s24 = sadd.s32 1, %s12252_s19 }
   0x6   : > { %14986 = sst [smem:[#allocation10_spill]] %s12354_s23  ;;  %s55_s25 = ssub.s32 %s12256_s20, %s12354_s23 }
   0x7   : > { %p65_p0 = scmp.ne.s32.totalorder %s12252_s19, %s12248_s18  ;;  %p56_p1 = scmp.eq.s32.totalorder %s55_s25, 0 }
   0x8   : > { %p66_p2 = scmp.eq.s32.totalorder %s12256_s20, 0  ;;  %p284_p3 = scmp.eq.s32.totalorder %s12350_s21, 1 }
   0x9   : > { %p289_p4 = scmp.ne.s32.totalorder %s12248_s18, %s12244_s17  ;;  %p290_p7 = scmp.eq.s32.totalorder %s9365_s22, 1 }
   0xa   : > { %s12366_s26 = scalar_select %p56_p1, %s12252_s19, %s58_s24  }
   0xb   : > { %p12368_p5 = por %p66_p2, %p65_p0  ;;  %p12372_p6 = por %p284_p3, %p65_p0 }
   0xc   : > { %14987 = sst [smem:[#allocation11_spill]] %s12366_s26  ;;  %p9366_p8 = scmp.ge.s32.totalorder %s12256_s20, 1 }
   0xd   : > { %s14989_s28 = scalar_select %p12372_p6, 1, 0 }
   0xe   : > { %p297_p9 = scmp.lt.s32.totalorder %s12256_s20, 3  ;;  %p12378_p10 = por %p290_p7, %p289_p4 }
   0xf   : > { %p10697_p11 = scmp.eq.s32.totalorder %s12350_s21, 0  ;;  %s12258_s12 = smov [#allocation4]  }
  0x10   : > { %s14990_s29 = scalar_select %p12378_p10, 1, 0 }
  0x11   : > { %p12383_p12 = pnand %p9366_p8, %p297_p9  ;;  %s330_s13 = sshll.u32 %s12258_s12, 4  ;;  %s331_s13 = int_to_ptr.vmem [resolvable:$true] %s330_s13 }
  0x12   : > { %14991 = sst [smem:[#allocation12_spill]] %s14990_s29  ;;  %s12177_s14 = scalar_lea.vmem %s331_s13, 36864 }
  0x13   : > { %p10689_p13 = pneg %p12383_p12  ;;  %p12178_p2 = scmp.ne.s32.totalorder %s331_s13, %s12177_s14 }
  0x14   : > { %p12185_p7 = scmp.lt.s32.totalorder %s331_s13, %s331_s13  ;;  %p12186_p10 = scmp.lt.s32.totalorder %s12177_s14, %s12177_s14 }
  0x15   : > { %p10690_p0 = pnand %p10697_p11, %p10689_p13 }
  0x16   : > { %p12187_p6 = por %p12186_p10, %p12185_p7 }
  0x17   : > { %p12168_p1 = pneg %p10690_p0 }
  0x19   : > { %p12180_p3 = pnand %p12178_p2, %p12168_p1 }
  0x1b   : > { %p12181_p4 = pneg %p12180_p3 }
  0x1d   : > { %p12188_p8 = pnand %p12187_p6, %p12181_p4 }
  0x1f   : > { %12191 = shalt.err (!%p12188_p8)
}
  0x20   : > { %s12259_s15 = smov 192   ;;  %s12260_s16 = smov 12  }
  0x21   : > { %10692 = dma.hbm_to_vmem [thread:$0]  (!%p10690_p0), %s14979_s9, 36864, %s331_s13, [#allocation5], %s12259_s15, %s12259_s15, %s12260_s16  }
  0x22   : > { %p9368_p9 = scmp.ge.s32.totalorder %s12256_s20, 2 }
  0x24   : > { %343 = sbr.rel (%p9368_p9) target bundleno = 60 (0x3c), region = 52 }
  0x29   : > { %356 = sbr.rel (!%p12368_p5) target bundleno = 60 (0x3c), region = 60  ;;  %s358_s25 = sand.u32 (%p12368_p5), 1, %s12252_s19  }
  0x2a   : > { %s10678_s12 = smul.u32 (%p12368_p5), 24, %s12256_s20 }
  0x2b   : > { %s10677_s14 = smul.u32 (%p12368_p5), 144, %s358_s25 }
  0x2c   : > { %s12404_s29 = scalar_lea.vmem (%p12368_p5), %s14971_s1, %s10678_s12 }
  0x2d   : > { %v379_v0 = vld [vmem:[%s12404_s29] sm:$0xff] (%p12368_p5)  ;;  %v381_v1 = vld [vmem:[%s12404_s29 + $0xc] sm:$0xff] (%p12368_p5)  ;;  %s12409_s27 = scalar_lea.vmem (%p12368_p5), [#allocation3], %s10677_s14  ;;  %v9372_v12 = vld [vmem:[%s12404_s29 + $0x8] sm:$0xf] (%p12368_p5) }
  0x2e   : > { %v383_v2 = vld [vmem:[%s12404_s29 + $0x30] sm:$0xff]  ;;  %380 = vst [vmem:[%s12409_s27] sm:$0xff] %v379_v0  ;;  %382 = vst [vmem:[%s12409_s27 + $0xc] sm:$0xff] %v381_v1  ;;  %v385_v3 = vld [vmem:[%s12404_s29 + $0x3c] sm:$0xff] }
  0x2f   : > { %384 = vst [vmem:[%s12409_s27 + $0x18] sm:$0xff] %v383_v2  ;;  %v387_v4 = vld [vmem:[%s12404_s29 + $0x60] sm:$0xff]  ;;  %v389_v5 = vld [vmem:[%s12404_s29 + $0x6c] sm:$0xff]  ;;  %386 = vst [vmem:[%s12409_s27 + $0x24] sm:$0xff] %v385_v3 }
  0x30   : > { %388 = vst [vmem:[%s12409_s27 + $0x30] sm:$0xff] %v387_v4  ;;  %390 = vst [vmem:[%s12409_s27 + $0x3c] sm:$0xff] %v389_v5  ;;  %v391_v6 = vld [vmem:[%s12404_s29 + $0x90] sm:$0xff]  ;;  %v393_v7 = vld [vmem:[%s12404_s29 + $0x9c] sm:$0xff] }
  0x31   : > { %v395_v8 = vld [vmem:[%s12404_s29 + $0xc0] sm:$0xff]  ;;  %392 = vst [vmem:[%s12409_s27 + $0x48] sm:$0xff] %v391_v6  ;;  %394 = vst [vmem:[%s12409_s27 + $0x54] sm:$0xff] %v393_v7  ;;  %v397_v9 = vld [vmem:[%s12404_s29 + $0xcc] sm:$0xff] }
  0x32   : > { %396 = vst [vmem:[%s12409_s27 + $0x60] sm:$0xff] %v395_v8  ;;  %v399_v10 = vld [vmem:[%s12404_s29 + $0xf0] sm:$0xff]  ;;  %v401_v11 = vld [vmem:[%s12404_s29 + $0xfc] sm:$0xff]  ;;  %398 = vst [vmem:[%s12409_s27 + $0x6c] sm:$0xff] %v397_v9 }
  0x33   : > { %400 = vst [vmem:[%s12409_s27 + $0x78] sm:$0xff] %v399_v10  ;;  %402 = vst [vmem:[%s12409_s27 + $0x84] sm:$0xff] %v401_v11  ;;  %v9374_v13 = vld [vmem:[%s12404_s29 + $0x14] sm:$0xf]  ;;  %v9376_v14 = vld [vmem:[%s12404_s29 + $0x38] sm:$0xf] }
  0x34   : > { %9373 = vst [vmem:[%s12409_s27 + $0x8] sm:$0xf] %v9372_v12  ;;  %9375 = vst [vmem:[%s12409_s27 + $0x14] sm:$0xf] %v9374_v13  ;;  %v9378_v15 = vld [vmem:[%s12404_s29 + $0x44] sm:$0xf] }
  0x35   : > { %9377 = vst [vmem:[%s12409_s27 + $0x20] sm:$0xf] %v9376_v14  ;;  %v9380_v16 = vld [vmem:[%s12404_s29 + $0x68] sm:$0xf]  ;;  %v9382_v17 = vld [vmem:[%s12404_s29 + $0x74] sm:$0xf] }
  0x36   : > { %9379 = vst [vmem:[%s12409_s27 + $0x2c] sm:$0xf] %v9378_v15  ;;  %9381 = vst [vmem:[%s12409_s27 + $0x38] sm:$0xf] %v9380_v16  ;;  %v9384_v18 = vld [vmem:[%s12404_s29 + $0x98] sm:$0xf] }
  0x37   : > { %9383 = vst [vmem:[%s12409_s27 + $0x44] sm:$0xf] %v9382_v17  ;;  %v9386_v19 = vld [vmem:[%s12404_s29 + $0xa4] sm:$0xf]  ;;  %v9388_v20 = vld [vmem:[%s12404_s29 + $0xc8] sm:$0xf] }
  0x38   : > { %9385 = vst [vmem:[%s12409_s27 + $0x50] sm:$0xf] %v9384_v18  ;;  %9387 = vst [vmem:[%s12409_s27 + $0x5c] sm:$0xf] %v9386_v19  ;;  %v9390_v21 = vld [vmem:[%s12404_s29 + $0xd4] sm:$0xf] }
  0x39   : > { %9389 = vst [vmem:[%s12409_s27 + $0x68] sm:$0xf] %v9388_v20  ;;  %v9392_v22 = vld [vmem:[%s12404_s29 + $0xf8] sm:$0xf]  ;;  %v9394_v23 = vld [vmem:[%s12404_s29 + $0x104] sm:$0xf] }
  0x3a   : > { %9391 = vst [vmem:[%s12409_s27 + $0x74] sm:$0xf] %v9390_v21  ;;  %9393 = vst [vmem:[%s12409_s27 + $0x80] sm:$0xf] %v9392_v22 }
  0x3b   : > { %9395 = vst [vmem:[%s12409_s27 + $0x8c] sm:$0xf] %v9394_v23 }
  0x3c PF: > { %443 = sbr.rel (%p12383_p12) target bundleno = 2851 (0xb23), region = 86  ;;  %s12459_s23 = sand.u32 (!%p12383_p12), 1, %s12248_s18  }
  0x3d   : > { %s10679_s26 = smul.u32 (!%p12383_p12), 144, %s12459_s23 }
  0x3f   : > { %s12462_s13 = scalar_lea.vmem (!%p12383_p12), [#allocation3], %s10679_s26 }
  0x41   : > { %12235 = dma.done.wait (%p10697_p11), [#allocation5], 36864  }
  0x42   : > { %12237 = vsyncadd (%p10697_p11), [#allocation5], 4294930432  ;;  %v12261_v24 = vmov 0   ;;  %v10742_v25 = vld [vmem:[%s14972_s2 + $0x74] ss:$8 sps:$4 sm:$0xff]   ;;  %s12262_s27 = smov 64  }
  0x43   : > { %1154 = vmatprep.mubr.bf16.mxu1 %v12261_v24  ;;  %v10744_v26 = vld [vmem:[%s14972_s2 + $0x174] ss:$8 sps:$4 sm:$0xff]   ;;  %1079 = vmatprep.subr.bf16.mxu0 %v10742_v25  ;;  %v10746_v27 = vld [vmem:[%s14972_s2 + $0x70] ss:$8 sps:$4 sm:$0xff]   ;;  %v10748_v29 = vld [vmem:[%s14972_s2 + $0x64] ss:$8 sps:$4 sm:$0xff]  }
  0x44   : > { %v10747_v28 = vld [vmem:[%s14972_s2 + $0x170] ss:$8 sps:$4 sm:$0xff]   ;;  %1122 = vmatprep.subr.bf16.mxu1 %v10744_v26  ;;  %1080 = vmatpush1.bf16.msra.mxu0 %v10746_v27  ;;  %v10750_v30 = vld [vmem:[%s14972_s2 + $0x164] ss:$8 sps:$4 sm:$0xff]   ;;  %v10752_v31 = vld [vmem:[%s14972_s2 + $0x60] ss:$8 sps:$4 sm:$0xff]  }
  0x45   : > { %1123 = vmatpush1.bf16.msra.mxu1 %v10747_v28  ;;  %1081 = vmatprep.subr.bf16.mxu0 %v10748_v29  ;;  %v10753_v32 = vld [vmem:[%s14972_s2 + $0x160] ss:$8 sps:$4 sm:$0xff]   ;;  %v10754_v33 = vld [vmem:[%s14972_s2 + $0x54] ss:$8 sps:$4 sm:$0xff]   ;;  %v10758_v35 = vld [vmem:[%s14972_s2 + $0x50] ss:$8 sps:$4 sm:$0xff]  }
  0x46   : > { %1124 = vmatprep.subr.bf16.mxu1 %v10750_v30  ;;  %v10756_v34 = vld [vmem:[%s14972_s2 + $0x154] ss:$8 sps:$4 sm:$0xff]   ;;  %v10759_v36 = vld [vmem:[%s14972_s2 + $0x150] ss:$8 sps:$4 sm:$0xff]   ;;  %v10760_v37 = vld [vmem:[%s14972_s2 + $0x44] ss:$8 sps:$4 sm:$0xff]  }
  0x47   : > { %v10762_v38 = vld [vmem:[%s14972_s2 + $0x144] ss:$8 sps:$4 sm:$0xff]   ;;  %v10764_v39 = vld [vmem:[%s14972_s2 + $0x40] ss:$8 sps:$4 sm:$0xff]   ;;  %v10766_v41 = vld [vmem:[%s14972_s2 + $0x34] ss:$8 sps:$4 sm:$0xff]  }
  0x48   : > { %1082 = vmatpush1.bf16.msra.mxu0 %v10752_v31  ;;  %v10765_v40 = vld [vmem:[%s14972_s2 + $0x140] ss:$8 sps:$4 sm:$0xff]   ;;  %v10768_v42 = vld [vmem:[%s14972_s2 + $0x134] ss:$8 sps:$4 sm:$0xff]   ;;  %v10770_v43 = vld [vmem:[%s14972_s2 + $0x30] ss:$8 sps:$4 sm:$0xff]  }
  0x49   : > { %1125 = vmatpush1.bf16.msra.mxu1 %v10753_v32  ;;  %1083 = vmatprep.subr.bf16.mxu0 %v10754_v33  ;;  %v10771_v44 = vld [vmem:[%s14972_s2 + $0x130] ss:$8 sps:$4 sm:$0xff]   ;;  %v10772_v45 = vld [vmem:[%s14972_s2 + $0x24] ss:$8 sps:$4 sm:$0xff]   ;;  %v10776_v47 = vld [vmem:[%s14972_s2 + $0x20] ss:$8 sps:$4 sm:$0xff]  }
  0x4a   : > { %1126 = vmatprep.subr.bf16.mxu1 %v10756_v34  ;;  %v10774_v46 = vld [vmem:[%s14972_s2 + $0x124] ss:$8 sps:$4 sm:$0xff]   ;;  %v10777_v48 = vld [vmem:[%s14972_s2 + $0x120] ss:$8 sps:$4 sm:$0xff]   ;;  %v10778_v49 = vld [vmem:[%s14972_s2 + $0x14] ss:$8 sps:$4 sm:$0xff]  }
  0x4b   : > { %v10780_v50 = vld [vmem:[%s14972_s2 + $0x114] ss:$8 sps:$4 sm:$0xff]   ;;  %v10782_v51 = vld [vmem:[%s14972_s2 + $0x10] ss:$8 sps:$4 sm:$0xff]   ;;  %v10784_v53 = vld [vmem:[%s14972_s2 + $0x4] ss:$8 sps:$4 sm:$0xff]  }
  0x4c   : > { %1084 = vmatpush1.bf16.msra.mxu0 %v10758_v35  ;;  %v10783_v52 = vld [vmem:[%s14972_s2 + $0x110] ss:$8 sps:$4 sm:$0xff]   ;;  %v10786_v54 = vld [vmem:[%s14972_s2 + $0x104] ss:$8 sps:$4 sm:$0xff]   ;;  %v10788_v55 = vld [vmem:[%s14972_s2] ss:$8 sps:$4 sm:$0xff]  }
  0x4d   : > { %1127 = vmatpush1.bf16.msra.mxu1 %v10759_v36  ;;  %1085 = vmatprep.subr.bf16.mxu0 %v10760_v37  ;;  %v10789_v56 = vld [vmem:[%s14972_s2 + $0x100] ss:$8 sps:$4 sm:$0xff]   ;;  %v10790_v57 = vld [vmem:[%s14972_s2 + $0xf4] ss:$8 sps:$4 sm:$0xff]   ;;  %v10793_v60 = vld [vmem:[%s14972_s2 + $0x1f0] ss:$8 sps:$4 sm:$0xff]  }
  0x4e   : > { %1128 = vmatprep.subr.bf16.mxu1 %v10762_v38  ;;  %v10795_v58 = vld [vmem:[%s14972_s2 + $0x1f4] ss:$8 sps:$4 sm:$0xff]   ;;  %v10796_v61 = vld [vmem:[%s14972_s2 + $0xf0] ss:$8 sps:$4 sm:$0xff]   ;;  %v10797_v62 = vld [vmem:[%s14972_s2 + $0xe4] ss:$8 sps:$4 sm:$0xff]  }
  0x4f   : > { %v10792_v59 = vld [vmem:[%s12462_s13 + $0x8] ss:$12 sps:$4 sm:$0xff]   ;;  %v10841_v11 = vld [vmem:[%s12462_s13 + $0x4] ss:$12 sps:$4 sm:$0xff]   ;;  %v10839_v30 = vld [vmem:[%s12462_s13] ss:$12 sps:$4 sm:$0xff]  }
  0x50   : > { %1086 = vmatpush1.bf16.msra.mxu0 %v10764_v39  ;;  %v10801_v63 = vld [vmem:[%s14972_s2 + $0x1e4] ss:$8 sps:$4 sm:$0xff]   ;;  %v10799_v0 = vld [vmem:[%s14972_s2 + $0x1e0] ss:$8 sps:$4 sm:$0xff]   ;;  %v10803_v2 = vld [vmem:[%s14972_s2 + $0xd4] ss:$8 sps:$4 sm:$0xff]   ;;  %1111 = vmatprep.mubr.bf16.mxu0 %v10841_v11 }
  0x51   : > { %1129 = vmatpush1.bf16.msra.mxu1 %v10765_v40  ;;  %1087 = vmatprep.subr.bf16.mxu0 %v10766_v41  ;;  %v10802_v1 = vld [vmem:[%s14972_s2 + $0xe0] ss:$8 sps:$4 sm:$0xff]   ;;  %v10807_v3 = vld [vmem:[%s14972_s2 + $0x1d4] ss:$8 sps:$4 sm:$0xff]   ;;  %v10805_v4 = vld [vmem:[%s14972_s2 + $0x1d0] ss:$8 sps:$4 sm:$0xff]  }
  0x52   : > { %1130 = vmatprep.subr.bf16.mxu1 %v10768_v42  ;;  %v10808_v5 = vld [vmem:[%s14972_s2 + $0xd0] ss:$8 sps:$4 sm:$0xff]   ;;  %v10809_v6 = vld [vmem:[%s14972_s2 + $0xc4] ss:$8 sps:$4 sm:$0xff]   ;;  %v10811_v8 = vld [vmem:[%s14972_s2 + $0x1c0] ss:$8 sps:$4 sm:$0xff]  }
  0x53   : > { %v10813_v7 = vld [vmem:[%s14972_s2 + $0x1c4] ss:$8 sps:$4 sm:$0xff]   ;;  %v10814_v9 = vld [vmem:[%s14972_s2 + $0xc0] ss:$8 sps:$4 sm:$0xff]   ;;  %v10815_v10 = vld [vmem:[%s14972_s2 + $0xb4] ss:$8 sps:$4 sm:$0xff]  }
  0x54   : > { %1088 = vmatpush1.bf16.msra.mxu0 %v10770_v43  ;;  %v10819_v12 = vld [vmem:[%s14972_s2 + $0x1b4] ss:$8 sps:$4 sm:$0xff]   ;;  %v10817_v13 = vld [vmem:[%s14972_s2 + $0x1b0] ss:$8 sps:$4 sm:$0xff]   ;;  %v10821_v15 = vld [vmem:[%s14972_s2 + $0xa4] ss:$8 sps:$4 sm:$0xff]  }
  0x55   : > { %1131 = vmatpush1.bf16.msra.mxu1 %v10771_v44  ;;  %1089 = vmatprep.subr.bf16.mxu0 %v10772_v45  ;;  %v10820_v14 = vld [vmem:[%s14972_s2 + $0xb0] ss:$8 sps:$4 sm:$0xff]   ;;  %v10825_v16 = vld [vmem:[%s14972_s2 + $0x1a4] ss:$8 sps:$4 sm:$0xff]   ;;  %v10823_v17 = vld [vmem:[%s14972_s2 + $0x1a0] ss:$8 sps:$4 sm:$0xff]  }
  0x56   : > { %1132 = vmatprep.subr.bf16.mxu1 %v10774_v46  ;;  %v10826_v18 = vld [vmem:[%s14972_s2 + $0xa0] ss:$8 sps:$4 sm:$0xff]   ;;  %v10827_v19 = vld [vmem:[%s14972_s2 + $0x94] ss:$8 sps:$4 sm:$0xff]   ;;  %v10829_v21 = vld [vmem:[%s14972_s2 + $0x190] ss:$8 sps:$4 sm:$0xff]  }
  0x57   : > { %v10831_v20 = vld [vmem:[%s14972_s2 + $0x194] ss:$8 sps:$4 sm:$0xff]   ;;  %v10832_v22 = vld [vmem:[%s14972_s2 + $0x90] ss:$8 sps:$4 sm:$0xff]   ;;  %v10833_v23 = vld [vmem:[%s14972_s2 + $0x84] ss:$8 sps:$4 sm:$0xff]  }
  0x58   : > { %1090 = vmatpush1.bf16.msra.mxu0 %v10776_v47  ;;  %v10837_v25 = vld [vmem:[%s14972_s2 + $0x184] ss:$8 sps:$4 sm:$0xff]   ;;  %v10835_v26 = vld [vmem:[%s14972_s2 + $0x180] ss:$8 sps:$4 sm:$0xff]   ;;  %v10844_v28 = vld [vmem:[%s14972_s2 + $0x274] ss:$8 sps:$4 sm:$0xff]  }
  0x59   : > { %1133 = vmatpush1.bf16.msra.mxu1 %v10777_v48  ;;  %1091 = vmatprep.subr.bf16.mxu0 %v10778_v49  ;;  %v10838_v27 = vld [vmem:[%s14972_s2 + $0x80] ss:$8 sps:$4 sm:$0xff]   ;;  %v10847_v29 = vld [vmem:[%s14972_s2 + $0x2f4] ss:$8 sps:$4 sm:$0xff]   ;;  %v10842_v31 = vld [vmem:[%s14972_s2 + $0x270] ss:$8 sps:$4 sm:$0xff]  }
  0x5a   : > { %1134 = vmatprep.subr.bf16.mxu1 %v10780_v50  ;;  %v10845_v32 = vld [vmem:[%s14972_s2 + $0x2f0] ss:$8 sps:$4 sm:$0xff]   ;;  %v10850_v33 = vld [vmem:[%s14972_s2 + $0x264] ss:$8 sps:$4 sm:$0xff]   ;;  %v10848_v35 = vld [vmem:[%s14972_s2 + $0x260] ss:$8 sps:$4 sm:$0xff]  }
  0x5b   : > { %v10853_v34 = vld [vmem:[%s14972_s2 + $0x2e4] ss:$8 sps:$4 sm:$0xff]   ;;  %v10851_v37 = vld [vmem:[%s14972_s2 + $0x2e0] ss:$8 sps:$4 sm:$0xff]   ;;  %v10856_v38 = vld [vmem:[%s14972_s2 + $0x254] ss:$8 sps:$4 sm:$0xff]  }
  0x5c   : > { %1092 = vmatpush1.bf16.msra.mxu0 %v10782_v51  ;;  %v10892_v36 = vld [vmem:[%s12462_s13 + $0x1c] ss:$12 sps:$4 sm:$0xff]   ;;  %vm12264_vm0 = vmmov 0   ;;  %vm2899_vm1 = vcmask 523264   ;;  %vm3197_vm4 = vcmask 130048   ;;  %vm3608_vm5 = vcmask 519168  }
  0x5d   : > { %1135 = vmatpush1.bf16.msra.mxu1 %v10783_v52  ;;  %1093 = vmatprep.subr.bf16.mxu0 %v10784_v53  ;;  %v10859_v39 = vld [vmem:[%s14972_s2 + $0x2d4] ss:$8 sps:$4 sm:$0xff]   ;;  %v10854_v40 = vld [vmem:[%s14972_s2 + $0x250] ss:$8 sps:$4 sm:$0xff]   ;;  %v10862_v42 = vld [vmem:[%s14972_s2 + $0x244] ss:$8 sps:$4 sm:$0xff]  }
  0x5e   : > { %1136 = vmatprep.subr.bf16.mxu1 %v10786_v54  ;;  %v10857_v41 = vld [vmem:[%s14972_s2 + $0x2d0] ss:$8 sps:$4 sm:$0xff]   ;;  %v10865_v43 = vld [vmem:[%s14972_s2 + $0x2c4] ss:$8 sps:$4 sm:$0xff]   ;;  %v10860_v44 = vld [vmem:[%s14972_s2 + $0x240] ss:$8 sps:$4 sm:$0xff]  }
  0x5f   : > { %v10863_v45 = vld [vmem:[%s14972_s2 + $0x2c0] ss:$8 sps:$4 sm:$0xff]   ;;  %v10868_v46 = vld [vmem:[%s14972_s2 + $0x234] ss:$8 sps:$4 sm:$0xff]   ;;  %v10866_v48 = vld [vmem:[%s14972_s2 + $0x230] ss:$8 sps:$4 sm:$0xff]  }
  0x60   : > { %1094 = vmatpush1.bf16.msra.mxu0 %v10788_v55  ;;  %v10871_v47 = vld [vmem:[%s14972_s2 + $0x2b4] ss:$8 sps:$4 sm:$0xff]   ;;  %v10869_v49 = vld [vmem:[%s14972_s2 + $0x2b0] ss:$8 sps:$4 sm:$0xff]   ;;  %v10874_v50 = vld [vmem:[%s14972_s2 + $0x224] ss:$8 sps:$4 sm:$0xff]  }
  0x61   : > { %1137 = vmatpush1.bf16.msra.mxu1 %v10789_v56  ;;  %1095 = vmatprep.subr.bf16.mxu0 %v10790_v57  ;;  %v10877_v51 = vld [vmem:[%s14972_s2 + $0x2a4] ss:$8 sps:$4 sm:$0xff]   ;;  %v10872_v52 = vld [vmem:[%s14972_s2 + $0x220] ss:$8 sps:$4 sm:$0xff]   ;;  %v10880_v54 = vld [vmem:[%s14972_s2 + $0x214] ss:$8 sps:$4 sm:$0xff]  }
  0x62   : > { %1421 = vmatprep.subr.bf16.mxu1 %v10795_v58  ;;  %v10875_v53 = vld [vmem:[%s14972_s2 + $0x2a0] ss:$8 sps:$4 sm:$0xff]   ;;  %v10883_v55 = vld [vmem:[%s14972_s2 + $0x294] ss:$8 sps:$4 sm:$0xff]   ;;  %v10878_v56 = vld [vmem:[%s14972_s2 + $0x210] ss:$8 sps:$4 sm:$0xff]  }
  0x63   : > { %v10881_v57 = vld [vmem:[%s14972_s2 + $0x290] ss:$8 sps:$4 sm:$0xff]   ;;  %v10886_v58 = vld [vmem:[%s14972_s2 + $0x204] ss:$8 sps:$4 sm:$0xff]   ;;  %vm3623_vm6 = vcmask 1043968   ;;  %s9398_s22 = sshll.u32 %s12350_s21, 1 }
  0x64   : > { %1155 = vmatmul.mubr.bf16.vlgmr.msra.gmra.mxu1 %v10792_v59  ;;  %1096 = vmatpush2.bf16.msra.mxu0 %v10796_v61  ;;  %v10889_v59 = vld [vmem:[%s14972_s2 + $0x284] ss:$8 sps:$4 sm:$0xff]   ;;  %v10887_v61 = vld [vmem:[%s14972_s2 + $0x280] ss:$8 sps:$4 sm:$0xff]   ;;  %v10909_v11 = vld [vmem:[%s14972_s2 + $0x450] ss:$8 sps:$4 sm:$0xff]  }
  0x65   : > { %1422 = vmatpush1.bf16.msra.mxu1 %v10793_v60  ;;  %1097 = vmatprep.subr.bf16.mxu0 %v10797_v62  ;;  %v10884_v60 = vld [vmem:[%s14972_s2 + $0x200] ss:$8 sps:$4 sm:$0xff]   ;;  %v10896_v62 = vld [vmem:[%s14972_s2 + $0x374] ss:$8 sps:$4 sm:$0xff]   ;;  %p496_p5 = scmp.lt.s32.totalorder %s9398_s22, 3  ;;  %s10680_s12 = smul.u32 48, %s12459_s23 }
  0x66   : > { %1423 = vmatprep.subr.bf16.mxu1 %v10801_v63  ;;  %1453 = vmatprep.mubr.bf16.mxu1 %v10892_v36  ;;  %v10899_v63 = vld [vmem:[%s14972_s2 + $0x474] ss:$8 sps:$4 sm:$0xff]   ;;  %v10942_v36 = vld [vmem:[%s14972_s2 + $0x3f0] ss:$8 sps:$4 sm:$0xff]   ;;  %s10682_s29 = smul.u32 768, %s12350_s21  ;;  %s9255_s21 = scalar_lea.sflag [#allocation6], %s12459_s23 }
  0x67   : > { %s15002_s22 = smov (!%p496_p5, %s9398_s22), 3  ;;  %p14993_p10 = scmp.ne.s32.totalorder %s14989_s28, 0 }
  0x68   : > { %1098 = vmatpush2.bf16.msra.mxu0 %v10802_v1  ;;  %v10893_v1 = vld [vmem:[%s12462_s13 + $0x20] ss:$12 sps:$4 sm:$0xff]   ;;  %s10681_s25 = smul.u32 24, %s15002_s22  ;;  %s14925_s16 = scalar_lea.hbm %s14981_s11, %s10682_s29 }
  0x69   : > { %1424 = vmatpush1.bf16.msra.mxu1 %v10799_v0  ;;  %1099 = vmatprep.subr.bf16.mxu0 %v10803_v2  ;;  %v10890_v0 = vld [vmem:[%s12462_s13 + $0x18] ss:$12 sps:$4 sm:$0xff]   ;;  %s12266_s24 = smov [#allocation7]  }
  0x6a   : > { %1425 = vmatprep.subr.bf16.mxu1 %v10807_v3  ;;  %v10894_v2 = vld [vmem:[%s14972_s2 + $0x370] ss:$8 sps:$4 sm:$0xff]   ;;  %s500_s14 = scalar_lea.vmem %s14970_s0, %s10681_s25 }
  0x6b   : > { %v10897_v3 = vld [vmem:[%s14972_s2 + $0x470] ss:$8 sps:$4 sm:$0xff]  }
  0x6c   : > { %1100 = vmatpush2.bf16.msra.mxu0 %v10808_v5  ;;  %v10905_v5 = vld [vmem:[%s14972_s2 + $0x464] ss:$8 sps:$4 sm:$0xff]  }
  0x6d   : > { %1426 = vmatpush1.bf16.msra.mxu1 %v10805_v4  ;;  %1101 = vmatprep.subr.bf16.mxu0 %v10809_v6  ;;  %v10902_v4 = vld [vmem:[%s14972_s2 + $0x364] ss:$8 sps:$4 sm:$0xff]   ;;  %v10900_v6 = vld [vmem:[%s14972_s2 + $0x360] ss:$8 sps:$4 sm:$0xff]  }
  0x6e   : > { %1427 = vmatprep.subr.bf16.mxu1 %v10813_v7  ;;  %v10903_v7 = vld [vmem:[%s14972_s2 + $0x460] ss:$8 sps:$4 sm:$0xff]  }
  0x70   : > { %1102 = vmatpush2.bf16.msra.mxu0 %v10814_v9  ;;  %v10911_v9 = vld [vmem:[%s14972_s2 + $0x454] ss:$8 sps:$4 sm:$0xff]  }
  0x71   : > { %1428 = vmatpush1.bf16.msra.mxu1 %v10811_v8  ;;  %1103 = vmatprep.subr.bf16.mxu0 %v10815_v10  ;;  %v10908_v8 = vld [vmem:[%s14972_s2 + $0x354] ss:$8 sps:$4 sm:$0xff]   ;;  %v10906_v10 = vld [vmem:[%s14972_s2 + $0x350] ss:$8 sps:$4 sm:$0xff]  }
  0x72   : > { %1429 = vmatprep.subr.bf16.mxu1 %v10819_v12  ;;  %v10914_v12 = vld [vmem:[%s14972_s2 + $0x344] ss:$8 sps:$4 sm:$0xff]  }
  0x74   : > { %1104 = vmatpush2.bf16.msra.mxu0 %v10820_v14  ;;  %v10912_v14 = vld [vmem:[%s14972_s2 + $0x340] ss:$8 sps:$4 sm:$0xff]  }
  0x75   : > { %1430 = vmatpush1.bf16.msra.mxu1 %v10817_v13  ;;  %1105 = vmatprep.subr.bf16.mxu0 %v10821_v15  ;;  %v10917_v13 = vld [vmem:[%s14972_s2 + $0x444] ss:$8 sps:$4 sm:$0xff]   ;;  %v10915_v15 = vld [vmem:[%s14972_s2 + $0x440] ss:$8 sps:$4 sm:$0xff]  }
  0x76   : > { %1431 = vmatprep.subr.bf16.mxu1 %v10825_v16  ;;  %v10920_v16 = vld [vmem:[%s14972_s2 + $0x334] ss:$8 sps:$4 sm:$0xff]  }
  0x78   : > { %1106 = vmatpush2.bf16.msra.mxu0 %v10826_v18  ;;  %v10918_v18 = vld [vmem:[%s14972_s2 + $0x330] ss:$8 sps:$4 sm:$0xff]  }
  0x79   : > { %1432 = vmatpush1.bf16.msra.mxu1 %v10823_v17  ;;  %1107 = vmatprep.subr.bf16.mxu0 %v10827_v19  ;;  %v10923_v17 = vld [vmem:[%s14972_s2 + $0x434] ss:$8 sps:$4 sm:$0xff]   ;;  %v10921_v19 = vld [vmem:[%s14972_s2 + $0x430] ss:$8 sps:$4 sm:$0xff]  }
  0x7a   : > { %1433 = vmatprep.subr.bf16.mxu1 %v10831_v20  ;;  %v10926_v20 = vld [vmem:[%s14972_s2 + $0x324] ss:$8 sps:$4 sm:$0xff]  }
  0x7c   : > { %1108 = vmatpush2.bf16.msra.mxu0 %v10832_v22  ;;  %v10993_v22 = vld [vmem:[%s12462_s13 + $0x34] ss:$12 sps:$4 sm:$0xff]  }
  0x7d   : > { %1434 = vmatpush1.bf16.msra.mxu1 %v10829_v21  ;;  %1109 = vmatprep.subr.bf16.mxu0 %v10833_v23  ;;  %v10929_v21 = vld [vmem:[%s14972_s2 + $0x424] ss:$8 sps:$4 sm:$0xff]   ;;  %v10924_v23 = vld [vmem:[%s14972_s2 + $0x320] ss:$8 sps:$4 sm:$0xff]  }
  0x7e   : > { %1435 = vmatprep.subr.bf16.mxu1 %v10837_v25  ;;  %v10927_v25 = vld [vmem:[%s14972_s2 + $0x420] ss:$8 sps:$4 sm:$0xff]  }
  0x80   : > { %1110 = vmatpush2.bf16.msra.mxu0 %v10838_v27  ;;  %v10935_v27 = vld [vmem:[%s14972_s2 + $0x414] ss:$8 sps:$4 sm:$0xff]  }
  0x81   : > { %1436 = vmatpush1.bf16.msra.mxu1 %v10835_v26  ;;  %1464 = vmatprep.subr.bf16.mxu0 %v10847_v29  ;;  %v10932_v26 = vld [vmem:[%s14972_s2 + $0x314] ss:$8 sps:$4 sm:$0xff]   ;;  %v10933_v29 = vld [vmem:[%s14972_s2 + $0x410] ss:$8 sps:$4 sm:$0xff]  }
  0x82   : > { %1437 = vmatprep.subr.bf16.mxu1 %v10844_v28  ;;  %v10930_v28 = vld [vmem:[%s14972_s2 + $0x310] ss:$8 sps:$4 sm:$0xff]  }
  0x83   : > { %1112 = vmatmul.mubr.bf16.vlgmr.msra.gmra.mxu0 %v10839_v30  ;;  %v10938_v30 = vld [vmem:[%s14972_s2 + $0x304] ss:$8 sps:$4 sm:$0xff]  }
  0x84   : > { %1465 = vmatpush1.bf16.msra.mxu0 %v10845_v32  ;;  %1496 = vmatprep.mubr.bf16.mxu0 %v12261_v24  ;;  %v10936_v32 = vld [vmem:[%s14972_s2 + $0x300] ss:$8 sps:$4 sm:$0xff]  }
  0x85   : > { %1438 = vmatpush2.bf16.msra.mxu1 %v10842_v31  ;;  %1466 = vmatprep.subr.bf16.mxu0 %v10853_v34  ;;  %v10941_v31 = vld [vmem:[%s14972_s2 + $0x404] ss:$8 sps:$4 sm:$0xff]   ;;  %v10944_v34 = vld [vmem:[%s14972_s2 + $0x3f4] ss:$8 sps:$4 sm:$0xff]  }
  0x86   : > { %1439 = vmatprep.subr.bf16.mxu1 %v10850_v33  ;;  %v10939_v33 = vld [vmem:[%s14972_s2 + $0x400] ss:$8 sps:$4 sm:$0xff]  }
  0x88   : > { %1467 = vmatpush1.bf16.msra.mxu0 %v10851_v37  ;;  %v10945_v37 = vld [vmem:[%s12462_s13 + $0x38] ss:$12 sps:$4 sm:$0xff]  }
  0x89   : > { %1440 = vmatpush2.bf16.msra.mxu1 %v10848_v35  ;;  %1468 = vmatprep.subr.bf16.mxu0 %v10859_v39  ;;  %v10948_v35 = vld [vmem:[%s14972_s2 + $0x4f4] ss:$8 sps:$4 sm:$0xff]   ;;  %v10951_v39 = vld [vmem:[%s14972_s2 + $0x3e4] ss:$8 sps:$4 sm:$0xff]  }
  0x8a   : > { %1441 = vmatprep.subr.bf16.mxu1 %v10856_v38  ;;  %v10946_v38 = vld [vmem:[%s14972_s2 + $0x4f0] ss:$8 sps:$4 sm:$0xff]  }
  0x8c   : > { %1469 = vmatpush1.bf16.msra.mxu0 %v10857_v41  ;;  %v10949_v41 = vld [vmem:[%s14972_s2 + $0x3e0] ss:$8 sps:$4 sm:$0xff]  }
  0x8d   : > { %1442 = vmatpush2.bf16.msra.mxu1 %v10854_v40  ;;  %1470 = vmatprep.subr.bf16.mxu0 %v10865_v43  ;;  %v10954_v40 = vld [vmem:[%s14972_s2 + $0x4e4] ss:$8 sps:$4 sm:$0xff]   ;;  %v10957_v43 = vld [vmem:[%s14972_s2 + $0x3d4] ss:$8 sps:$4 sm:$0xff]  }
  0x8e   : > { %1443 = vmatprep.subr.bf16.mxu1 %v10862_v42  ;;  %v10952_v42 = vld [vmem:[%s14972_s2 + $0x4e0] ss:$8 sps:$4 sm:$0xff]  }
  0x90   : > { %1471 = vmatpush1.bf16.msra.mxu0 %v10863_v45  ;;  %v10955_v45 = vld [vmem:[%s14972_s2 + $0x3d0] ss:$8 sps:$4 sm:$0xff]  }
  0x91   : > { %1444 = vmatpush2.bf16.msra.mxu1 %v10860_v44  ;;  %1472 = vmatprep.subr.bf16.mxu0 %v10871_v47  ;;  %v10960_v44 = vld [vmem:[%s14972_s2 + $0x4d4] ss:$8 sps:$4 sm:$0xff]   ;;  %v10963_v47 = vld [vmem:[%s14972_s2 + $0x3c4] ss:$8 sps:$4 sm:$0xff]  }
  0x92   : > { %1445 = vmatprep.subr.bf16.mxu1 %v10868_v46  ;;  %v10958_v46 = vld [vmem:[%s14972_s2 + $0x4d0] ss:$8 sps:$4 sm:$0xff]  }
  0x94   : > { %1473 = vmatpush1.bf16.msra.mxu0 %v10869_v49  ;;  %v10966_v49 = vld [vmem:[%s14972_s2 + $0x4c4] ss:$8 sps:$4 sm:$0xff]  }
  0x95   : > { %1446 = vmatpush2.bf16.msra.mxu1 %v10866_v48  ;;  %1474 = vmatprep.subr.bf16.mxu0 %v10877_v51  ;;  %v11044_v48 = vld [vmem:[%s12462_s13 + $0x4c] ss:$12 sps:$4 sm:$0xff]  }
  0x96   : > { %1447 = vmatprep.subr.bf16.mxu1 %v10874_v50  ;;  %v10961_v50 = vld [vmem:[%s14972_s2 + $0x3c0] ss:$8 sps:$4 sm:$0xff]  }
  0x97   : > { %v10964_v51 = vld [vmem:[%s14972_s2 + $0x4c0] ss:$8 sps:$4 sm:$0xff]  }
  0x98   : > { %1475 = vmatpush1.bf16.msra.mxu0 %v10875_v53  ;;  %v10972_v53 = vld [vmem:[%s14972_s2 + $0x4b4] ss:$8 sps:$4 sm:$0xff]  }
  0x99   : > { %1448 = vmatpush2.bf16.msra.mxu1 %v10872_v52  ;;  %1476 = vmatprep.subr.bf16.mxu0 %v10883_v55  ;;  %v10969_v52 = vld [vmem:[%s14972_s2 + $0x3b4] ss:$8 sps:$4 sm:$0xff]   ;;  %v10970_v55 = vld [vmem:[%s14972_s2 + $0x4b0] ss:$8 sps:$4 sm:$0xff]  }
  0x9a   : > { %1449 = vmatprep.subr.bf16.mxu1 %v10880_v54  ;;  %v10967_v54 = vld [vmem:[%s14972_s2 + $0x3b0] ss:$8 sps:$4 sm:$0xff]  }
  0x9c   : > { %1477 = vmatpush1.bf16.msra.mxu0 %v10881_v57  ;;  %v10978_v57 = vld [vmem:[%s14972_s2 + $0x4a4] ss:$8 sps:$4 sm:$0xff]  }
  0x9d   : > { %1450 = vmatpush2.bf16.msra.mxu1 %v10878_v56  ;;  %1478 = vmatprep.subr.bf16.mxu0 %v10889_v59  ;;  %v10975_v56 = vld [vmem:[%s14972_s2 + $0x3a4] ss:$8 sps:$4 sm:$0xff]   ;;  %v10976_v59 = vld [vmem:[%s14972_s2 + $0x4a0] ss:$8 sps:$4 sm:$0xff]  }
  0x9e   : > { %1451 = vmatprep.subr.bf16.mxu1 %v10886_v58  ;;  %v10973_v58 = vld [vmem:[%s14972_s2 + $0x3a0] ss:$8 sps:$4 sm:$0xff]  }
  0xa0   : > { %1479 = vmatpush1.bf16.msra.mxu0 %v10887_v61  ;;  %v10984_v61 = vld [vmem:[%s14972_s2 + $0x494] ss:$8 sps:$4 sm:$0xff]  }
  0xa1   : > { %1452 = vmatpush2.bf16.msra.mxu1 %v10884_v60  ;;  %1763 = vmatprep.subr.bf16.mxu0 %v10896_v62  ;;  %v10981_v60 = vld [vmem:[%s14972_s2 + $0x394] ss:$8 sps:$4 sm:$0xff]   ;;  %v10979_v62 = vld [vmem:[%s14972_s2 + $0x390] ss:$8 sps:$4 sm:$0xff]  }
  0xa2   : > { %1806 = vmatprep.subr.bf16.mxu1 %v10899_v63  ;;  %v10982_v63 = vld [vmem:[%s14972_s2 + $0x490] ss:$8 sps:$4 sm:$0xff]  }
  0xa3   : > { %1497 = vmatmul.mubr.bf16.vlgmr.msra.gmra.mxu0 %v10893_v1  ;;  %v10990_v1 = vld [vmem:[%s14972_s2 + $0x484] ss:$8 sps:$4 sm:$0xff]  }
  0xa4   : > { %1454 = vmatmul.mubr.bf16.vlgmr.msra.gmra.mxu1 %v10890_v0  ;;  %1764 = vmatpush1.bf16.msra.mxu0 %v10894_v2  ;;  %v10987_v0 = vld [vmem:[%s14972_s2 + $0x384] ss:$8 sps:$4 sm:$0xff]   ;;  %v10985_v2 = vld [vmem:[%s14972_s2 + $0x380] ss:$8 sps:$4 sm:$0xff]  }
  0xa5   : > { %1807 = vmatpush1.bf16.msra.mxu1 %v10897_v3  ;;  %1765 = vmatprep.subr.bf16.mxu0 %v10902_v4  ;;  %v10988_v3 = vld [vmem:[%s14972_s2 + $0x480] ss:$8 sps:$4 sm:$0xff]   ;;  %v10996_v4 = vld [vmem:[%s14972_s2 + $0x574] ss:$8 sps:$4 sm:$0xff]  }
  0xa6   : > { %1808 = vmatprep.subr.bf16.mxu1 %v10905_v5  ;;  %1838 = vmatprep.mubr.bf16.mxu1 %v12261_v24  ;;  %v10999_v5 = vld [vmem:[%s14972_s2 + $0x5f4] ss:$8 sps:$4 sm:$0xff]  }
  0xa7   : > { %1795 = vmatprep.mubr.bf16.mxu0 %v10993_v22  ;;  %v11023_v22 = vld [vmem:[%s14972_s2 + $0x5b4] ss:$8 sps:$4 sm:$0xff]  }
  0xa8   : > { %1766 = vmatpush1.bf16.msra.mxu0 %v10900_v6  ;;  %v10991_v6 = vld [vmem:[%s12462_s13 + $0x30] ss:$12 sps:$4 sm:$0xff]  }
  0xa9   : > { %1809 = vmatpush1.bf16.msra.mxu1 %v10903_v7  ;;  %1767 = vmatprep.subr.bf16.mxu0 %v10908_v8  ;;  %v10994_v7 = vld [vmem:[%s14972_s2 + $0x570] ss:$8 sps:$4 sm:$0xff]  }
  0xaa   : > { %1810 = vmatprep.subr.bf16.mxu1 %v10911_v9  ;;  %v10997_v8 = vld [vmem:[%s14972_s2 + $0x5f0] ss:$8 sps:$4 sm:$0xff]   ;;  %v11002_v9 = vld [vmem:[%s14972_s2 + $0x564] ss:$8 sps:$4 sm:$0xff]  }
  0xac   : > { %1768 = vmatpush1.bf16.msra.mxu0 %v10906_v10  ;;  %v11005_v10 = vld [vmem:[%s14972_s2 + $0x5e4] ss:$8 sps:$4 sm:$0xff]  }
  0xad   : > { %1811 = vmatpush1.bf16.msra.mxu1 %v10909_v11  ;;  %1769 = vmatprep.subr.bf16.mxu0 %v10914_v12  ;;  %v11000_v11 = vld [vmem:[%s14972_s2 + $0x560] ss:$8 sps:$4 sm:$0xff]  }
  0xae   : > { %1812 = vmatprep.subr.bf16.mxu1 %v10917_v13  ;;  %v11003_v12 = vld [vmem:[%s14972_s2 + $0x5e0] ss:$8 sps:$4 sm:$0xff]   ;;  %v11008_v13 = vld [vmem:[%s14972_s2 + $0x554] ss:$8 sps:$4 sm:$0xff]  }
  0xb0   : > { %1770 = vmatpush1.bf16.msra.mxu0 %v10912_v14  ;;  %v11011_v14 = vld [vmem:[%s14972_s2 + $0x5d4] ss:$8 sps:$4 sm:$0xff]  }
  0xb1   : > { %1813 = vmatpush1.bf16.msra.mxu1 %v10915_v15  ;;  %1771 = vmatprep.subr.bf16.mxu0 %v10920_v16  ;;  %v11006_v15 = vld [vmem:[%s14972_s2 + $0x550] ss:$8 sps:$4 sm:$0xff]  }
  0xb2   : > { %1814 = vmatprep.subr.bf16.mxu1 %v10923_v17  ;;  %v11009_v16 = vld [vmem:[%s14972_s2 + $0x5d0] ss:$8 sps:$4 sm:$0xff]   ;;  %v11014_v17 = vld [vmem:[%s14972_s2 + $0x544] ss:$8 sps:$4 sm:$0xff]  }
  0xb4   : > { %1772 = vmatpush1.bf16.msra.mxu0 %v10918_v18  ;;  %v11017_v18 = vld [vmem:[%s14972_s2 + $0x5c4] ss:$8 sps:$4 sm:$0xff]  }
  0xb5   : > { %1815 = vmatpush1.bf16.msra.mxu1 %v10921_v19  ;;  %1773 = vmatprep.subr.bf16.mxu0 %v10926_v20  ;;  %v11012_v19 = vld [vmem:[%s14972_s2 + $0x540] ss:$8 sps:$4 sm:$0xff]  }
  0xb6   : > { %1816 = vmatprep.subr.bf16.mxu1 %v10929_v21  ;;  %v11015_v20 = vld [vmem:[%s14972_s2 + $0x5c0] ss:$8 sps:$4 sm:$0xff]   ;;  %v11020_v21 = vld [vmem:[%s14972_s2 + $0x534] ss:$8 sps:$4 sm:$0xff]  }
  0xb8   : > { %1774 = vmatpush1.bf16.msra.mxu0 %v10924_v23  ;;  %v11018_v23 = vld [vmem:[%s14972_s2 + $0x530] ss:$8 sps:$4 sm:$0xff]  }
  0xb9   : > { %1817 = vmatpush1.bf16.msra.mxu1 %v10927_v25  ;;  %1775 = vmatprep.subr.bf16.mxu0 %v10932_v26  ;;  %v11021_v25 = vld [vmem:[%s14972_s2 + $0x5b0] ss:$8 sps:$4 sm:$0xff]   ;;  %v11026_v26 = vld [vmem:[%s14972_s2 + $0x524] ss:$8 sps:$4 sm:$0xff]  }
  0xba   : > { %1818 = vmatprep.subr.bf16.mxu1 %v10935_v27  ;;  %v11029_v27 = vld [vmem:[%s14972_s2 + $0x5a4] ss:$8 sps:$4 sm:$0xff]  }
  0xbc   : > { %1776 = vmatpush1.bf16.msra.mxu0 %v10930_v28  ;;  %v11024_v28 = vld [vmem:[%s14972_s2 + $0x520] ss:$8 sps:$4 sm:$0xff]  }
  0xbd   : > { %1819 = vmatpush1.bf16.msra.mxu1 %v10933_v29  ;;  %1777 = vmatprep.subr.bf16.mxu0 %v10938_v30  ;;  %v11027_v29 = vld [vmem:[%s14972_s2 + $0x5a0] ss:$8 sps:$4 sm:$0xff]   ;;  %v11032_v30 = vld [vmem:[%s14972_s2 + $0x514] ss:$8 sps:$4 sm:$0xff]  }
  0xbe   : > { %1820 = vmatprep.subr.bf16.mxu1 %v10941_v31  ;;  %v11035_v31 = vld [vmem:[%s14972_s2 + $0x594] ss:$8 sps:$4 sm:$0xff]  }
  0xc0   : > { %1778 = vmatpush1.bf16.msra.mxu0 %v10936_v32  ;;  %v11030_v32 = vld [vmem:[%s14972_s2 + $0x510] ss:$8 sps:$4 sm:$0xff]  }
  0xc1   : > { %1821 = vmatpush1.bf16.msra.mxu1 %v10939_v33  ;;  %1779 = vmatprep.subr.bf16.mxu0 %v10944_v34  ;;  %v11033_v33 = vld [vmem:[%s14972_s2 + $0x590] ss:$8 sps:$4 sm:$0xff]   ;;  %v11038_v34 = vld [vmem:[%s14972_s2 + $0x504] ss:$8 sps:$4 sm:$0xff]  }
  0xc2   : > { %2105 = vmatprep.subr.bf16.mxu1 %v10948_v35  ;;  %v11041_v35 = vld [vmem:[%s14972_s2 + $0x584] ss:$8 sps:$4 sm:$0xff]  }
  0xc4   : > { %1839 = vmatmul.mubr.bf16.vlgmr.msra.gmra.mxu1 %v10945_v37  ;;  %1780 = vmatpush2.bf16.msra.mxu0 %v10942_v36  ;;  %v11036_v36 = vld [vmem:[%s14972_s2 + $0x500] ss:$8 sps:$4 sm:$0xff]  }
  0xc5   : > { %2106 = vmatpush1.bf16.msra.mxu1 %v10946_v38  ;;  %1781 = vmatprep.subr.bf16.mxu0 %v10951_v39  ;;  %v11039_v37 = vld [vmem:[%s14972_s2 + $0x580] ss:$8 sps:$4 sm:$0xff]   ;;  %v11048_v38 = vld [vmem:[%s14972_s2 + $0x674] ss:$8 sps:$4 sm:$0xff]  }
  0xc6   : > { %2107 = vmatprep.subr.bf16.mxu1 %v10954_v40  ;;  %2137 = vmatprep.mubr.bf16.mxu1 %v11044_v48  ;;  %v11051_v39 = vld [vmem:[%s14972_s2 + $0x774] ss:$8 sps:$4 sm:$0xff]   ;;  %v11055_v48 = vld [vmem:[%s14972_s2 + $0x760] ss:$8 sps:$4 sm:$0xff]  }
  0xc7   : > { %v11042_v40 = vld [vmem:[%s12462_s13 + $0x48] ss:$12 sps:$4 sm:$0xff]  }
  0xc8   : > { %1782 = vmatpush2.bf16.msra.mxu0 %v10949_v41  ;;  %v11045_v41 = vld [vmem:[%s12462_s13 + $0x50] ss:$12 sps:$4 sm:$0xff]  }
  0xc9   : > { %2108 = vmatpush1.bf16.msra.mxu1 %v10952_v42  ;;  %1783 = vmatprep.subr.bf16.mxu0 %v10957_v43  ;;  %v11046_v42 = vld [vmem:[%s14972_s2 + $0x670] ss:$8 sps:$4 sm:$0xff]  }
  0xca   : > { %2109 = vmatprep.subr.bf16.mxu1 %v10960_v44  ;;  %v11049_v43 = vld [vmem:[%s14972_s2 + $0x770] ss:$8 sps:$4 sm:$0xff]   ;;  %v11054_v44 = vld [vmem:[%s14972_s2 + $0x664] ss:$8 sps:$4 sm:$0xff]  }
  0xcc   : > { %1784 = vmatpush2.bf16.msra.mxu0 %v10955_v45  ;;  %v11057_v45 = vld [vmem:[%s14972_s2 + $0x764] ss:$8 sps:$4 sm:$0xff]  }
  0xcd   : > { %2110 = vmatpush1.bf16.msra.mxu1 %v10958_v46  ;;  %1785 = vmatprep.subr.bf16.mxu0 %v10963_v47  ;;  %v11145_v46 = vld [vmem:[%s12462_s13 + $0x64] ss:$12 sps:$4 sm:$0xff]  }
  0xce   : > { %2111 = vmatprep.subr.bf16.mxu1 %v10966_v49  ;;  %v11052_v47 = vld [vmem:[%s14972_s2 + $0x660] ss:$8 sps:$4 sm:$0xff]   ;;  %v11060_v49 = vld [vmem:[%s14972_s2 + $0x654] ss:$8 sps:$4 sm:$0xff]  }
  0xd0   : > { %1786 = vmatpush2.bf16.msra.mxu0 %v10961_v50  ;;  %v11063_v50 = vld [vmem:[%s14972_s2 + $0x754] ss:$8 sps:$4 sm:$0xff]  }
  0xd1   : > { %2112 = vmatpush1.bf16.msra.mxu1 %v10964_v51  ;;  %1787 = vmatprep.subr.bf16.mxu0 %v10969_v52  ;;  %v11058_v51 = vld [vmem:[%s14972_s2 + $0x650] ss:$8 sps:$4 sm:$0xff]  }
  0xd2   : > { %2113 = vmatprep.subr.bf16.mxu1 %v10972_v53  ;;  %v11061_v52 = vld [vmem:[%s14972_s2 + $0x750] ss:$8 sps:$4 sm:$0xff]   ;;  %v11066_v53 = vld [vmem:[%s14972_s2 + $0x644] ss:$8 sps:$4 sm:$0xff]  }
  0xd4   : > { %1788 = vmatpush2.bf16.msra.mxu0 %v10967_v54  ;;  %v11069_v54 = vld [vmem:[%s14972_s2 + $0x744] ss:$8 sps:$4 sm:$0xff]  }
  0xd5   : > { %2114 = vmatpush1.bf16.msra.mxu1 %v10970_v55  ;;  %1789 = vmatprep.subr.bf16.mxu0 %v10975_v56  ;;  %v11064_v55 = vld [vmem:[%s14972_s2 + $0x640] ss:$8 sps:$4 sm:$0xff]  }
  0xd6   : > { %2115 = vmatprep.subr.bf16.mxu1 %v10978_v57  ;;  %v11067_v56 = vld [vmem:[%s14972_s2 + $0x740] ss:$8 sps:$4 sm:$0xff]   ;;  %v11072_v57 = vld [vmem:[%s14972_s2 + $0x634] ss:$8 sps:$4 sm:$0xff]  }
  0xd8   : > { %1790 = vmatpush2.bf16.msra.mxu0 %v10973_v58  ;;  %v11075_v58 = vld [vmem:[%s14972_s2 + $0x734] ss:$8 sps:$4 sm:$0xff]  }
  0xd9   : > { %2116 = vmatpush1.bf16.msra.mxu1 %v10976_v59  ;;  %1791 = vmatprep.subr.bf16.mxu0 %v10981_v60  ;;  %v11070_v59 = vld [vmem:[%s14972_s2 + $0x630] ss:$8 sps:$4 sm:$0xff]  }
  0xda   : > { %2117 = vmatprep.subr.bf16.mxu1 %v10984_v61  ;;  %v11073_v60 = vld [vmem:[%s14972_s2 + $0x730] ss:$8 sps:$4 sm:$0xff]   ;;  %v11078_v61 = vld [vmem:[%s14972_s2 + $0x624] ss:$8 sps:$4 sm:$0xff]  }
  0xdc   : > { %1792 = vmatpush2.bf16.msra.mxu0 %v10979_v62  ;;  %v11081_v62 = vld [vmem:[%s14972_s2 + $0x724] ss:$8 sps:$4 sm:$0xff]  }
  0xdd   : > { %2118 = vmatpush1.bf16.msra.mxu1 %v10982_v63  ;;  %1793 = vmatprep.subr.bf16.mxu0 %v10987_v0  ;;  %v11076_v63 = vld [vmem:[%s14972_s2 + $0x620] ss:$8 sps:$4 sm:$0xff]  }
  0xde   : > { %2119 = vmatprep.subr.bf16.mxu1 %v10990_v1  ;;  %v11079_v0 = vld [vmem:[%s14972_s2 + $0x720] ss:$8 sps:$4 sm:$0xff]   ;;  %v11084_v1 = vld [vmem:[%s14972_s2 + $0x614] ss:$8 sps:$4 sm:$0xff]  }
  0xe0   : > { %1794 = vmatpush2.bf16.msra.mxu0 %v10985_v2  ;;  %v11087_v2 = vld [vmem:[%s14972_s2 + $0x714] ss:$8 sps:$4 sm:$0xff]  }
  0xe1   : > { %2120 = vmatpush1.bf16.msra.mxu1 %v10988_v3  ;;  %2148 = vmatprep.subr.bf16.mxu0 %v10999_v5  ;;  %v11082_v3 = vld [vmem:[%s14972_s2 + $0x610] ss:$8 sps:$4 sm:$0xff]   ;;  %v11090_v5 = vld [vmem:[%s14972_s2 + $0x604] ss:$8 sps:$4 sm:$0xff]  }
  0xe2   : > { %2121 = vmatprep.subr.bf16.mxu1 %v10996_v4  ;;  %v11085_v4 = vld [vmem:[%s14972_s2 + $0x710] ss:$8 sps:$4 sm:$0xff]  }
  0xe3   : > { %1796 = vmatmul.mubr.bf16.vlgmr.msra.gmra.mxu0 %v10991_v6  ;;  %v11093_v6 = vld [vmem:[%s14972_s2 + $0x704] ss:$8 sps:$4 sm:$0xff]  }
  0xe4   : > { %2149 = vmatpush1.bf16.msra.mxu0 %v10997_v8  ;;  %2180 = vmatprep.mubr.bf16.mxu0 %v12261_v24  ;;  %v11091_v8 = vld [vmem:[%s14972_s2 + $0x700] ss:$8 sps:$4 sm:$0xff]  }
  0xe5   : > { %2122 = vmatpush2.bf16.msra.mxu1 %v10994_v7  ;;  %2150 = vmatprep.subr.bf16.mxu0 %v11005_v10  ;;  %v11088_v7 = vld [vmem:[%s14972_s2 + $0x600] ss:$8 sps:$4 sm:$0xff]   ;;  %v11100_v10 = vld [vmem:[%s14972_s2 + $0x7f4] ss:$8 sps:$4 sm:$0xff]  }
  0xe6   : > { %2123 = vmatprep.subr.bf16.mxu1 %v11002_v9  ;;  %v11096_v9 = vld [vmem:[%s14972_s2 + $0x6f4] ss:$8 sps:$4 sm:$0xff]  }
  0xe8   : > { %2151 = vmatpush1.bf16.msra.mxu0 %v11003_v12  ;;  %v11094_v12 = vld [vmem:[%s14972_s2 + $0x6f0] ss:$8 sps:$4 sm:$0xff]  }
  0xe9   : > { %2124 = vmatpush2.bf16.msra.mxu1 %v11000_v11  ;;  %2152 = vmatprep.subr.bf16.mxu0 %v11011_v14  ;;  %v11097_v11 = vld [vmem:[%s12462_s13 + $0x68] ss:$12 sps:$4 sm:$0xff]  }
  0xea   : > { %2125 = vmatprep.subr.bf16.mxu1 %v11008_v13  ;;  %v11098_v13 = vld [vmem:[%s14972_s2 + $0x7f0] ss:$8 sps:$4 sm:$0xff]   ;;  %v11103_v14 = vld [vmem:[%s14972_s2 + $0x6e4] ss:$8 sps:$4 sm:$0xff]  }
  0xec   : > { %2153 = vmatpush1.bf16.msra.mxu0 %v11009_v16  ;;  %v11196_v16 = vld [vmem:[%s12462_s13 + $0x7c] ss:$12 sps:$4 sm:$0xff]  }
  0xed   : > { %2126 = vmatpush2.bf16.msra.mxu1 %v11006_v15  ;;  %2154 = vmatprep.subr.bf16.mxu0 %v11017_v18  ;;  %v11106_v15 = vld [vmem:[%s14972_s2 + $0x7e4] ss:$8 sps:$4 sm:$0xff]   ;;  %v11104_v18 = vld [vmem:[%s14972_s2 + $0x7e0] ss:$8 sps:$4 sm:$0xff]  }
  0xee   : > { %2127 = vmatprep.subr.bf16.mxu1 %v11014_v17  ;;  %v11101_v17 = vld [vmem:[%s14972_s2 + $0x6e0] ss:$8 sps:$4 sm:$0xff]  }
  0xf0   : > { %2155 = vmatpush1.bf16.msra.mxu0 %v11015_v20  ;;  %v11112_v20 = vld [vmem:[%s14972_s2 + $0x7d4] ss:$8 sps:$4 sm:$0xff]  }
  0xf1   : > { %2128 = vmatpush2.bf16.msra.mxu1 %v11012_v19  ;;  %2156 = vmatprep.subr.bf16.mxu0 %v11023_v22  ;;  %v11109_v19 = vld [vmem:[%s14972_s2 + $0x6d4] ss:$8 sps:$4 sm:$0xff]   ;;  %v11110_v22 = vld [vmem:[%s14972_s2 + $0x7d0] ss:$8 sps:$4 sm:$0xff]  }
  0xf2   : > { %2129 = vmatprep.subr.bf16.mxu1 %v11020_v21  ;;  %v11107_v21 = vld [vmem:[%s14972_s2 + $0x6d0] ss:$8 sps:$4 sm:$0xff]  }
  0xf4   : > { %2157 = vmatpush1.bf16.msra.mxu0 %v11021_v25  ;;  %v11118_v25 = vld [vmem:[%s14972_s2 + $0x7c4] ss:$8 sps:$4 sm:$0xff]  }
  0xf5   : > { %2130 = vmatpush2.bf16.msra.mxu1 %v11018_v23  ;;  %2158 = vmatprep.subr.bf16.mxu0 %v11029_v27  ;;  %v11115_v23 = vld [vmem:[%s14972_s2 + $0x6c4] ss:$8 sps:$4 sm:$0xff]   ;;  %v11116_v27 = vld [vmem:[%s14972_s2 + $0x7c0] ss:$8 sps:$4 sm:$0xff]  }
  0xf6   : > { %2131 = vmatprep.subr.bf16.mxu1 %v11026_v26  ;;  %v11113_v26 = vld [vmem:[%s14972_s2 + $0x6c0] ss:$8 sps:$4 sm:$0xff]  }
  0xf8   : > { %2159 = vmatpush1.bf16.msra.mxu0 %v11027_v29  ;;  %v11124_v29 = vld [vmem:[%s14972_s2 + $0x7b4] ss:$8 sps:$4 sm:$0xff]  }
  0xf9   : > { %2132 = vmatpush2.bf16.msra.mxu1 %v11024_v28  ;;  %2160 = vmatprep.subr.bf16.mxu0 %v11035_v31  ;;  %v11121_v28 = vld [vmem:[%s14972_s2 + $0x6b4] ss:$8 sps:$4 sm:$0xff]   ;;  %v11122_v31 = vld [vmem:[%s14972_s2 + $0x7b0] ss:$8 sps:$4 sm:$0xff]  }
  0xfa   : > { %2133 = vmatprep.subr.bf16.mxu1 %v11032_v30  ;;  %v11119_v30 = vld [vmem:[%s14972_s2 + $0x6b0] ss:$8 sps:$4 sm:$0xff]  }
  0xfc   : > { %2161 = vmatpush1.bf16.msra.mxu0 %v11033_v33  ;;  %v11130_v33 = vld [vmem:[%s14972_s2 + $0x7a4] ss:$8 sps:$4 sm:$0xff]  }
  0xfd   : > { %2134 = vmatpush2.bf16.msra.mxu1 %v11030_v32  ;;  %2162 = vmatprep.subr.bf16.mxu0 %v11041_v35  ;;  %v11127_v32 = vld [vmem:[%s14972_s2 + $0x6a4] ss:$8 sps:$4 sm:$0xff]   ;;  %v11128_v35 = vld [vmem:[%s14972_s2 + $0x7a0] ss:$8 sps:$4 sm:$0xff]  }
  0xfe   : > { %2135 = vmatprep.subr.bf16.mxu1 %v11038_v34  ;;  %v11125_v34 = vld [vmem:[%s14972_s2 + $0x6a0] ss:$8 sps:$4 sm:$0xff]  }
 0x100   : > { %2163 = vmatpush1.bf16.msra.mxu0 %v11039_v37  ;;  %v11136_v37 = vld [vmem:[%s14972_s2 + $0x794] ss:$8 sps:$4 sm:$0xff]  }
 0x101   : > { %2136 = vmatpush2.bf16.msra.mxu1 %v11036_v36  ;;  %2447 = vmatprep.subr.bf16.mxu0 %v11048_v38  ;;  %v11133_v36 = vld [vmem:[%s14972_s2 + $0x694] ss:$8 sps:$4 sm:$0xff]   ;;  %v11131_v38 = vld [vmem:[%s14972_s2 + $0x690] ss:$8 sps:$4 sm:$0xff]  }
 0x102   : > { %2490 = vmatprep.subr.bf16.mxu1 %v11051_v39  ;;  %v11134_v39 = vld [vmem:[%s14972_s2 + $0x790] ss:$8 sps:$4 sm:$0xff]  }
 0x103   : > { %2181 = vmatmul.mubr.bf16.vlgmr.msra.gmra.mxu0 %v11045_v41  ;;  %v11142_v41 = vld [vmem:[%s14972_s2 + $0x784] ss:$8 sps:$4 sm:$0xff]  }
 0x104   : > { %2138 = vmatmul.mubr.bf16.vlgmr.msra.gmra.mxu1 %v11042_v40  ;;  %2448 = vmatpush1.bf16.msra.mxu0 %v11046_v42  ;;  %v11139_v40 = vld [vmem:[%s14972_s2 + $0x684] ss:$8 sps:$4 sm:$0xff]   ;;  %v11137_v42 = vld [vmem:[%s14972_s2 + $0x680] ss:$8 sps:$4 sm:$0xff]  }
 0x105   : > { %2491 = vmatpush1.bf16.msra.mxu1 %v11049_v43  ;;  %2449 = vmatprep.subr.bf16.mxu0 %v11054_v44  ;;  %v11140_v43 = vld [vmem:[%s14972_s2 + $0x780] ss:$8 sps:$4 sm:$0xff]   ;;  %v11148_v44 = vld [vmem:[%s14972_s2 + $0x874] ss:$8 sps:$4 sm:$0xff]  }
 0x106   : > { %2492 = vmatprep.subr.bf16.mxu1 %v11057_v45  ;;  %2522 = vmatprep.mubr.bf16.mxu1 %v12261_v24  ;;  %v11151_v45 = vld [vmem:[%s14972_s2 + $0x8f4] ss:$8 sps:$4 sm:$0xff]  }
 0x107   : > { %2479 = vmatprep.mubr.bf16.mxu0 %v11145_v46 }
 0x108   : > { %2450 = vmatpush1.bf16.msra.mxu0 %v11052_v47  ;;  %v11143_v47 = vld [vmem:[%s12462_s13 + $0x60] ss:$12 sps:$4 sm:$0xff]  }
 0x109   : > { %2493 = vmatpush1.bf16.msra.mxu1 %v11055_v48  ;;  %2451 = vmatprep.subr.bf16.mxu0 %v11060_v49  ;;  %v11146_v48 = vld [vmem:[%s14972_s2 + $0x870] ss:$8 sps:$4 sm:$0xff]  }
 0x10a   : > { %2494 = vmatprep.subr.bf16.mxu1 %v11063_v50  ;;  %v11149_v49 = vld [vmem:[%s14972_s2 + $0x8f0] ss:$8 sps:$4 sm:$0xff]   ;;  %v11154_v50 = vld [vmem:[%s14972_s2 + $0x864] ss:$8 sps:$4 sm:$0xff]  }
 0x10c   : > { %2452 = vmatpush1.bf16.msra.mxu0 %v11058_v51  ;;  %v11157_v51 = vld [vmem:[%s14972_s2 + $0x8e4] ss:$8 sps:$4 sm:$0xff]  }
 0x10d   : > { %2495 = vmatpush1.bf16.msra.mxu1 %v11061_v52  ;;  %2453 = vmatprep.subr.bf16.mxu0 %v11066_v53  ;;  %v11152_v53 = vld [vmem:[%s14972_s2 + $0x860] ss:$8 sps:$4 sm:$0xff]  }
 0x10e   : > { %2496 = vmatprep.subr.bf16.mxu1 %v11069_v54  ;;  %v11155_v54 = vld [vmem:[%s14972_s2 + $0x8e0] ss:$8 sps:$4 sm:$0xff]  }
 0x110   : > { %2454 = vmatpush1.bf16.msra.mxu0 %v11064_v55 }
 0x111   : > { %2497 = vmatpush1.bf16.msra.mxu1 %v11067_v56  ;;  %2455 = vmatprep.subr.bf16.mxu0 %v11072_v57  ;;  %v11160_v56 = vld [vmem:[%s14972_s2 + $0x854] ss:$8 sps:$4 sm:$0xff]  }
 0x112   : > { %2498 = vmatprep.subr.bf16.mxu1 %v11075_v58  ;;  %v11163_v57 = vld [vmem:[%s14972_s2 + $0x8d4] ss:$8 sps:$4 sm:$0xff]  }
 0x114   : > { %2456 = vmatpush1.bf16.msra.mxu0 %v11070_v59 }
 0x115   : > { %2499 = vmatpush1.bf16.msra.mxu1 %v11073_v60  ;;  %2457 = vmatprep.subr.bf16.mxu0 %v11078_v61  ;;  %v11158_v61 = vld [vmem:[%s14972_s2 + $0x850] ss:$8 sps:$4 sm:$0xff]  }
 0x116   : > { %2500 = vmatprep.subr.bf16.mxu1 %v11081_v62  ;;  %v11161_v62 = vld [vmem:[%s14972_s2 + $0x8d0] ss:$8 sps:$4 sm:$0xff]  }
 0x118   : > { %2458 = vmatpush1.bf16.msra.mxu0 %v11076_v63 }
 0x119   : > { %2501 = vmatpush1.bf16.msra.mxu1 %v11079_v0  ;;  %2459 = vmatprep.subr.bf16.mxu0 %v11084_v1  ;;  %v11166_v0 = vld [vmem:[%s14972_s2 + $0x844] ss:$8 sps:$4 sm:$0xff]  }
 0x11a   : > { %2502 = vmatprep.subr.bf16.mxu1 %v11087_v2 }
 0x11c   : > { %2460 = vmatpush1.bf16.msra.mxu0 %v11082_v3  ;;  %v11169_v3 = vld [vmem:[%s14972_s2 + $0x8c4] ss:$8 sps:$4 sm:$0xff]  }
 0x11d   : > { %2503 = vmatpush1.bf16.msra.mxu1 %v11085_v4  ;;  %2461 = vmatprep.subr.bf16.mxu0 %v11090_v5 }
 0x11e   : > { %2504 = vmatprep.subr.bf16.mxu1 %v11093_v6 }
 0x120   : > { %2462 = vmatpush1.bf16.msra.mxu0 %v11088_v7 }
 0x121   : > { %2505 = vmatpush1.bf16.msra.mxu1 %v11091_v8  ;;  %2463 = vmatprep.subr.bf16.mxu0 %v11096_v9  ;;  %v11164_v8 = vld [vmem:[%s14972_s2 + $0x840] ss:$8 sps:$4 sm:$0xff]  }
 0x122   : > { %2789 = vmatprep.subr.bf16.mxu1 %v11100_v10  ;;  %v11167_v9 = vld [vmem:[%s14972_s2 + $0x8c0] ss:$8 sps:$4 sm:$0xff]   ;;  %v11172_v10 = vld [vmem:[%s14972_s2 + $0x834] ss:$8 sps:$4 sm:$0xff]  }
 0x124   : > { %2523 = vmatmul.mubr.bf16.vlgmr.msra.gmra.mxu1 %v11097_v11  ;;  %2464 = vmatpush2.bf16.msra.mxu0 %v11094_v12  ;;  %v1156_v46 = vpop.f32.mrf.mxu1  ;;  %v11175_v11 = vld [vmem:[%s14972_s2 + $0x8b4] ss:$8 sps:$4 sm:$0xff]  }
 0x125   : > { %2790 = vmatpush1.bf16.msra.mxu1 %v11098_v13  ;;  %2465 = vmatprep.subr.bf16.mxu0 %v11103_v14  ;;  %v11170_v13 = vld [vmem:[%s14972_s2 + $0x830] ss:$8 sps:$4 sm:$0xff]  }
 0x126   : > { %2791 = vmatprep.subr.bf16.mxu1 %v11106_v15  ;;  %2821 = vmatprep.mubr.bf16.mxu1 %v11196_v16  ;;  %v1158_v52 = vpop.f32.mrf.mxu1  ;;  %v11173_v14 = vld [vmem:[%s14972_s2 + $0x8b0] ss:$8 sps:$4 sm:$0xff]   ;;  %v11178_v15 = vld [vmem:[%s14972_s2 + $0x824] ss:$8 sps:$4 sm:$0xff]  }
 0x127   : > { %v11181_v16 = vld [vmem:[%s14972_s2 + $0x8a4] ss:$8 sps:$4 sm:$0xff]  }
 0x128   : > { %2466 = vmatpush2.bf16.msra.mxu0 %v11101_v17  ;;  %v1160_v58 = vpop.f32.mrf.mxu1  ;;  %v11176_v17 = vld [vmem:[%s14972_s2 + $0x820] ss:$8 sps:$4 sm:$0xff]  }
 0x129   : > { %2792 = vmatpush1.bf16.msra.mxu1 %v11104_v18  ;;  %2467 = vmatprep.subr.bf16.mxu0 %v11109_v19  ;;  %v11179_v18 = vld [vmem:[%s14972_s2 + $0x8a0] ss:$8 sps:$4 sm:$0xff]   ;;  %v11184_v19 = vld [vmem:[%s14972_s2 + $0x814] ss:$8 sps:$4 sm:$0xff]  }
 0x12a   : > { %2793 = vmatprep.subr.bf16.mxu1 %v11112_v20  ;;  %v1162_v4 = vpop.f32.mrf.mxu1  ;;  %v11187_v20 = vld [vmem:[%s14972_s2 + $0x894] ss:$8 sps:$4 sm:$0xff]  }
 0x12c   : > { %2468 = vmatpush2.bf16.msra.mxu0 %v11107_v21  ;;  %v11182_v21 = vld [vmem:[%s14972_s2 + $0x810] ss:$8 sps:$4 sm:$0xff]  }
 0x12d   : > { %2794 = vmatpush1.bf16.msra.mxu1 %v11110_v22  ;;  %2469 = vmatprep.subr.bf16.mxu0 %v11115_v23  ;;  %v11185_v22 = vld [vmem:[%s14972_s2 + $0x890] ss:$8 sps:$4 sm:$0xff]   ;;  %v11190_v23 = vld [vmem:[%s14972_s2 + $0x804] ss:$8 sps:$4 sm:$0xff]  }
 0x12e   : > { %2795 = vmatprep.subr.bf16.mxu1 %v11118_v25  ;;  %v11193_v25 = vld [vmem:[%s14972_s2 + $0x884] ss:$8 sps:$4 sm:$0xff]  }
 0x130   : > { %2470 = vmatpush2.bf16.msra.mxu0 %v11113_v26  ;;  %v11188_v26 = vld [vmem:[%s14972_s2 + $0x800] ss:$8 sps:$4 sm:$0xff]  }
 0x131   : > { %2796 = vmatpush1.bf16.msra.mxu1 %v11116_v27  ;;  %2471 = vmatprep.subr.bf16.mxu0 %v11121_v28  ;;  %v11191_v27 = vld [vmem:[%s14972_s2 + $0x880] ss:$8 sps:$4 sm:$0xff]  }
 0x132   : > { %2797 = vmatprep.subr.bf16.mxu1 %v11124_v29  ;;  %v11194_v28 = vld [vmem:[%s12462_s13 + $0x78] ss:$12 sps:$4 sm:$0xff]   ;;  %v11197_v29 = vld [vmem:[%s12462_s13 + $0x80] ss:$12 sps:$4 sm:$0xff]  }
 0x134   : > { %2472 = vmatpush2.bf16.msra.mxu0 %v11119_v30  ;;  %v12263_v30 = vmov 0.0  }
 0x135   : > { %2798 = vmatpush1.bf16.msra.mxu1 %v11122_v31  ;;  %2473 = vmatprep.subr.bf16.mxu0 %v11127_v32 }
 0x136   : > { %2799 = vmatprep.subr.bf16.mxu1 %v11130_v33 }
 0x138   : > { %2474 = vmatpush2.bf16.msra.mxu0 %v11125_v34 }
 0x139   : > { %2800 = vmatpush1.bf16.msra.mxu1 %v11128_v35  ;;  %2475 = vmatprep.subr.bf16.mxu0 %v11133_v36 }
 0x13a   : > { %2801 = vmatprep.subr.bf16.mxu1 %v11136_v37 }
 0x13c   : > { %2476 = vmatpush2.bf16.msra.mxu0 %v11131_v38 }
 0x13d   : > { %2802 = vmatpush1.bf16.msra.mxu1 %v11134_v39  ;;  %2477 = vmatprep.subr.bf16.mxu0 %v11139_v40 }
 0x13e   : > { %2803 = vmatprep.subr.bf16.mxu1 %v11142_v41 }
 0x140   : > { %2478 = vmatpush2.bf16.msra.mxu0 %v11137_v42 }
 0x141   : > { %2804 = vmatpush1.bf16.msra.mxu1 %v11140_v43  ;;  %2832 = vmatprep.subr.bf16.mxu0 %v11151_v45 }
 0x142   : > { %2805 = vmatprep.subr.bf16.mxu1 %v11148_v44 }
 0x143   : > { %v1113_v55 = vpop.f32.mrf.mxu0  ;;  %2480 = vmatmul.mubr.bf16.vlgmr.msra.gmra.mxu0 %v11143_v47 }
 0x144   : > { %2833 = vmatpush1.bf16.msra.mxu0 %v11149_v49  ;;  %2864 = vmatprep.mubr.bf16.mxu0 %v12261_v24  ;;  %v1157_v1 = vadd.f32 %v1156_v46, %v1113_v55 }
 0x145   : > { %2806 = vmatpush2.bf16.msra.mxu1 %v11146_v48  ;;  %v1115_v59 = vpop.f32.mrf.mxu0  ;;  %2834 = vmatprep.subr.bf16.mxu0 %v11157_v51 }
 0x146   : > { %2807 = vmatprep.subr.bf16.mxu1 %v11154_v50  ;;  %v13287_v60 = vadd.f32 %v1158_v52, %v1115_v59 }
 0x147   : > { %v1117_v63 = vpop.f32.mrf.mxu0 }
 0x148   : > { %v1161_v2 = vadd.f32 %v1160_v58, %v1117_v63  ;;  %2835 = vmatpush1.bf16.msra.mxu0 %v11155_v54 }
 0x149   : > { %2808 = vmatpush2.bf16.msra.mxu1 %v11152_v53  ;;  %v1119_v5 = vpop.f32.mrf.mxu0  ;;  %2836 = vmatprep.subr.bf16.mxu0 %v11163_v57 }
 0x14a   : > { %2809 = vmatprep.subr.bf16.mxu1 %v11160_v56  ;;  %v13302_v6 = vadd.f32 %v1162_v4, %v1119_v5  ;;  %v13304_v7 = vpack.c.bf16 %v1161_v2, %v1157_v1 }
 0x14c   : > { %v2881_v12 = vpack.c.bf16 %v13302_v6, %v13287_v60  ;;  %2837 = vmatpush1.bf16.msra.mxu0 %v11161_v62  ;;  %2897 = vrot.lane.b32.xlu0 %v13304_v7, %s12262_s27  ;;  %v12265_v6 = vmov -1e+30  }
 0x14d   : > { %2810 = vmatpush2.bf16.msra.mxu1 %v11158_v61  ;;  %2838 = vmatprep.subr.bf16.mxu0 %v11169_v3 }
 0x14e   : > { %2811 = vmatprep.subr.bf16.mxu1 %v11166_v0 }
 0x150   : > { %2839 = vmatpush1.bf16.msra.mxu0 %v11167_v9 }
 0x151   : > { %2812 = vmatpush2.bf16.msra.mxu1 %v11164_v8  ;;  %2840 = vmatprep.subr.bf16.mxu0 %v11175_v11 }
 0x152   : > { %2813 = vmatprep.subr.bf16.mxu1 %v11172_v10 }
 0x154   : > { %2841 = vmatpush1.bf16.msra.mxu0 %v11173_v14 }
 0x155   : > { %2814 = vmatpush2.bf16.msra.mxu1 %v11170_v13  ;;  %2842 = vmatprep.subr.bf16.mxu0 %v11181_v16 }
 0x156   : > { %2815 = vmatprep.subr.bf16.mxu1 %v11178_v15 }
 0x158   : > { %2843 = vmatpush1.bf16.msra.mxu0 %v11179_v18 }
 0x159   : > { %2816 = vmatpush2.bf16.msra.mxu1 %v11176_v17  ;;  %2844 = vmatprep.subr.bf16.mxu0 %v11187_v20 }
 0x15a   : > { %2817 = vmatprep.subr.bf16.mxu1 %v11184_v19 }
 0x15c   : > { %2845 = vmatpush1.bf16.msra.mxu0 %v11185_v22 }
 0x15d   : > { %2818 = vmatpush2.bf16.msra.mxu1 %v11182_v21  ;;  %2846 = vmatprep.subr.bf16.mxu0 %v11193_v25 }
 0x15e   : > { %2819 = vmatprep.subr.bf16.mxu1 %v11190_v23 }
 0x160   : > { %2847 = vmatpush1.bf16.msra.mxu0 %v11191_v27 }
 0x161   : > { %2820 = vmatpush2.bf16.msra.mxu1 %v11188_v26  ;;  %10609 = vmatprep.subr.bf16.mxu0 %v12263_v30 }
 0x162   : > { %10585 = vmatprep.subr.bf16.mxu1 %v12263_v30 }
 0x163   : > { %v1498_v32 = vpop.f32.mrf.mxu0  ;;  %2865 = vmatmul.mubr.bf16.vlgmr.msra.gmra.mxu0 %v11197_v29 }
 0x164   : > { %v1455_v31 = vpop.f32.mrf.mxu1  ;;  %2822 = vmatmul.mubr.bf16.vlgmr.msra.gmra.mxu1 %v11194_v28  ;;  %10611 = vmatprep.mubr.msk.bf16.mxu0 %vm12264_vm0, %v12263_v30 }
 0x165   : > { %10587 = vmatprep.mubr.msk.bf16.mxu1 %vm12264_vm0, %v12263_v30  ;;  %v1500_v34 = vpop.f32.mrf.mxu0  ;;  %v1499_v38 = vadd.f32 %v1498_v32, %v1455_v31 }
 0x166   : > { %v1457_v33 = vpop.f32.mrf.mxu1 }
 0x167   : > { %v13372_v35 = vadd.f32 %v1500_v34, %v1457_v33  ;;  %v1502_v37 = vpop.f32.mrf.mxu0 }
 0x168   : > { %v1459_v36 = vpop.f32.mrf.mxu1 }
 0x169   : > { %v1503_v39 = vadd.f32 %v1502_v37, %v1459_v36  ;;  %v1504_v41 = vpop.f32.mrf.mxu0 }
 0x16a   : > { %v1461_v40 = vpop.f32.mrf.mxu1 }
 0x16b   : > { %v2876_v42 = vpack.c.bf16 %v1503_v39, %v1499_v38  ;;  %v13374_v43 = vadd.f32 %v1504_v41, %v1461_v40 }
 0x16d   : > { %v2882_v44 = vpack.c.bf16 %v13374_v43, %v13372_v35  ;;  %2948 = vrot.lane.b32.xlu0 %v2876_v42, %s12262_s27 }
 0x184   : > { %v1840_v45 = vpop.f32.mrf.mxu1 }
 0x186   : > { %v1842_v46 = vpop.f32.mrf.mxu1 }
 0x188   : > { %v1844_v48 = vpop.f32.mrf.mxu1 }
 0x18a   : > { %v1846_v54 = vpop.f32.mrf.mxu1 }
 0x1a3   : > { %v1797_v47 = vpop.f32.mrf.mxu0 }
 0x1a4   : > { %v1841_v52 = vadd.f32 %v1840_v45, %v1797_v47 }
 0x1a5   : > { %v1799_v49 = vpop.f32.mrf.mxu0 }
 0x1a6   : > { %v13379_v50 = vadd.f32 %v1842_v46, %v1799_v49 }
 0x1a7   : > { %v1801_v51 = vpop.f32.mrf.mxu0 }
 0x1a8   : > { %v1845_v53 = vadd.f32 %v1844_v48, %v1801_v51 }
 0x1a9   : > { %v1803_v55 = vpop.f32.mrf.mxu0 }
 0x1aa   : > { %v13381_v56 = vadd.f32 %v1846_v54, %v1803_v55  ;;  %v2877_v57 = vpack.c.bf16 %v1845_v53, %v1841_v52 }
 0x1ac   : > { %v2883_v58 = vpack.c.bf16 %v13381_v56, %v13379_v50  ;;  %2998 = vrot.lane.b32.xlu1 %v2877_v57, %s12262_s27 }
 0x1be   : > { %v2898_v59 = vpop.permute.xlu0 %2897 }
 0x1bf   : > { %v2904_v61 = vsel %vm2899_vm1, %v2898_v59, 0  ;;  %v2887_v59 = vlaneseq }
 0x1c0   : > { %10586 = vmatpush3.bf16.xpose.msra.mxu1 %v2904_v61 }
 0x1c1   : > { %10591 = vmatprep.subr.bf16.mxu1 %v12263_v30 }
 0x1c3   : > { %v2182_v63 = vpop.f32.mrf.mxu0 }
 0x1c4   : > { %v2139_v62 = vpop.f32.mrf.mxu1 }
 0x1c5   : > { %v2184_v1 = vpop.f32.mrf.mxu0  ;;  %v2183_v5 = vadd.f32 %v2182_v63, %v2139_v62  ;;  %v13438_v63 = vshrl.u32 %v2887_v59, 7 }
 0x1c6   : > { %v2141_v0 = vpop.f32.mrf.mxu1 }
 0x1c7   : > { %v13388_v2 = vadd.f32 %v2184_v1, %v2141_v0  ;;  %v2186_v4 = vpop.f32.mrf.mxu0  ;;  %10588 = vmatmul.mubr.msk.bf16.vlgmr.msra.gmra.mxu1 %vm2899_vm1, %v13304_v7  ;;  %v2891_v0 = vand.u32 127, %v2887_v59  ;;  %v2889_v60 = vadd.s32 8, %v13438_v63 }
 0x1c8   : > { %v2143_v3 = vpop.f32.mrf.mxu1  ;;  %10593 = vmatprep.mubr.msk.bf16.mxu1 %vm12264_vm0, %v12263_v30 }
 0x1c9   : > { %v2187_v8 = vadd.f32 %v2186_v4, %v2143_v3  ;;  %v2188_v10 = vpop.f32.mrf.mxu0  ;;  %vm2892_vm2 = vcmp.ge.s32.totalorder %v13438_v63, %v2891_v0  ;;  %vm2893_vm3 = vcmp.ge.s32.totalorder %v2889_v60, %v2891_v0 }
 0x1ca   : > { %v2145_v9 = vpop.f32.mrf.mxu1 }
 0x1cb   : > { %v2878_v11 = vpack.c.bf16 %v2187_v8, %v2183_v5  ;;  %v13394_v13 = vadd.f32 %v2188_v10, %v2145_v9  ;;  %v2895_v8 = vsel %vm2893_vm3, 0.0, %v12265_v6 }
 0x1cd   : > { %v2884_v14 = vpack.c.bf16 %v13394_v13, %v13388_v2  ;;  %3048 = vrot.lane.b32.xlu1 %v2878_v11, %s12262_s27 }
 0x1df   : > { %v2949_v15 = vpop.permute.xlu0 %2948 }
 0x1e0   : > { %v2954_v16 = vsel %vm2899_vm1, %v2949_v15, 0 }
 0x1e1   : > { %10592 = vmatpush3.bf16.xpose.msra.mxu1 %v2954_v16 }
 0x1e2   : > { %10597 = vmatprep.subr.bf16.mxu1 %v12263_v30 }
 0x1e4   : > { %v2524_v7 = vpop.f32.mrf.mxu1 }
 0x1e6   : > { %v2526_v17 = vpop.f32.mrf.mxu1 }
 0x1e8   : > { %10594 = vmatmul.mubr.msk.bf16.vlgmr.msra.gmra.mxu1 %vm2899_vm1, %v2876_v42  ;;  %v2528_v19 = vpop.f32.mrf.mxu1 }
 0x1e9   : > { %10599 = vmatprep.mubr.msk.bf16.mxu1 %vm12264_vm0, %v12263_v30 }
 0x1ea   : > { %v2530_v26 = vpop.f32.mrf.mxu1 }
 0x203   : > { %v2481_v18 = vpop.f32.mrf.mxu0 }
 0x204   : > { %v2525_v23 = vadd.f32 %v2524_v7, %v2481_v18 }
 0x205   : > { %v2483_v20 = vpop.f32.mrf.mxu0 }
 0x206   : > { %v13404_v21 = vadd.f32 %v2526_v17, %v2483_v20 }
 0x207   : > { %v2485_v22 = vpop.f32.mrf.mxu0 }
 0x208   : > { %v2529_v25 = vadd.f32 %v2528_v19, %v2485_v22 }
 0x209   : > { %v2487_v27 = vpop.f32.mrf.mxu0 }
 0x20a   : > { %v2879_v28 = vpack.c.bf16 %v2529_v25, %v2525_v23  ;;  %v13406_v29 = vadd.f32 %v2530_v26, %v2487_v27 }
 0x20c   : > { %v2885_v31 = vpack.c.bf16 %v13406_v29, %v13404_v21  ;;  %3098 = vrot.lane.b32.xlu1 %v2879_v28, %s12262_s27  ;;  %v11198_v21 = vld [vmem:[%s14973_s3 + $0xa8] ss:$12 sps:$4 sm:$0xff]   ;;  %v11200_v29 = vld [vmem:[%s14973_s3 + $0xac] ss:$12 sps:$4 sm:$0xff]  }
 0x21e   : > { %v2999_v32 = vpop.permute.xlu1 %2998 }
 0x21f   : > { %v3004_v33 = vsel %vm2899_vm1, %v2999_v32, 0 }
 0x220   : > { %10598 = vmatpush3.bf16.xpose.msra.mxu1 %v3004_v33 }
 0x221   : > { %10603 = vmatprep.subr.bf16.mxu1 %v12263_v30 }
 0x223   : > { %v2866_v36 = vpop.f32.mrf.mxu0 }
 0x224   : > { %v2823_v34 = vpop.f32.mrf.mxu1 }
 0x225   : > { %v2868_v38 = vpop.f32.mrf.mxu0  ;;  %v2867_v42 = vadd.f32 %v2866_v36, %v2823_v34 }
 0x226   : > { %v2825_v37 = vpop.f32.mrf.mxu1 }
 0x227   : > { %v13413_v39 = vadd.f32 %v2868_v38, %v2825_v37  ;;  %v2870_v41 = vpop.f32.mrf.mxu0  ;;  %10600 = vmatmul.mubr.msk.bf16.vlgmr.msra.gmra.mxu1 %vm2899_vm1, %v2877_v57 }
 0x228   : > { %v2827_v40 = vpop.f32.mrf.mxu1  ;;  %10605 = vmatprep.mubr.msk.bf16.mxu1 %vm12264_vm0, %v12263_v30 }
 0x229   : > { %v2871_v45 = vadd.f32 %v2870_v41, %v2827_v40  ;;  %v13454_v26 = vpop.f32.mrf.mxu0 }
 0x22a   : > { %v13426_v52 = vpop.f32.mrf.mxu1 }
 0x22b   : > { %v2880_v46 = vpack.c.bf16 %v2871_v45, %v2867_v42 }
 0x22d   : > { %3148 = vrot.lane.b32.xlu0 %v2880_v46, %s12262_s27 }
 0x23f   : > { %v3049_v47 = vpop.permute.xlu1 %3048 }
 0x240   : > { %v3054_v48 = vsel %vm2899_vm1, %v3049_v47, 0 }
 0x241   : > { %10604 = vmatpush3.bf16.xpose.msra.mxu1 %v3054_v48 }
 0x242   : > { %10615 = vmatprep.subr.bf16.mxu1 %v12263_v30 }
 0x248   : > { %10606 = vmatmul.mubr.msk.bf16.vlgmr.msra.gmra.mxu1 %vm2899_vm1, %v2878_v11 }
 0x249   : > { %10617 = vmatprep.mubr.msk.bf16.mxu1 %vm12264_vm0, %v12263_v30 }
 0x27e   : > { %v3099_v49 = vpop.permute.xlu1 %3098 }
 0x27f   : > { %v3104_v51 = vsel %vm2899_vm1, %v3099_v49, 0 }
 0x280   : > { %10610 = vmatpush3.bf16.xpose.msra.mxu0 %v3104_v51 }
 0x281   : > { %10621 = vmatprep.subr.bf16.mxu0 %v12263_v30 }
 0x287   : > { %10612 = vmatmul.mubr.msk.bf16.vlgmr.msra.gmra.mxu0 %vm2899_vm1, %v2879_v28  ;;  %v2940_v53 = vpop.f32.mrf.mxu1 }
 0x288   : > { %10622 = vmatpush3.bf16.msra.mxu0 %v2881_v12  ;;  %10623 = vmatprep.mubr.msk.bf16.mxu0 %vm12264_vm0, %v12263_v30  ;;  %v2894_v12 = vsel %vm2892_vm2, 0.0, %v12265_v6 }
 0x289   : > { %10633 = vmatprep.subr.bf16.mxu0 %v12263_v30  ;;  %v10589_v54 = vpop.f32.mrf.mxu1  ;;  %v2941_v45 = vadd.f32 %v2940_v53, %v2894_v12 }
 0x28b   : > { %v13435_v55 = vpop.f32.mrf.mxu1 }
 0x28c   : > { %v2944_v59 = vadd.f32 %v13435_v55, %v2895_v8 }
 0x28d   : > { %v10590_v57 = vpop.f32.mrf.mxu1 }
 0x28e   : > { %v3198_v57 = vsel %vm3197_vm4, %v2941_v45, -inf  ;;  %v3201_v6 = vsel %vm3197_vm4, %v2944_v59, -inf }
 0x29f   : > { %v3149_v61 = vpop.permute.xlu0 %3148 }
 0x2a0   : > { %v3154_v62 = vsel %vm2899_vm1, %v3149_v61, 0 }
 0x2a1   : > { %10616 = vmatpush3.bf16.xpose.msra.mxu1 %v3154_v62 }
 0x2a2   : > { %10627 = vmatprep.subr.bf16.mxu1 %v12263_v30 }
 0x2a8   : > { %v2990_v1 = vpop.f32.mrf.mxu1  ;;  %10618 = vmatmul.mubr.msk.bf16.vlgmr.msra.gmra.mxu1 %vm2899_vm1, %v2880_v46 }
 0x2a9   : > { %v2991_v3 = vadd.f32 %v2990_v1, %v2894_v12  ;;  %10628 = vmatpush3.bf16.msra.mxu1 %v2882_v44  ;;  %10629 = vmatprep.mubr.msk.bf16.mxu1 %vm12264_vm0, %v12263_v30 }
 0x2aa   : > { %v10595_v4 = vpop.f32.mrf.mxu1  ;;  %10639 = vmatprep.subr.bf16.mxu1 %v12263_v30 }
 0x2ab   : > { %v3204_v5 = vsel %vm3197_vm4, %v2991_v3, -inf }
 0x2ac   : > { %3205 = vmax.xlane.f32.xlu0 %v3204_v5  ;;  %v2993_v9 = vpop.f32.mrf.mxu1 }
 0x2ad   : > { %v2994_v10 = vadd.f32 %v2993_v9, %v2895_v8 }
 0x2ae   : > { %v10596_v11 = vpop.f32.mrf.mxu1 }
 0x2af   : > { %v3207_v15 = vsel %vm3197_vm4, %v2994_v10, -inf }
 0x2b0   : > { %3208 = vmax.xlane.f32.xlu1 %v3207_v15 }
 0x2e7   : > { %v3040_v16 = vpop.f32.mrf.mxu1 }
 0x2e8   : > { %v3041_v61 = vadd.f32 %v3040_v16, %v2894_v12 }
 0x2e9   : > { %v10601_v35 = vpop.f32.mrf.mxu1 }
 0x2ea   : > { %v3210_v60 = vsel %vm3197_vm4, %v3041_v61, -inf }
 0x2eb   : > { %v3043_v43 = vpop.f32.mrf.mxu1 }
 0x2ec   : > { %v3044_v53 = vadd.f32 %v3043_v43, %v2895_v8 }
 0x2ed   : > { %v10602_v44 = vpop.f32.mrf.mxu1 }
 0x2ee   : > { %v3213_v4 = vsel %vm3197_vm4, %v3044_v53, -inf }
 0x308   : > { %v3090_v7 = vpop.f32.mrf.mxu1 }
 0x309   : > { %v3091_v17 = vadd.f32 %v3090_v7, %v2894_v12 }
 0x30a   : > { %v10607_v18 = vpop.f32.mrf.mxu1 }
 0x30b   : > { %v3216_v19 = vsel %vm3197_vm4, %v3091_v17, -inf }
 0x30c   : > { %3217 = vmax.xlane.f32.xlu0 %v3216_v19  ;;  %v3093_v20 = vpop.f32.mrf.mxu1 }
 0x30d   : > { %v3094_v22 = vadd.f32 %v3093_v20, %v2895_v8 }
 0x30e   : > { %v10608_v23 = vpop.f32.mrf.mxu1 }
 0x30f   : > { %v3219_v25 = vsel %vm3197_vm4, %v3094_v22, -inf }
 0x310   : > { %3220 = vmax.xlane.f32.xlu0 %v3219_v25 }
 0x335   : > { %v3206_v34 = vpop.xlane.xlu0 %3205 }
 0x336   : > { %v3236_v36 = vsub.f32 %v2991_v3, %v3206_v34 }
 0x338   : > { %v3250_v38 = vmul.f32 1.442695, %v3236_v36 }
 0x339   : > { %v3209_v37 = vpop.xlane.xlu1 %3208 }
 0x33a   : > { %v3237_v40 = vsub.f32 %v2994_v10, %v3209_v37  ;;  %12114 = vpow2.f32 %v3250_v38 }
 0x33c   : > { %v3252_v47 = vmul.f32 1.442695, %v3237_v40 }
 0x33e   : > { %12116 = vpow2.f32 %v3252_v47 }
 0x347   : > { %v3140_v27 = vpop.f32.mrf.mxu0  ;;  %v13464_v55 = vpop.eup %12114 }
 0x348   : > { %v3141_v0 = vadd.f32 %v3140_v27, %v2894_v12 }
 0x349   : > { %v10613_v28 = vpop.f32.mrf.mxu0 }
 0x34a   : > { %v3222_v3 = vsel %vm3197_vm4, %v3141_v0, -inf }
 0x34b   : > { %v3143_v32 = vpop.f32.mrf.mxu0  ;;  %v13469_v9 = vpop.eup %12116 }
 0x34c   : > { %v3144_v1 = vadd.f32 %v3143_v32, %v2895_v8 }
 0x34d   : > { %v10614_v33 = vpop.f32.mrf.mxu0 }
 0x34e   : > { %v3225_v5 = vsel %vm3197_vm4, %v3144_v1, -inf }
 0x368   : > { %v3190_v41 = vpop.f32.mrf.mxu1 }
 0x369   : > { %v3191_v42 = vadd.f32 %v3190_v41, %v2894_v12  ;;  %v3276_v12 = vsel %vm3197_vm4, %v13464_v55, 0.0 }
 0x36a   : > { %v10619_v46 = vpop.f32.mrf.mxu1 }
 0x36b   : > { %v3228_v48 = vsel %vm3197_vm4, %v3191_v42, -inf }
 0x36c   : > { %3229 = vmax.xlane.f32.xlu1 %v3228_v48  ;;  %v3193_v49 = vpop.f32.mrf.mxu1 }
 0x36d   : > { %v3194_v51 = vadd.f32 %v3193_v49, %v2895_v8  ;;  %v3279_v8 = vsel %vm3197_vm4, %v13469_v9, 0.0 }
 0x36e   : > { %v10620_v54 = vpop.f32.mrf.mxu1 }
 0x36f   : > { %v3231_v62 = vsel %vm3197_vm4, %v3194_v51, -inf }
 0x370   : > { %3199 = vmax.xlane.f32.xlu1 %v3198_v57  ;;  %3232 = vmax.xlane.f32.xlu0 %v3231_v62 }
 0x374   : > { %3211 = vmax.xlane.f32.xlu1 %v3210_v60  ;;  %3202 = vmax.xlane.f32.xlu0 %v3201_v6 }
 0x378   : > { %3223 = vmax.xlane.f32.xlu1 %v3222_v3  ;;  %3214 = vmax.xlane.f32.xlu0 %v3213_v4 }
 0x37c   : > { %3226 = vmax.xlane.f32.xlu0 %v3225_v5  ;;  %3277 = vadd.xlane.f32.xlu1 %v3276_v12 }
 0x380   : > { %3280 = vadd.xlane.f32.xlu0 %v3279_v8 }
 0x395   : > { %v3218_v10 = vpop.xlane.xlu0 %3217 }
 0x396   : > { %v3240_v11 = vsub.f32 %v3091_v17, %v3218_v10 }
 0x398   : > { %v3258_v15 = vmul.f32 1.442695, %v3240_v11 }
 0x399   : > { %v3221_v16 = vpop.xlane.xlu0 %3220 }
 0x39a   : > { %12118 = vpow2.f32 %v3258_v15  ;;  %v3241_v35 = vsub.f32 %v3094_v22, %v3221_v16 }
 0x39c   : > { %v3260_v43 = vmul.f32 1.442695, %v3241_v35 }
 0x39e   : > { %12120 = vpow2.f32 %v3260_v43 }
 0x3a7   : > { %v13473_v44 = vpop.eup %12118 }
 0x3a8   : > { %v3288_v7 = vsel %vm3197_vm4, %v13473_v44, 0.0 }
 0x3a9   : > { %3289 = vadd.xlane.f32.xlu1 %v3288_v7 }
 0x3ab   : > { %v13477_v18 = vpop.eup %12120 }
 0x3ac   : > { %v3291_v19 = vsel %vm3197_vm4, %v13477_v18, 0.0 }
 0x3ad   : > { %3292 = vadd.xlane.f32.xlu0 %v3291_v19 }
 0x3f5   : > { %v3230_v20 = vpop.xlane.xlu1 %3229 }
 0x3f6   : > { %v3244_v17 = vsub.f32 %v3191_v42, %v3230_v20 }
 0x3f8   : > { %v3266_v23 = vmul.f32 1.442695, %v3244_v17 }
 0x3f9   : > { %v3200_v25 = vpop.xlane.xlu1 %3199  ;;  %v3233_v27 = vpop.xlane.xlu0 %3232 }
 0x3fa   : > { %12122 = vpow2.f32 %v3266_v23  ;;  %v3234_v22 = vsub.f32 %v2941_v45, %v3200_v25  ;;  %v3245_v28 = vsub.f32 %v3194_v51, %v3233_v27 }
 0x3fc   : > { %v3246_v32 = vmul.f32 1.442695, %v3234_v22  ;;  %v3268_v33 = vmul.f32 1.442695, %v3245_v28 }
 0x3fd   : > { %v3212_v34 = vpop.xlane.xlu1 %3211  ;;  %v3203_v36 = vpop.xlane.xlu0 %3202 }
 0x3fe   : > { %12124 = vpow2.f32 %v3246_v32  ;;  %v3238_v37 = vsub.f32 %v3041_v61, %v3212_v34  ;;  %v3235_v38 = vsub.f32 %v2944_v59, %v3203_v36 }
 0x3ff   : > { %12126 = vpow2.f32 %v3268_v33 }
 0x400   : > { %v3254_v40 = vmul.f32 1.442695, %v3238_v37  ;;  %v3248_v41 = vmul.f32 1.442695, %v3235_v38 }
 0x401   : > { %v3224_v46 = vpop.xlane.xlu1 %3223  ;;  %v3215_v47 = vpop.xlane.xlu0 %3214 }
 0x402   : > { %12128 = vpow2.f32 %v3254_v40  ;;  %v3242_v42 = vsub.f32 %v3141_v0, %v3224_v46  ;;  %v3239_v48 = vsub.f32 %v3044_v53, %v3215_v47 }
 0x403   : > { %12130 = vpow2.f32 %v3248_v41 }
 0x404   : > { %v3262_v49 = vmul.f32 1.442695, %v3242_v42  ;;  %v3256_v54 = vmul.f32 1.442695, %v3239_v48 }
 0x405   : > { %v3227_v45 = vpop.xlane.xlu0 %3226  ;;  %v3278_v51 = vpop.xlane.xlu1 %3277 }
 0x406   : > { %12132 = vpow2.f32 %v3262_v49  ;;  %v3243_v57 = vsub.f32 %v3144_v1, %v3227_v45 }
 0x407   : > { %v13481_v62 = vpop.eup %12122  ;;  %12134 = vpow2.f32 %v3256_v54 }
 0x408   : > { %v3264_v61 = vmul.f32 1.442695, %v3243_v57  ;;  %v3300_v59 = vsel %vm3197_vm4, %v13481_v62, 0.0  ;;  %12136 = vrcp.f32 %v3278_v51 }
 0x409   : > { %3301 = vadd.xlane.f32.xlu1 %v3300_v59  ;;  %v3281_v60 = vpop.xlane.xlu0 %3280 }
 0x40a   : > { %12138 = vpow2.f32 %v3264_v61 }
 0x40b   : > { %v13485_v0 = vpop.eup %12124  ;;  %12140 = vrcp.f32 %v3281_v60 }
 0x40c   : > { %v12127_v53 = vpop.eup %12126  ;;  %v3270_v6 = vsel %vm3197_vm4, %v13485_v0, 0.0 }
 0x40d   : > { %3271 = vadd.xlane.f32.xlu1 %v3270_v6  ;;  %v3303_v1 = vsel %vm3197_vm4, %v12127_v53, 0.0  ;;  %v11201_v6 = vld [vmem:[%s14973_s3 + $0x90] ss:$12 sps:$4 sm:$0xff]  }
 0x40e   : > { %3304 = vadd.xlane.f32.xlu0 %v3303_v1 }
 0x40f   : > { %v13490_v3 = vpop.eup %12128 }
 0x410   : > { %v12131_v4 = vpop.eup %12130  ;;  %v3282_v5 = vsel %vm3197_vm4, %v13490_v3, 0.0 }
 0x411   : > { %3283 = vadd.xlane.f32.xlu1 %v3282_v5  ;;  %v3273_v12 = vsel %vm3197_vm4, %v12131_v4, 0.0  ;;  %v11218_v5 = vld [vmem:[%s14973_s3 + $0x22c] ss:$12 sps:$4 sm:$0xff]  }
 0x412   : > { %3274 = vadd.xlane.f32.xlu0 %v3273_v12  ;;  %v11224_v12 = vld [vmem:[%s14973_s3 + $0x214] ss:$12 sps:$4 sm:$0xff]  }
 0x413   : > { %v13495_v8 = vpop.eup %12132 }
 0x414   : > { %v13497_v10 = vpop.eup %12134  ;;  %v3294_v11 = vsel %vm3197_vm4, %v13495_v8, 0.0 }
 0x415   : > { %3295 = vadd.xlane.f32.xlu1 %v3294_v11  ;;  %v3285_v15 = vsel %vm3197_vm4, %v13497_v10, 0.0  ;;  %v12137_v16 = vpop.eup %12136  ;;  %v11222_v11 = vld [vmem:[%s14973_s3 + $0x210] ss:$12 sps:$4 sm:$0xff]  }
 0x416   : > { %3286 = vadd.xlane.f32.xlu0 %v3285_v15  ;;  %v3320_v19 = vmul.f32 %v12137_v16, %v13464_v55  ;;  %v11209_v16 = vld [vmem:[%s14973_s3 + $0x64] ss:$12 sps:$4 sm:$0xff]  }
 0x417   : > { %v13503_v35 = vpop.eup %12138 }
 0x418   : > { %v12141_v43 = vpop.eup %12140  ;;  %v3297_v7 = vsel %vm3197_vm4, %v13503_v35, 0.0 }
 0x419   : > { %v3321_v20 = vmul.f32 %v12141_v43, %v13469_v9  ;;  %v2873_v9 = vadd.f32 %v13454_v26, %v13426_v52 }
 0x41a   : > { %3298 = vadd.xlane.f32.xlu0 %v3297_v7  ;;  %v11207_v7 = vld [vmem:[%s14973_s3 + $0x60] ss:$12 sps:$4 sm:$0xff]  }
 0x41b   : > { %v3331_v17 = vpack.c.bf16 %v3321_v20, %v3320_v19  ;;  %v2886_v13 = vpack.c.bf16 %v2873_v9, %v13413_v39  ;;  %v11228_v19 = vld [vmem:[%s14973_s3 + $0x1f8] ss:$12 sps:$4 sm:$0xff]   ;;  %v11213_v9 = vld [vmem:[%s14973_s3 + $0x30] ss:$12 sps:$4 sm:$0xff]  }
 0x41c   : > { %v11212_v20 = vld [vmem:[%s14973_s3 + $0x4c] ss:$12 sps:$4 sm:$0xff]  }
 0x41d   : > { %10630 = vmatmul.mubr.msk.bf16.vlgmr.msra.gmra.mxu1 %vm3197_vm4, %v3331_v17  ;;  %v11236_v17 = vld [vmem:[%s14973_s3 + $0x1e4] ss:$12 sps:$4 sm:$0xff]  }
 0x41e   : > { %10640 = vmatpush3.bf16.msra.mxu1 %v2884_v14  ;;  %10641 = vmatprep.mubr.msk.bf16.mxu1 %vm12264_vm0, %v12263_v30 }
 0x41f   : > { %10651 = vmatprep.subr.bf16.mxu1 %v12263_v30 }
 0x432   : > { %v3290_v23 = vpop.xlane.xlu1 %3289 }
 0x433   : > { %12142 = vrcp.f32 %v3290_v23  ;;  %v11210_v23 = vld [vmem:[%s14973_s3 + $0x48] ss:$12 sps:$4 sm:$0xff]  }
 0x436   : > { %v3293_v25 = vpop.xlane.xlu0 %3292 }
 0x437   : > { %12144 = vrcp.f32 %v3293_v25  ;;  %v11234_v25 = vld [vmem:[%s14973_s3 + $0x1e0] ss:$12 sps:$4 sm:$0xff]  }
 0x440   : > { %v12143_v55 = vpop.eup %12142 }
 0x441   : > { %v3324_v22 = vmul.f32 %v12143_v55, %v13473_v44  ;;  %v11215_v55 = vld [vmem:[%s14973_s3 + $0x34] ss:$12 sps:$4 sm:$0xff]  }
 0x444   : > { %v12145_v27 = vpop.eup %12144 }
 0x445   : > { %v3325_v28 = vmul.f32 %v12145_v27, %v13477_v18  ;;  %v11242_v27 = vld [vmem:[%s14973_s3 + $0x1cc] ss:$12 sps:$4 sm:$0xff]  }
 0x447   : > { %v3333_v2 = vpack.c.bf16 %v3325_v28, %v3324_v22  ;;  %v11240_v22 = vld [vmem:[%s14973_s3 + $0x1c8] ss:$12 sps:$4 sm:$0xff]  }
 0x448   : > { %v11221_v28 = vld [vmem:[%s14973_s3 + $0x1c] ss:$12 sps:$4 sm:$0xff]  }
 0x449   : > { %10642 = vmatmul.mubr.msk.bf16.vlgmr.msra.gmra.mxu1 %vm3197_vm4, %v3333_v2  ;;  %v11219_v2 = vld [vmem:[%s14973_s3 + $0x18] ss:$12 sps:$4 sm:$0xff]  }
 0x44a   : > { %10652 = vmatpush3.bf16.msra.mxu1 %v2886_v13  ;;  %10653 = vmatprep.mubr.msk.bf16.mxu1 %vm12264_vm0, %v12263_v30  ;;  %v11227_v13 = vld [vmem:[%s14973_s3 + $0x4] ss:$12 sps:$4 sm:$0xff]  }
 0x44b   : > { %4234 = vmatprep.subr.bf16.mxu1 %v11218_v5 }
 0x492   : > { %v3302_v14 = vpop.xlane.xlu1 %3301 }
 0x493   : > { %12146 = vrcp.f32 %v3302_v14  ;;  %v11225_v14 = vld [vmem:[%s14973_s3] ss:$12 sps:$4 sm:$0xff]  }
 0x496   : > { %v3272_v32 = vpop.xlane.xlu1 %3271 }
 0x497   : > { %v3305_v33 = vpop.xlane.xlu0 %3304 }
 0x498   : > { %12148 = vrcp.f32 %v3305_v33  ;;  %v11231_v33 = vld [vmem:[%s14973_s3 + $0x168] ss:$12 sps:$4 sm:$0xff]  }
 0x499   : > { %12150 = vrcp.f32 %v3272_v32  ;;  %v11233_v32 = vld [vmem:[%s14973_s3 + $0x16c] ss:$12 sps:$4 sm:$0xff]  }
 0x49a   : > { %v3284_v26 = vpop.xlane.xlu1 %3283 }
 0x49b   : > { %v3275_v52 = vpop.xlane.xlu0 %3274 }
 0x49c   : > { %12152 = vrcp.f32 %v3275_v52  ;;  %v11239_v52 = vld [vmem:[%s14973_s3 + $0x154] ss:$12 sps:$4 sm:$0xff]  }
 0x49e   : > { %v3296_v40 = vpop.xlane.xlu1 %3295 }
 0x49f   : > { %v3287_v44 = vpop.xlane.xlu0 %3286 }
 0x4a0   : > { %12154 = vrcp.f32 %v3287_v44  ;;  %v12147_v18 = vpop.eup %12146  ;;  %v11245_v44 = vld [vmem:[%s14973_s3 + $0x13c] ss:$12 sps:$4 sm:$0xff]  }
 0x4a1   : > { %12156 = vrcp.f32 %v3284_v26  ;;  %v3328_v36 = vmul.f32 %v12147_v18, %v13481_v62  ;;  %v11237_v26 = vld [vmem:[%s14973_s3 + $0x150] ss:$12 sps:$4 sm:$0xff]   ;;  %v11243_v18 = vld [vmem:[%s14973_s3 + $0x138] ss:$12 sps:$4 sm:$0xff]  }
 0x4a3   : > { %v3299_v34 = vpop.xlane.xlu0 %3298 }
 0x4a4   : > { %12158 = vrcp.f32 %v3299_v34  ;;  %v11246_v34 = vld [vmem:[%s14973_s3 + $0x1b0] ss:$12 sps:$4 sm:$0xff]  }
 0x4a5   : > { %v12149_v39 = vpop.eup %12148  ;;  %12160 = vrcp.f32 %v3296_v40  ;;  %v11252_v40 = vld [vmem:[%s14973_s3 + $0x198] ss:$12 sps:$4 sm:$0xff]  }
 0x4a6   : > { %v3329_v37 = vmul.f32 %v12149_v39, %v12127_v53  ;;  %v12151_v38 = vpop.eup %12150  ;;  %v11248_v39 = vld [vmem:[%s14973_s3 + $0x1b4] ss:$12 sps:$4 sm:$0xff]  }
 0x4a7   : > { %v3318_v47 = vmul.f32 %v12151_v38, %v13485_v0  ;;  %v11254_v38 = vld [vmem:[%s14973_s3 + $0x19c] ss:$12 sps:$4 sm:$0xff]  }
 0x4a8   : > { %v3335_v41 = vpack.c.bf16 %v3329_v37, %v3328_v36  ;;  %v11249_v36 = vld [vmem:[%s14973_s3 + $0x120] ss:$12 sps:$4 sm:$0xff]   ;;  %v11251_v37 = vld [vmem:[%s14973_s3 + $0x124] ss:$12 sps:$4 sm:$0xff]  }
 0x4a9   : > { %v12153_v46 = vpop.eup %12152 }
 0x4aa   : > { %10654 = vmatmul.mubr.msk.bf16.vlgmr.msra.gmra.mxu1 %vm3197_vm4, %v3335_v41  ;;  %v3319_v42 = vmul.f32 %v12153_v46, %v12131_v4  ;;  %v11216_v4 = vld [vmem:[%s14973_s3 + $0x228] ss:$12 sps:$4 sm:$0xff]   ;;  %v11257_v46 = vld [vmem:[%s14973_s3 + $0x10c] ss:$12 sps:$4 sm:$0xff]  }
 0x4ab   : > { %4266 = vmatprep.mubr.bf16.mxu1 %v12261_v24  ;;  %4235 = vmatpush1.bf16.msra.mxu1 %v11216_v4  ;;  %v11255_v41 = vld [vmem:[%s14973_s3 + $0x108] ss:$12 sps:$4 sm:$0xff]  }
 0x4ac   : > { %v3330_v48 = vpack.c.bf16 %v3319_v42, %v3318_v47  ;;  %4236 = vmatprep.subr.bf16.mxu1 %v11224_v12  ;;  %v11260_v47 = vld [vmem:[%s14973_s3 + $0x184] ss:$12 sps:$4 sm:$0xff]   ;;  %v11258_v42 = vld [vmem:[%s14973_s3 + $0x180] ss:$12 sps:$4 sm:$0xff]  }
 0x4ad   : > { %v12155_v49 = vpop.eup %12154 }
 0x4ae   : > { %10624 = vmatmul.mubr.msk.bf16.vlgmr.msra.gmra.mxu0 %vm3197_vm4, %v3330_v48  ;;  %v12157_v54 = vpop.eup %12156  ;;  %v3323_v45 = vmul.f32 %v12155_v49, %v13497_v10  ;;  %v11204_v10 = vld [vmem:[%s14973_s3 + $0x78] ss:$12 sps:$4 sm:$0xff]   ;;  %v11261_v48 = vld [vmem:[%s14973_s3 + $0xf0] ss:$12 sps:$4 sm:$0xff]   ;;  %v11263_v49 = vld [vmem:[%s14973_s3 + $0xf4] ss:$12 sps:$4 sm:$0xff]  }
 0x4af   : > { %10634 = vmatpush3.bf16.msra.mxu0 %v2883_v58  ;;  %10635 = vmatprep.mubr.msk.bf16.mxu0 %vm12264_vm0, %v12263_v30  ;;  %v3322_v51 = vmul.f32 %v12157_v54, %v13490_v3  ;;  %v11206_v3 = vld [vmem:[%s14973_s3 + $0x7c] ss:$12 sps:$4 sm:$0xff]  }
 0x4b0   : > { %10645 = vmatprep.subr.bf16.mxu0 %v12263_v30  ;;  %4237 = vmatpush1.bf16.msra.mxu1 %v11222_v11 }
 0x4b1   : > { %v3332_v57 = vpack.c.bf16 %v3323_v45, %v3322_v51  ;;  %v12159_v62 = vpop.eup %12158  ;;  %v11264_v51 = vld [vmem:[%s14973_s3 + $0x170] ss:$12 sps:$4 sm:$0xff]  }
 0x4b2   : > { %v12161_v61 = vpop.eup %12160  ;;  %v3327_v50 = vmul.f32 %v12159_v62, %v13503_v35  ;;  %v11230_v35 = vld [vmem:[%s14973_s3 + $0x1fc] ss:$12 sps:$4 sm:$0xff]   ;;  %v11265_v62 = vld [vmem:[%s14973_s3 + $0xd8] ss:$12 sps:$4 sm:$0xff]  }
 0x4b3   : > { %v3326_v56 = vmul.f32 %v12161_v61, %v13495_v8  ;;  %4238 = vmatprep.subr.bf16.mxu1 %v11230_v35  ;;  %v11267_v61 = vld [vmem:[%s14973_s3 + $0xdc] ss:$12 sps:$4 sm:$0xff]  }
 0x4b4   : > { %4239 = vmatpush1.bf16.msra.mxu1 %v11228_v19 }
 0x4b5   : > { %v3334_v58 = vpack.c.bf16 %v3327_v50, %v3326_v56  ;;  %4240 = vmatprep.subr.bf16.mxu1 %v11236_v17 }
 0x4b6   : > { %10636 = vmatmul.mubr.msk.bf16.vlgmr.msra.gmra.mxu0 %vm3197_vm4, %v3332_v57 }
 0x4b7   : > { %10646 = vmatpush3.bf16.msra.mxu0 %v2885_v31  ;;  %10647 = vmatprep.mubr.msk.bf16.mxu0 %vm12264_vm0, %v12263_v30  ;;  %v11203_v31 = vld [vmem:[%s14973_s3 + $0x94] ss:$12 sps:$4 sm:$0xff]  }
 0x4b8   : > { %4191 = vmatprep.subr.bf16.mxu0 %v11200_v29  ;;  %4241 = vmatpush1.bf16.msra.mxu1 %v11234_v25  ;;  %v11273_v29 = vld [vmem:[%s14973_s3 + $0xc4] ss:$12 sps:$4 sm:$0xff]  }
 0x4b9   : > { %4242 = vmatprep.subr.bf16.mxu1 %v11242_v27 }
 0x4bc   : > { %4243 = vmatpush1.bf16.msra.mxu1 %v11240_v22  ;;  %v11269_v22 = vld [vmem:[%s14973_s3 + $0xb0] ss:$12 sps:$4 sm:$0xff]  }
 0x4bd   : > { %4244 = vmatprep.subr.bf16.mxu1 %v11248_v39  ;;  %v11282_v39 = vld [vmem:[%s14973_s3 + $0x68] ss:$12 sps:$4 sm:$0xff]  }
 0x4be   : > { %10648 = vmatmul.mubr.msk.bf16.vlgmr.msra.gmra.mxu0 %vm3197_vm4, %v3334_v58 }
 0x4bf   : > { %4192 = vmatpush1.bf16.msra.mxu0 %v11198_v21  ;;  %v11271_v21 = vld [vmem:[%s14973_s3 + $0xc0] ss:$12 sps:$4 sm:$0xff]  }
 0x4c0   : > { %4193 = vmatprep.subr.bf16.mxu0 %v11203_v31  ;;  %4245 = vmatpush1.bf16.msra.mxu1 %v11246_v34  ;;  %v11283_v34 = vld [vmem:[%s14973_s3 + $0x218] ss:$12 sps:$4 sm:$0xff]  }
 0x4c1   : > { %4246 = vmatprep.subr.bf16.mxu1 %v11254_v38  ;;  %v11286_v38 = vld [vmem:[%s14973_s3 + $0x200] ss:$12 sps:$4 sm:$0xff]  }
 0x4c3   : > { %4194 = vmatpush1.bf16.msra.mxu0 %v11201_v6 }
 0x4c4   : > { %4195 = vmatprep.subr.bf16.mxu0 %v11206_v3  ;;  %4247 = vmatpush1.bf16.msra.mxu1 %v11252_v40  ;;  %v11287_v40 = vld [vmem:[%s14973_s3 + $0xf8] ss:$12 sps:$4 sm:$0xff]  }
 0x4c5   : > { %4248 = vmatprep.subr.bf16.mxu1 %v11260_v47  ;;  %v11290_v47 = vld [vmem:[%s14973_s3 + $0xe0] ss:$12 sps:$4 sm:$0xff]  }
 0x4c7   : > { %4196 = vmatpush1.bf16.msra.mxu0 %v11204_v10 }
 0x4c8   : > { %4197 = vmatprep.subr.bf16.mxu0 %v11209_v16  ;;  %4249 = vmatpush1.bf16.msra.mxu1 %v11258_v42  ;;  %v11291_v42 = vld [vmem:[%s14973_s3 + $0x20] ss:$12 sps:$4 sm:$0xff]  }
 0x4c9   : > { %10422 = vmatprep.subr.bf16.mxu1 %v11264_v51  ;;  %v11296_v51 = vld [vmem:[%s14973_s3 + $0x1a0] ss:$12 sps:$4 sm:$0xff]  }
 0x4cb   : > { %4198 = vmatpush1.bf16.msra.mxu0 %v11207_v7 }
 0x4cc   : > { %4199 = vmatprep.subr.bf16.mxu0 %v11212_v20 }
 0x4cf   : > { %4200 = vmatpush1.bf16.msra.mxu0 %v11210_v23 }
 0x4d0   : > { %4201 = vmatprep.subr.bf16.mxu0 %v11215_v55 }
 0x4d3   : > { %4202 = vmatpush1.bf16.msra.mxu0 %v11213_v9 }
 0x4d4   : > { %4203 = vmatprep.subr.bf16.mxu0 %v11221_v28 }
 0x4d7   : > { %4204 = vmatpush1.bf16.msra.mxu0 %v11219_v2 }
 0x4d8   : > { %4205 = vmatprep.subr.bf16.mxu0 %v11227_v13  ;;  %v11270_v13 = vld [vmem:[%s14973_s3 + $0x158] ss:$12 sps:$4 sm:$0xff]  }
 0x4db   : > { %4206 = vmatpush1.bf16.msra.mxu0 %v11225_v14  ;;  %v11274_v14 = vld [vmem:[%s14973_s3 + $0x98] ss:$12 sps:$4 sm:$0xff]  }
 0x4dc   : > { %4207 = vmatprep.subr.bf16.mxu0 %v11233_v32  ;;  %v11275_v32 = vld [vmem:[%s14973_s3 + $0x140] ss:$12 sps:$4 sm:$0xff]  }
 0x4dd   : > { %v13546_v59 = vpop.f32.mrf.mxu1 }
 0x4de   : > { %v10388_v58 = vpack.c.bf16 %v13546_v59, %v13546_v59 }
 0x4df   : > { %v10631_v60 = vpop.f32.mrf.mxu1  ;;  %4208 = vmatpush2.bf16.msra.mxu0 %v11231_v33  ;;  %v11279_v33 = vld [vmem:[%s14973_s3 + $0x80] ss:$12 sps:$4 sm:$0xff]  }
 0x4e0   : > { %4209 = vmatprep.subr.bf16.mxu0 %v11239_v52  ;;  %v11280_v52 = vld [vmem:[%s14973_s3 + $0x230] ss:$12 sps:$4 sm:$0xff]  }
 0x4e1   : > { %v13548_v0 = vpop.f32.mrf.mxu1 }
 0x4e2   : > { %v10389_v3 = vpack.c.bf16 %v13548_v0, %v13548_v0 }
 0x4e3   : > { %v10632_v53 = vpop.f32.mrf.mxu1  ;;  %4210 = vmatpush2.bf16.msra.mxu0 %v11237_v26  ;;  %v11281_v26 = vld [vmem:[%s14973_s3 + $0x128] ss:$12 sps:$4 sm:$0xff]  }
 0x4e4   : > { %4211 = vmatprep.subr.bf16.mxu0 %v11245_v44 }
 0x4e7   : > { %4212 = vmatpush2.bf16.msra.mxu0 %v11243_v18 }
 0x4e8   : > { %4213 = vmatprep.subr.bf16.mxu0 %v11251_v37  ;;  %v11285_v37 = vld [vmem:[%s14973_s3 + $0x50] ss:$12 sps:$4 sm:$0xff]  }
 0x4eb   : > { %4214 = vmatpush2.bf16.msra.mxu0 %v11249_v36  ;;  %v11284_v36 = vld [vmem:[%s14973_s3 + $0x110] ss:$12 sps:$4 sm:$0xff]  }
 0x4ec   : > { %4215 = vmatprep.subr.bf16.mxu0 %v11257_v46  ;;  %v11289_v46 = vld [vmem:[%s14973_s3 + $0x1e8] ss:$12 sps:$4 sm:$0xff]  }
 0x4ef   : > { %4216 = vmatpush2.bf16.msra.mxu0 %v11255_v41  ;;  %v11288_v41 = vld [vmem:[%s14973_s3 + $0x38] ss:$12 sps:$4 sm:$0xff]  }
 0x4f0   : > { %4217 = vmatprep.subr.bf16.mxu0 %v11263_v49  ;;  %v11293_v49 = vld [vmem:[%s14973_s3 + $0xc8] ss:$12 sps:$4 sm:$0xff]  }
 0x4f3   : > { %4218 = vmatpush2.bf16.msra.mxu0 %v11261_v48  ;;  %v11292_v48 = vld [vmem:[%s14973_s3 + $0x1d0] ss:$12 sps:$4 sm:$0xff]  }
 0x4f4   : > { %4219 = vmatprep.subr.bf16.mxu0 %v11267_v61 }
 0x4f7   : > { %4220 = vmatpush2.bf16.msra.mxu0 %v11265_v62 }
 0x4f8   : > { %4221 = vmatprep.subr.bf16.mxu0 %v11273_v29 }
 0x4fb   : > { %4222 = vmatpush2.bf16.msra.mxu0 %v11271_v21 }
 0x4fc   : > { %10657 = vmatprep.subr.bf16.mxu0 %v12263_v30 }
 0x509   : > { %v13562_v1 = vpop.f32.mrf.mxu1 }
 0x50a   : > { %v10392_v4 = vpack.c.bf16 %v13562_v1, %v13562_v1 }
 0x50b   : > { %v10643_v8 = vpop.f32.mrf.mxu1 }
 0x50d   : > { %v13582_v15 = vpop.f32.mrf.mxu1 }
 0x50e   : > { %v10393_v10 = vpack.c.bf16 %v13582_v15, %v13582_v15 }
 0x50f   : > { %v10644_v43 = vpop.f32.mrf.mxu1 }
 0x56a   : > { %v3593_v54 = vpop.f32.mrf.mxu1 }
 0x56b   : > { %v10396_v45 = vpack.c.bf16 %v3593_v54, %v3593_v54  ;;  %v11294_v54 = vld [vmem:[%s14973_s3 + $0x8] ss:$12 sps:$4 sm:$0xff]  }
 0x56c   : > { %v10655_v57 = vpop.f32.mrf.mxu1 }
 0x56d   : > { %3666 = vrot.lane.b32.xlu1 %v10396_v45, %s12262_s27  ;;  %v11295_v45 = vld [vmem:[%s14973_s3 + $0x1b8] ss:$12 sps:$4 sm:$0xff]   ;;  %v11297_v57 = vld [vmem:[%s14973_s3 + $0x188] ss:$12 sps:$4 sm:$0xff]  }
 0x56e   : > { %v3373_v50 = vpop.f32.mrf.mxu0  ;;  %v3596_v56 = vpop.f32.mrf.mxu1 }
 0x56f   : > { %v10386_v60 = vpack.c.bf16 %v3373_v50, %v3373_v50  ;;  %v10397_v53 = vpack.c.bf16 %v3596_v56, %v3596_v56  ;;  %v13803_v56 = vsub.s32 1, %v13438_v63 }
 0x570   : > { %v10625_v31 = vpop.f32.mrf.mxu0  ;;  %v10656_v6 = vpop.f32.mrf.mxu1 }
 0x571   : > { %3609 = vst.msk [vmem:[#allocation2] sm:$0xf] %vm3608_vm5, %v10386_v60  ;;  %3617 = vrot.lane.b32.xlu1 %v10388_v58, %s12262_s27  ;;  %3668 = vrot.lane.b32.xlu0 %v10397_v53, %s12262_s27  ;;  %v13806_v53 = vsub.s32 0, %v13438_v63 }
 0x572   : > { %v3376_v59 = vpop.f32.mrf.mxu0 }
 0x573   : > { %v10387_v5 = vpack.c.bf16 %v3376_v59, %v3376_v59 }
 0x574   : > { %v10626_v12 = vpop.f32.mrf.mxu0 }
 0x575   : > { %3610 = vst.msk [vmem:[#allocation2 + $0xc] sm:$0xf] %vm3608_vm5, %v10387_v5  ;;  %3619 = vrot.lane.b32.xlu1 %v10389_v3, %s12262_s27  ;;  %3642 = vrot.lane.b32.xlu0 %v10392_v4, %s12262_s27  ;;  %v13814_v4 = vsub.s32 2, %v13438_v63 }
 0x576   : > { %v3461_v8 = vpop.f32.mrf.mxu0 }
 0x577   : > { %v10390_v11 = vpack.c.bf16 %v3461_v8, %v3461_v8 }
 0x578   : > { %v10637_v0 = vpop.f32.mrf.mxu0 }
 0x579   : > { %3634 = vst.msk [vmem:[#allocation2 + $0x4] sm:$0xf] %vm3608_vm5, %v10390_v11  ;;  %3644 = vrot.lane.b32.xlu1 %v10393_v10, %s12262_s27  ;;  %s12196_s27 = sshll.u32 %s12266_s24, 4  ;;  %s12197_s27 = int_to_ptr.vmem [resolvable:$false] %s12196_s27 }
 0x57a   : > { %v3464_v1 = vpop.f32.mrf.mxu0  ;;  %s12198_s25 = scalar_lea.vmem %s12197_s27, 1536 }
 0x57b   : > { %v10391_v16 = vpack.c.bf16 %v3464_v1, %v3464_v1 }
 0x57c   : > { %v10638_v35 = vpop.f32.mrf.mxu0 }
 0x57d   : > { %3635 = vst.msk [vmem:[#allocation2 + $0x10] sm:$0xf] %vm3608_vm5, %v10391_v16  ;;  %v506_v35 = vld [vmem:[%s500_s14 + $0x8] sm:$0xff] }
 0x57e   : > { %v3549_v43 = vpop.f32.mrf.mxu0 }
 0x57f   : > { %v10394_v7 = vpack.c.bf16 %v3549_v43, %v3549_v43 }
 0x580   : > { %v10649_v19 = vpop.f32.mrf.mxu0 }
 0x581   : > { %3658 = vst.msk [vmem:[#allocation2 + $0x8] sm:$0xf] %vm3608_vm5, %v10394_v7 }
 0x582   : > { %v3552_v20 = vpop.f32.mrf.mxu0 }
 0x583   : > { %v10395_v17 = vpack.c.bf16 %v3552_v20, %v3552_v20  ;;  %v505_v20 = vld [vmem:[%s500_s14] sm:$0xff] }
 0x584   : > { %v10650_v23 = vpop.f32.mrf.mxu0 }
 0x585   : > { %3659 = vst.msk [vmem:[#allocation2 + $0x14] sm:$0xf] %vm3608_vm5, %v10395_v17 }
 0x5df   : > { %v3667_v15 = vpop.permute.xlu1 %3666 }
 0x5e0   : > { %3672 = vst.msk [vmem:[#allocation2 + $0x8] sm:$0xf] %vm3623_vm6, %v3667_v15 }
 0x5e3   : > { %v3618_v25 = vpop.permute.xlu1 %3617  ;;  %v3669_v55 = vpop.permute.xlu0 %3668 }
 0x5e4   : > { %3624 = vst.msk [vmem:[#allocation2] sm:$0xf] %vm3623_vm6, %v3618_v25  ;;  %3673 = vst.msk [vmem:[#allocation2 + $0x14] sm:$0xf] %vm3623_vm6, %v3669_v55  ;;  %v509_v55 = vld [vmem:[%s500_s14 + $0x20] sm:$0xff] }
 0x5e7   : > { %v3620_v27 = vpop.permute.xlu1 %3619  ;;  %v3643_v9 = vpop.permute.xlu0 %3642 }
 0x5e8   : > { %3625 = vst.msk [vmem:[#allocation2 + $0xc] sm:$0xf] %vm3623_vm6, %v3620_v27  ;;  %3648 = vst.msk [vmem:[#allocation2 + $0x4] sm:$0xf] %vm3623_vm6, %v3643_v9  ;;  %v507_v27 = vld [vmem:[%s500_s14 + $0x10] sm:$0xff] }
 0x5eb   : > { %v3645_v28 = vpop.permute.xlu1 %3644  ;;  %v11268_v2 = vld [vmem:[#allocation2 + $0x8] ss:$12 sps:$4 sm:$0xff]  }
 0x5ec   : > { %3649 = vst.msk [vmem:[#allocation2 + $0x10] sm:$0xf] %vm3623_vm6, %v3645_v28  ;;  %4267 = vmatmul.mubr.bf16.vlgmr.msra.gmra.mxu1 %v11268_v2 }
 0x5ed   : > { %10423 = vmatpush3.bf16.msra.mxu1 %v11269_v22 }
 0x5ee   : > { %10424 = vmatprep.subr.bf16.mxu1 %v11270_v13  ;;  %v508_v13 = vld [vmem:[%s500_s14 + $0x18] sm:$0xff] }
 0x5ef   : > { %v11276_v44 = vld [vmem:[#allocation2] ss:$12 sps:$4 sm:$0xff]  }
 0x5f1   : > { %10425 = vmatpush3.bf16.msra.mxu1 %v11274_v14 }
 0x5f2   : > { %10426 = vmatprep.subr.bf16.mxu1 %v11275_v32 }
 0x5f3   : > { %v11278_v18 = vld [vmem:[#allocation2 + $0x4] ss:$12 sps:$4 sm:$0xff]  }
 0x5f4   : > { %4223 = vmatprep.mubr.bf16.mxu0 %v11278_v18  ;;  %4309 = vmatprep.mubr.bf16.mxu1 %v11278_v18 }
 0x5f5   : > { %10427 = vmatpush3.bf16.msra.mxu1 %v11279_v33  ;;  %4224 = vmatmul.mubr.bf16.vlgmr.msra.gmra.mxu0 %v11276_v44 }
 0x5f6   : > { %10658 = vmatpush3.bf16.msra.mxu0 %v11280_v52  ;;  %10428 = vmatprep.subr.bf16.mxu1 %v11281_v26 }
 0x5f7   : > { %10659 = vmatprep.subr.bf16.mxu0 %v12263_v30  ;;  %10673 = vmatprep.mubr.msk.bf16.mxu0 %vm12264_vm0, %v12263_v30 }
 0x5f9   : > { %10429 = vmatpush3.bf16.msra.mxu1 %v11282_v39 }
 0x5fa   : > { %10660 = vmatpush3.bf16.msra.mxu0 %v11283_v34  ;;  %10430 = vmatprep.subr.bf16.mxu1 %v11284_v36 }
 0x5fb   : > { %10661 = vmatprep.subr.bf16.mxu0 %v12263_v30 }
 0x5fd   : > { %10431 = vmatpush3.bf16.msra.mxu1 %v11285_v37 }
 0x5fe   : > { %10662 = vmatpush3.bf16.msra.mxu0 %v11286_v38  ;;  %10432 = vmatprep.subr.bf16.mxu1 %v11287_v40 }
 0x5ff   : > { %10663 = vmatprep.subr.bf16.mxu0 %v12263_v30 }
 0x601   : > { %10433 = vmatpush3.bf16.msra.mxu1 %v11288_v41 }
 0x602   : > { %10664 = vmatpush3.bf16.msra.mxu0 %v11289_v46  ;;  %10434 = vmatprep.subr.bf16.mxu1 %v11290_v47  ;;  %v11298_v46 = vld [vmem:[%s14977_s7 + $0x2a0] ss:$48 sps:$4 sm:$0xff]   ;;  %v11300_v47 = vld [vmem:[%s14977_s7 + $0x2a4] ss:$48 sps:$4 sm:$0xff]  }
 0x603   : > { %10665 = vmatprep.subr.bf16.mxu0 %v12263_v30 }
 0x605   : > { %10435 = vmatpush3.bf16.msra.mxu1 %v11291_v42  ;;  %v11303_v42 = vld [vmem:[%s14977_s7 + $0x244] ss:$48 sps:$4 sm:$0xff]  }
 0x606   : > { %10666 = vmatpush3.bf16.msra.mxu0 %v11292_v48  ;;  %10436 = vmatprep.subr.bf16.mxu1 %v11293_v49  ;;  %v11301_v48 = vld [vmem:[%s14977_s7 + $0x240] ss:$48 sps:$4 sm:$0xff]   ;;  %v11306_v49 = vld [vmem:[%s14977_s7 + $0x1e4] ss:$48 sps:$4 sm:$0xff]  }
 0x607   : > { %10667 = vmatprep.subr.bf16.mxu0 %v12263_v30 }
 0x609   : > { %10437 = vmatpush3.bf16.msra.mxu1 %v11294_v54  ;;  %v11322_v54 = vld [vmem:[%s14977_s7 + $0x8a0] ss:$48 sps:$4 sm:$0xff]  }
 0x60a   : > { %10668 = vmatpush3.bf16.msra.mxu0 %v11295_v45  ;;  %6249 = vmatprep.subr.bf16.mxu1 %v11300_v47  ;;  %v11324_v45 = vld [vmem:[%s14977_s7 + $0x8a4] ss:$48 sps:$4 sm:$0xff]  }
 0x60b   : > { %10669 = vmatprep.subr.bf16.mxu0 %v12263_v30  ;;  %v11351_v47 = vld [vmem:[%s14977_s7 + $0x424] ss:$48 sps:$4 sm:$0xff]  }
 0x60c   : > { %4310 = vmatmul.mubr.bf16.vlgmr.msra.gmra.mxu1 %v11276_v44  ;;  %v510_v44 = vld [vmem:[%s500_s14 + $0x28] sm:$0xff]  ;;  %s14905_s14 = scalar_lea.vmem [#allocation7], %s10680_s12 }
 0x60d   : > { %6250 = vmatpush1.bf16.msra.mxu1 %v11298_v46  ;;  %v11346_v46 = vld [vmem:[%s14977_s7 + $0x720] ss:$48 sps:$4 sm:$0xff]   ;;  %s9269_s26 = sshll.u32 %s14905_s14, 4  ;;  %s14919_s26 = int_to_ptr.vmem [resolvable:$true] %s9269_s26 }
 0x60e   : > { %10670 = vmatpush3.bf16.msra.mxu0 %v11296_v51  ;;  %6251 = vmatprep.subr.bf16.mxu1 %v11303_v42  ;;  %v11304_v51 = vld [vmem:[%s14977_s7 + $0x1e0] ss:$48 sps:$4 sm:$0xff]   ;;  %s12192_s22 = scalar_lea.vmem %s14919_s26, 768  ;;  %p12199_p13 = scmp.lt.s32.totalorder %s14919_s26, %s12197_s27 }
 0x60f   : > { %10671 = vmatprep.subr.bf16.mxu0 %v12263_v30  ;;  %v3774_v30 = vld [vmem:[%s14974_s4] sm:$0x7]  ;;  %p12193_p6 = scmp.ne.s32.totalorder %s14919_s26, %s12192_s22  ;;  %p12200_p0 = scmp.lt.s32.totalorder %s12198_s25, %s12192_s22 }
 0x610   : > { %v3783_v21 = vrot.slane %v3774_v30, %v13803_v56  ;;  %v3779_v6 = vrot.slane %v3774_v30, %v13806_v53  ;;  %v3787_v16 = vrot.slane %v3774_v30, %v13814_v4  ;;  %v11318_v30 = vld [vmem:[%s14977_s7 + $0x64] ss:$48 sps:$4 sm:$0xff]   ;;  %v11349_v42 = vld [vmem:[%s14977_s7 + $0x420] ss:$48 sps:$4 sm:$0xff]  }
 0x611   : > { %6252 = vmatpush1.bf16.msra.mxu1 %v11301_v48  ;;  %v11354_v48 = vld [vmem:[%s14977_s7 + $0x6c4] ss:$48 sps:$4 sm:$0xff]   ;;  %p12194_p11 = pnand %p12193_p6, %p14993_p10  ;;  %p12201_p1 = por %p12200_p0, %p12199_p13 }
 0x612   : > { %10672 = vmatpush3.bf16.msra.mxu0 %v11297_v57  ;;  %6253 = vmatprep.subr.bf16.mxu1 %v11306_v49  ;;  %v11309_v57 = vld [vmem:[%s14977_s7 + $0x184] ss:$48 sps:$4 sm:$0xff]  }
 0x613   : > { %6292 = vmatprep.subr.bf16.mxu0 %v11324_v45  ;;  %v11357_v49 = vld [vmem:[%s14977_s7 + $0x3c4] ss:$48 sps:$4 sm:$0xff]   ;;  %v11355_v45 = vld [vmem:[%s14977_s7 + $0x3c0] ss:$48 sps:$4 sm:$0xff]   ;;  %p12195_p12 = pneg %p12194_p11 }
 0x615   : > { %10674 = vmatmul.mubr.bf16.vlgmr.msra.gmra.mxu0 %v11268_v2  ;;  %6254 = vmatpush1.bf16.msra.mxu1 %v11304_v51  ;;  %v11360_v51 = vld [vmem:[%s14977_s7 + $0x664] ss:$48 sps:$4 sm:$0xff]   ;;  %p12202_p2 = pnand %p12201_p1, %p12195_p12 }
 0x616   : > { %6324 = vmatprep.mubr.bf16.mxu0 %v12261_v24  ;;  %6293 = vmatpush1.bf16.msra.mxu0 %v11322_v54  ;;  %v11352_v54 = vld [vmem:[%s14977_s7 + $0x6c0] ss:$48 sps:$4 sm:$0xff]  }
 0x617   : > { %6255 = vmatprep.subr.bf16.mxu1 %v11309_v57  ;;  %v11363_v57 = vld [vmem:[%s14977_s7 + $0x364] ss:$48 sps:$4 sm:$0xff]  }
 0x6ac   : > { %v4268_v62 = vpop.f32.mrf.mxu1 }
 0x6ae   : > { %v4270_v50 = vpop.f32.mrf.mxu1 }
 0x6b0   : > { %v4272_v60 = vpop.f32.mrf.mxu1 }
 0x6b2   : > { %v4274_v31 = vpop.f32.mrf.mxu1 }
 0x6b5   : > { %v4225_v61 = vpop.f32.mrf.mxu0 }
 0x6b6   : > { %v4226_v12 = vadd.f32 %v4225_v61, %v3779_v6  ;;  %v11312_v61 = vld [vmem:[%s14977_s7 + $0x124] ss:$48 sps:$4 sm:$0xff]  }
 0x6b7   : > { %v4227_v58 = vpop.f32.mrf.mxu0 }
 0x6b8   : > { %v4228_v59 = vadd.f32 %v4227_v58, %v3783_v21  ;;  %v4269_v43 = vadd.f32 %v4268_v62, %v4226_v12  ;;  %v11307_v62 = vld [vmem:[%s14977_s7 + $0x180] ss:$48 sps:$4 sm:$0xff]   ;;  %v11315_v58 = vld [vmem:[%s14977_s7 + $0xc4] ss:$48 sps:$4 sm:$0xff]  }
 0x6b9   : > { %v4229_v29 = vpop.f32.mrf.mxu0  ;;  %6256 = vmatpush1.bf16.msra.mxu1 %v11307_v62  ;;  %v11358_v62 = vld [vmem:[%s14977_s7 + $0x660] ss:$48 sps:$4 sm:$0xff]  }
 0x6ba   : > { %v4271_v10 = vadd.f32 %v4270_v50, %v4228_v59  ;;  %v4230_v7 = vadd.f32 %v4229_v29, %v3779_v6  ;;  %v13822_v22 = vadd.f32 %v4269_v43, %v505_v20  ;;  %v11310_v50 = vld [vmem:[%s14977_s7 + $0x120] ss:$48 sps:$4 sm:$0xff]   ;;  %6257 = vmatprep.subr.bf16.mxu1 %v11312_v61  ;;  %v11321_v29 = vld [vmem:[%s14977_s7 + $0x4] ss:$48 sps:$4 sm:$0xff]  }
 0x6bb   : > { %v4231_v5 = vpop.f32.mrf.mxu0  ;;  %v11327_v6 = vld [vmem:[%s14977_s7 + $0x5a4] ss:$48 sps:$4 sm:$0xff]   ;;  %v11325_v59 = vld [vmem:[%s14977_s7 + $0x5a0] ss:$48 sps:$4 sm:$0xff]  }
 0x6bc   : > { %v4232_v11 = vadd.f32 %v4231_v5, %v3783_v21  ;;  %v13820_v17 = vadd.f32 %v4271_v10, %v506_v35  ;;  %v4273_v28 = vadd.f32 %v4272_v60, %v4230_v7  ;;  %v11313_v60 = vld [vmem:[%s14977_s7 + $0xc0] ss:$48 sps:$4 sm:$0xff]  }
 0x6bd   : > { %6258 = vmatpush1.bf16.msra.mxu1 %v11310_v50  ;;  %v11316_v21 = vld [vmem:[%s14977_s7 + $0x60] ss:$48 sps:$4 sm:$0xff]   ;;  %v11366_v50 = vld [vmem:[%s14977_s7 + $0x604] ss:$48 sps:$4 sm:$0xff]  }
 0x6be   : > { %v4275_v23 = vadd.f32 %v4274_v31, %v4232_v11  ;;  %v4365_v26 = vadd.f32 %v13820_v17, %v13822_v22  ;;  %v13830_v39 = vadd.f32 %v4273_v28, %v508_v13  ;;  %6259 = vmatprep.subr.bf16.mxu1 %v11315_v58  ;;  %v11319_v31 = vld [vmem:[%s14977_s7] ss:$48 sps:$4 sm:$0xff]   ;;  %v11330_v28 = vld [vmem:[%s14977_s7 + $0x844] ss:$48 sps:$4 sm:$0xff]  }
 0x6bf   : > { %v11333_v13 = vld [vmem:[%s14977_s7 + $0x544] ss:$48 sps:$4 sm:$0xff]   ;;  %6294 = vmatprep.subr.bf16.mxu0 %v11330_v28  ;;  %v11361_v61 = vld [vmem:[%s14977_s7 + $0x360] ss:$48 sps:$4 sm:$0xff]  }
 0x6c0   : > { %v13824_v32 = vadd.f32 %v4275_v23, %v509_v55  ;;  %v11369_v58 = vld [vmem:[%s14977_s7 + $0x304] ss:$48 sps:$4 sm:$0xff]  }
 0x6c1   : > { %6260 = vmatpush1.bf16.msra.mxu1 %v11313_v60  ;;  %v11364_v60 = vld [vmem:[%s14977_s7 + $0x600] ss:$48 sps:$4 sm:$0xff]  }
 0x6c2   : > { %v4369_v40 = vadd.f32 %v13824_v32, %v13830_v39  ;;  %6261 = vmatprep.subr.bf16.mxu1 %v11318_v30  ;;  %v11367_v30 = vld [vmem:[%s14977_s7 + $0x300] ss:$48 sps:$4 sm:$0xff]  }
 0x6c5   : > { %6262 = vmatpush1.bf16.msra.mxu1 %v11316_v21  ;;  %v11372_v21 = vld [vmem:[%s14977_s7 + $0x2ac] ss:$48 sps:$4 sm:$0xff]  }
 0x6c6   : > { %6263 = vmatprep.subr.bf16.mxu1 %v11321_v29  ;;  %v11375_v29 = vld [vmem:[%s14977_s7 + $0x8ac] ss:$48 sps:$4 sm:$0xff]  }
 0x6c9   : > { %6264 = vmatpush1.bf16.msra.mxu1 %v11319_v31 }
 0x6ca   : > { %6265 = vmatprep.subr.bf16.mxu1 %v11327_v6 }
 0x6cc   : > { %v10438_v3 = vpop.f32.mrf.mxu1 }
 0x6cd   : > { %6266 = vmatpush2.bf16.msra.mxu1 %v11325_v59 }
 0x6ce   : > { %v10439_v8 = vpop.f32.mrf.mxu1  ;;  %6267 = vmatprep.subr.bf16.mxu1 %v11333_v13 }
 0x6cf   : > { %v10440_v0 = vadd.f32 %v10439_v8, %v10438_v3 }
 0x6d0   : > { %v10441_v1 = vpop.f32.mrf.mxu1 }
 0x6d1   : > { %v4312_v25 = vadd.f32 %v10440_v0, %v3787_v16 }
 0x6d2   : > { %v10442_v19 = vpop.f32.mrf.mxu1 }
 0x6d3   : > { %v10443_v15 = vadd.f32 %v10442_v19, %v10441_v1 }
 0x6d5   : > { %v4352_v9 = vpop.f32.mrf.mxu0  ;;  %v4315_v52 = vadd.f32 %v10443_v15, %v3787_v16 }
 0x6d6   : > { %v4353_v2 = vadd.f32 %v4352_v9, %v4312_v25 }
 0x6d7   : > { %v10675_v14 = vpop.f32.mrf.mxu0 }
 0x6d8   : > { %v13826_v33 = vadd.f32 %v4353_v2, %v507_v27  ;;  %v11328_v2 = vld [vmem:[%s14977_s7 + $0x840] ss:$48 sps:$4 sm:$0xff]  }
 0x6d9   : > { %v4355_v18 = vpop.f32.mrf.mxu0  ;;  %v11331_v14 = vld [vmem:[%s14977_s7 + $0x540] ss:$48 sps:$4 sm:$0xff]   ;;  %6295 = vmatpush1.bf16.msra.mxu0 %v11328_v2 }
 0x6da   : > { %v4356_v34 = vadd.f32 %v4355_v18, %v4315_v52  ;;  %v4366_v36 = vadd.f32 %v4365_v26, %v13826_v33  ;;  %6268 = vmatpush2.bf16.msra.mxu1 %v11331_v14  ;;  %v11336_v52 = vld [vmem:[%s14977_s7 + $0x7e4] ss:$48 sps:$4 sm:$0xff]   ;;  %v11334_v26 = vld [vmem:[%s14977_s7 + $0x7e0] ss:$48 sps:$4 sm:$0xff]  }
 0x6db   : > { %v10676_v37 = vpop.f32.mrf.mxu0  ;;  %6296 = vmatprep.subr.bf16.mxu0 %v11336_v52  ;;  %v11337_v18 = vld [vmem:[%s14977_s7 + $0x4e0] ss:$48 sps:$4 sm:$0xff]  }
 0x6dc   : > { %v13833_v38 = vadd.f32 %v4356_v34, %v510_v44  ;;  %4367 = vadd.xlane.f32.xlu0 %v4366_v36  ;;  %v11339_v44 = vld [vmem:[%s14977_s7 + $0x4e4] ss:$48 sps:$4 sm:$0xff]   ;;  %v11340_v36 = vld [vmem:[%s14977_s7 + $0x780] ss:$48 sps:$4 sm:$0xff]  }
 0x6dd   : > { %6269 = vmatprep.subr.bf16.mxu1 %v11339_v44  ;;  %6297 = vmatpush1.bf16.msra.mxu0 %v11334_v26  ;;  %v11342_v34 = vld [vmem:[%s14977_s7 + $0x784] ss:$48 sps:$4 sm:$0xff]   ;;  %v11343_v37 = vld [vmem:[%s14977_s7 + $0x480] ss:$48 sps:$4 sm:$0xff]  }
 0x6de   : > { %v4370_v41 = vadd.f32 %v4369_v40, %v13833_v38  ;;  %6270 = vmatpush2.bf16.msra.mxu1 %v11337_v18  ;;  %v11345_v40 = vld [vmem:[%s14977_s7 + $0x484] ss:$48 sps:$4 sm:$0xff]   ;;  %6298 = vmatprep.subr.bf16.mxu0 %v11342_v34 }
 0x6df   : > { %6271 = vmatprep.subr.bf16.mxu1 %v11345_v40 }
 0x6e0   : > { %4371 = vadd.xlane.f32.xlu1 %v4370_v41  ;;  %v11348_v41 = vld [vmem:[%s14977_s7 + $0x724] ss:$48 sps:$4 sm:$0xff]  }
 0x6e1   : > { %6299 = vmatpush1.bf16.msra.mxu0 %v11340_v36 }
 0x6e2   : > { %6272 = vmatpush2.bf16.msra.mxu1 %v11343_v37  ;;  %6300 = vmatprep.subr.bf16.mxu0 %v11348_v41 }
 0x6e3   : > { %6273 = vmatprep.subr.bf16.mxu1 %v11351_v47 }
 0x6e5   : > { %6301 = vmatpush1.bf16.msra.mxu0 %v11346_v46 }
 0x6e6   : > { %6274 = vmatpush2.bf16.msra.mxu1 %v11349_v42  ;;  %6302 = vmatprep.subr.bf16.mxu0 %v11354_v48  ;;  %v11378_v48 = vld [vmem:[%s14977_s7 + $0x24c] ss:$48 sps:$4 sm:$0xff]  }
 0x6e7   : > { %6275 = vmatprep.subr.bf16.mxu1 %v11357_v49  ;;  %v11381_v49 = vld [vmem:[%s14977_s7 + $0x84c] ss:$48 sps:$4 sm:$0xff]  }
 0x6e9   : > { %6303 = vmatpush1.bf16.msra.mxu0 %v11352_v54  ;;  %v11376_v54 = vld [vmem:[%s14977_s7 + $0x248] ss:$48 sps:$4 sm:$0xff]  }
 0x6ea   : > { %6276 = vmatpush2.bf16.msra.mxu1 %v11355_v45  ;;  %6304 = vmatprep.subr.bf16.mxu0 %v11360_v51  ;;  %v11379_v45 = vld [vmem:[%s14977_s7 + $0x848] ss:$48 sps:$4 sm:$0xff]   ;;  %v11384_v51 = vld [vmem:[%s14977_s7 + $0x1ec] ss:$48 sps:$4 sm:$0xff]  }
 0x6eb   : > { %6277 = vmatprep.subr.bf16.mxu1 %v11363_v57  ;;  %v11387_v57 = vld [vmem:[%s14977_s7 + $0x7ec] ss:$48 sps:$4 sm:$0xff]  }
 0x6ed   : > { %6305 = vmatpush1.bf16.msra.mxu0 %v11358_v62  ;;  %v11382_v62 = vld [vmem:[%s14977_s7 + $0x1e8] ss:$48 sps:$4 sm:$0xff]  }
 0x6ee   : > { %6278 = vmatpush2.bf16.msra.mxu1 %v11361_v61  ;;  %6306 = vmatprep.subr.bf16.mxu0 %v11366_v50  ;;  %v11385_v61 = vld [vmem:[%s14977_s7 + $0x7e8] ss:$48 sps:$4 sm:$0xff]   ;;  %v11390_v50 = vld [vmem:[%s14977_s7 + $0x18c] ss:$48 sps:$4 sm:$0xff]  }
 0x6ef   : > { %6279 = vmatprep.subr.bf16.mxu1 %v11369_v58  ;;  %v11393_v58 = vld [vmem:[%s14977_s7 + $0x78c] ss:$48 sps:$4 sm:$0xff]  }
 0x6f1   : > { %6307 = vmatpush1.bf16.msra.mxu0 %v11364_v60  ;;  %v11388_v60 = vld [vmem:[%s14977_s7 + $0x188] ss:$48 sps:$4 sm:$0xff]  }
 0x6f2   : > { %6280 = vmatpush2.bf16.msra.mxu1 %v11367_v30  ;;  %6335 = vmatprep.subr.bf16.mxu0 %v11372_v21  ;;  %v11391_v30 = vld [vmem:[%s14977_s7 + $0x788] ss:$48 sps:$4 sm:$0xff]   ;;  %v11396_v21 = vld [vmem:[%s14977_s7 + $0x12c] ss:$48 sps:$4 sm:$0xff]  }
 0x6f3   : > { %6378 = vmatprep.subr.bf16.mxu1 %v11375_v29  ;;  %v11399_v29 = vld [vmem:[%s14977_s7 + $0x72c] ss:$48 sps:$4 sm:$0xff]  }
 0x765   : > { %v4368_v3 = vpop.xlane.xlu0 %4367 }
 0x766   : > { %v4374_v5 = vmul.f32 0.0026041667, %v4368_v3 }
 0x768   : > { %v13899_v12 = vsub.f32 %v13822_v22, %v4374_v5  ;;  %v13902_v8 = vsub.f32 %v13820_v17, %v4374_v5  ;;  %v13905_v10 = vsub.f32 %v13826_v33, %v4374_v5 }
 0x769   : > { %v4372_v11 = vpop.xlane.xlu1 %4371 }
 0x76a   : > { %v4375_v0 = vmul.f32 0.0026041667, %v4372_v11  ;;  %v4382_v1 = vmul.f32 %v13899_v12, %v13899_v12  ;;  %v4383_v16 = vmul.f32 %v13902_v8, %v13902_v8  ;;  %v4384_v35 = vmul.f32 %v13905_v10, %v13905_v10 }
 0x76c   : > { %v13914_v43 = vsub.f32 %v13830_v39, %v4375_v0  ;;  %v13917_v7 = vsub.f32 %v13824_v32, %v4375_v0  ;;  %v13920_v19 = vsub.f32 %v13833_v38, %v4375_v0  ;;  %v4388_v20 = vadd.f32 %v4383_v16, %v4382_v1  ;;  %v4408_v0 = vld [vmem:[%s14975_s5] sm:$0x7] }
 0x76e   : > { %v4389_v23 = vadd.f32 %v4388_v20, %v4384_v35  ;;  %v4385_v15 = vmul.f32 %v13914_v43, %v13914_v43  ;;  %v4386_v25 = vmul.f32 %v13917_v7, %v13917_v7  ;;  %v4387_v55 = vmul.f32 %v13920_v19, %v13920_v19  ;;  %v4431_v20 = vld [vmem:[%s14976_s6] sm:$0x7] }
 0x76f   : > { %v4417_v35 = vrot.slane %v4408_v0, %v13803_v56  ;;  %v4444_v28 = vrot.slane %v4431_v20, %v13814_v4  ;;  %v4436_v26 = vrot.slane %v4431_v20, %v13806_v53 }
 0x770   : > { %4390 = vadd.xlane.f32.xlu0 %v4389_v23  ;;  %v4392_v27 = vadd.f32 %v4386_v25, %v4385_v15  ;;  %v4421_v15 = vrot.slane %v4408_v0, %v13814_v4 }
 0x772   : > { %v4393_v9 = vadd.f32 %v4392_v27, %v4387_v55  ;;  %v4413_v55 = vrot.slane %v4408_v0, %v13806_v53  ;;  %v11408_v0 = vld [vmem:[%s14977_s7 + $0x6c] ss:$48 sps:$4 sm:$0xff]  }
 0x774   : > { %4394 = vadd.xlane.f32.xlu0 %v4393_v9  ;;  %v4440_v9 = vrot.slane %v4431_v20, %v13803_v56  ;;  %v11414_v20 = vld [vmem:[%s14977_s7 + $0xc] ss:$48 sps:$4 sm:$0xff]  }
 0x7f9   : > { %v4391_v31 = vpop.xlane.xlu0 %4390 }
 0x7fa   : > { %v4396_v6 = vmul.f32 0.0026041667, %v4391_v31  ;;  %v11394_v31 = vld [vmem:[%s14977_s7 + $0x128] ss:$48 sps:$4 sm:$0xff]  }
 0x7fc   : > { %v4398_v59 = vadd.f32 1e-05, %v4396_v6  ;;  %v11397_v6 = vld [vmem:[%s14977_s7 + $0x728] ss:$48 sps:$4 sm:$0xff]  }
 0x7fd   : > { %v4395_v3 = vpop.xlane.xlu0 %4394 }
 0x7fe   : > { %12162 = vrsqrt.f32 %v4398_v59  ;;  %v4397_v5 = vmul.f32 0.0026041667, %v4395_v3  ;;  %v11402_v59 = vld [vmem:[%s14977_s7 + $0xcc] ss:$48 sps:$4 sm:$0xff]  }
 0x7ff   : > { %v11405_v3 = vld [vmem:[%s14977_s7 + $0x6cc] ss:$48 sps:$4 sm:$0xff]  }
 0x800   : > { %v4399_v11 = vadd.f32 1e-05, %v4397_v5  ;;  %v11400_v5 = vld [vmem:[%s14977_s7 + $0xc8] ss:$48 sps:$4 sm:$0xff]  }
 0x802   : > { %12164 = vrsqrt.f32 %v4399_v11  ;;  %v11403_v11 = vld [vmem:[%s14977_s7 + $0x6c8] ss:$48 sps:$4 sm:$0xff]  }
 0x80b   : > { %v12163_v1 = vpop.eup %12162 }
 0x80c   : > { %v4403_v16 = vmul.f32 %v12163_v1, %v13902_v8  ;;  %v4404_v23 = vmul.f32 %v12163_v1, %v13905_v10  ;;  %v4402_v25 = vmul.f32 %v12163_v1, %v13899_v12  ;;  %v11411_v1 = vld [vmem:[%s14977_s7 + $0x66c] ss:$48 sps:$4 sm:$0xff]  }
 0x80e   : > { %v4426_v2 = vmul.f32 %v4417_v35, %v4403_v16  ;;  %v4427_v14 = vmul.f32 %v4421_v15, %v4404_v23  ;;  %v4425_v10 = vmul.f32 %v4413_v55, %v4402_v25  ;;  %v11406_v16 = vld [vmem:[%s14977_s7 + $0x68] ss:$48 sps:$4 sm:$0xff]   ;;  %v11417_v23 = vld [vmem:[%s14977_s7 + $0x60c] ss:$48 sps:$4 sm:$0xff]  }
 0x80f   : > { %v12165_v27 = vpop.eup %12164  ;;  %v11415_v25 = vld [vmem:[%s14977_s7 + $0x608] ss:$48 sps:$4 sm:$0xff]  }
 0x810   : > { %v4406_v8 = vmul.f32 %v12165_v27, %v13917_v7  ;;  %v4407_v13 = vmul.f32 %v12165_v27, %v13920_v19  ;;  %v4405_v52 = vmul.f32 %v12165_v27, %v13914_v43  ;;  %v4449_v34 = vadd.f32 %v4440_v9, %v4426_v2  ;;  %v11370_v7 = vld [vmem:[%s14977_s7 + $0x2a8] ss:$48 sps:$4 sm:$0xff]   ;;  %v11423_v27 = vld [vmem:[%s14977_s7 + $0x2b4] ss:$48 sps:$4 sm:$0xff]  }
 0x811   : > { %v4450_v37 = vadd.f32 %v4444_v28, %v4427_v14  ;;  %v4448_v41 = vadd.f32 %v4436_v26, %v4425_v10  ;;  %v11373_v43 = vld [vmem:[%s14977_s7 + $0x8a8] ss:$48 sps:$4 sm:$0xff]   ;;  %v11429_v2 = vld [vmem:[%s14977_s7 + $0x254] ss:$48 sps:$4 sm:$0xff]   ;;  %v11427_v14 = vld [vmem:[%s14977_s7 + $0x250] ss:$48 sps:$4 sm:$0xff]  }
 0x812   : > { %v4429_v44 = vmul.f32 %v4417_v35, %v4406_v8  ;;  %v4430_v12 = vmul.f32 %v4421_v15, %v4407_v13  ;;  %v4428_v18 = vmul.f32 %v4413_v55, %v4405_v52  ;;  %v11409_v35 = vld [vmem:[%s14977_s7 + $0x668] ss:$48 sps:$4 sm:$0xff]   ;;  %v11420_v55 = vld [vmem:[%s14977_s7 + $0x5ac] ss:$48 sps:$4 sm:$0xff]   ;;  %v11435_v10 = vld [vmem:[%s14977_s7 + $0x1f4] ss:$48 sps:$4 sm:$0xff]  }
 0x813   : > { %v11412_v15 = vld [vmem:[%s14977_s7 + $0x8] ss:$48 sps:$4 sm:$0xff]   ;;  %v11426_v8 = vld [vmem:[%s14977_s7 + $0x54c] ss:$48 sps:$4 sm:$0xff]  }
 0x814   : > { %v4452_v36 = vadd.f32 %v4440_v9, %v4429_v44  ;;  %v4453_v40 = vadd.f32 %v4444_v28, %v4430_v12  ;;  %v4451_v46 = vadd.f32 %v4436_v26, %v4428_v18  ;;  %v11418_v9 = vld [vmem:[%s14977_s7 + $0x5a8] ss:$48 sps:$4 sm:$0xff]   ;;  %v11421_v28 = vld [vmem:[%s14977_s7 + $0x2b0] ss:$48 sps:$4 sm:$0xff]   ;;  %v11432_v52 = vld [vmem:[%s14977_s7 + $0x4ec] ss:$48 sps:$4 sm:$0xff]  }
 0x815   : > { %v11424_v13 = vld [vmem:[%s14977_s7 + $0x548] ss:$48 sps:$4 sm:$0xff]   ;;  %v11433_v44 = vld [vmem:[%s14977_s7 + $0x1f0] ss:$48 sps:$4 sm:$0xff]   ;;  %v11438_v12 = vld [vmem:[%s14977_s7 + $0x48c] ss:$48 sps:$4 sm:$0xff]  }
 0x816   : > { %v14039_v19 = vpack.c.bf16 %v4452_v36, %v4449_v34  ;;  %v14041_v47 = vpack.c.bf16 %v4453_v40, %v4450_v37  ;;  %v14046_v42 = vpack.c.bf16 %v4451_v46, %v4448_v41  ;;  %v11430_v26 = vld [vmem:[%s14977_s7 + $0x4e8] ss:$48 sps:$4 sm:$0xff]   ;;  %v11441_v18 = vld [vmem:[%s14977_s7 + $0x194] ss:$48 sps:$4 sm:$0xff]   ;;  %v11439_v36 = vld [vmem:[%s14977_s7 + $0x190] ss:$48 sps:$4 sm:$0xff]  }
 0x817   : > { %v11436_v34 = vld [vmem:[%s14977_s7 + $0x488] ss:$48 sps:$4 sm:$0xff]   ;;  %v11444_v37 = vld [vmem:[%s14977_s7 + $0x42c] ss:$48 sps:$4 sm:$0xff]   ;;  %v11447_v40 = vld [vmem:[%s14977_s7 + $0x134] ss:$48 sps:$4 sm:$0xff]  }
 0x818   : > { %6281 = vmatprep.mubr.bf16.mxu1 %v14039_v19  ;;  %6325 = vmatmul.mubr.bf16.vlgmr.msra.gmra.mxu0 %v14041_v47  ;;  %v11445_v41 = vld [vmem:[%s14977_s7 + $0x130] ss:$48 sps:$4 sm:$0xff]   ;;  %v11450_v46 = vld [vmem:[%s14977_s7 + $0x3cc] ss:$48 sps:$4 sm:$0xff]  }
 0x819   : > { %6336 = vmatpush1.bf16.msra.mxu0 %v11370_v7  ;;  %6282 = vmatmul.mubr.bf16.vlgmr.msra.gmra.mxu1 %v14046_v42  ;;  %v11442_v7 = vld [vmem:[%s14977_s7 + $0x428] ss:$48 sps:$4 sm:$0xff]  }
 0x81a   : > { %6367 = vmatprep.mubr.bf16.mxu0 %v14039_v19  ;;  %6379 = vmatpush1.bf16.msra.mxu1 %v11373_v43  ;;  %v11453_v43 = vld [vmem:[%s14977_s7 + $0xd4] ss:$48 sps:$4 sm:$0xff]  }
 0x81b   : > { %6337 = vmatprep.subr.bf16.mxu0 %v11378_v48  ;;  %6380 = vmatprep.subr.bf16.mxu1 %v11381_v49  ;;  %v11448_v48 = vld [vmem:[%s14977_s7 + $0x3c8] ss:$48 sps:$4 sm:$0xff]   ;;  %v11451_v49 = vld [vmem:[%s14977_s7 + $0xd0] ss:$48 sps:$4 sm:$0xff]  }
 0x81c   : > { %6410 = vmatprep.mubr.bf16.mxu1 %v12261_v24 }
 0x81d   : > { %6338 = vmatpush1.bf16.msra.mxu0 %v11376_v54  ;;  %v11456_v54 = vld [vmem:[%s14977_s7 + $0x36c] ss:$48 sps:$4 sm:$0xff]  }
 0x81e   : > { %6381 = vmatpush1.bf16.msra.mxu1 %v11379_v45  ;;  %6339 = vmatprep.subr.bf16.mxu0 %v11384_v51  ;;  %v11459_v45 = vld [vmem:[%s14977_s7 + $0x74] ss:$48 sps:$4 sm:$0xff]   ;;  %v11454_v51 = vld [vmem:[%s14977_s7 + $0x368] ss:$48 sps:$4 sm:$0xff]  }
 0x81f   : > { %6382 = vmatprep.subr.bf16.mxu1 %v11387_v57  ;;  %v11457_v57 = vld [vmem:[%s14977_s7 + $0x70] ss:$48 sps:$4 sm:$0xff]  }
 0x821   : > { %6340 = vmatpush1.bf16.msra.mxu0 %v11382_v62  ;;  %v11462_v62 = vld [vmem:[%s14977_s7 + $0x30c] ss:$48 sps:$4 sm:$0xff]  }
 0x822   : > { %6383 = vmatpush1.bf16.msra.mxu1 %v11385_v61  ;;  %6341 = vmatprep.subr.bf16.mxu0 %v11390_v50  ;;  %v11465_v61 = vld [vmem:[%s14977_s7 + $0x14] ss:$48 sps:$4 sm:$0xff]   ;;  %v11460_v50 = vld [vmem:[%s14977_s7 + $0x308] ss:$48 sps:$4 sm:$0xff]  }
 0x823   : > { %6384 = vmatprep.subr.bf16.mxu1 %v11393_v58  ;;  %v11463_v58 = vld [vmem:[%s14977_s7 + $0x10] ss:$48 sps:$4 sm:$0xff]  }
 0x825   : > { %6342 = vmatpush1.bf16.msra.mxu0 %v11388_v60  ;;  %v11468_v60 = vld [vmem:[%s14977_s7 + $0x8b4] ss:$48 sps:$4 sm:$0xff]  }
 0x826   : > { %6385 = vmatpush1.bf16.msra.mxu1 %v11391_v30  ;;  %6343 = vmatprep.subr.bf16.mxu0 %v11396_v21  ;;  %v11471_v30 = vld [vmem:[%s14977_s7 + $0x5b4] ss:$48 sps:$4 sm:$0xff]   ;;  %v11466_v21 = vld [vmem:[%s14977_s7 + $0x8b0] ss:$48 sps:$4 sm:$0xff]  }
 0x827   : > { %6386 = vmatprep.subr.bf16.mxu1 %v11399_v29  ;;  %v11469_v29 = vld [vmem:[%s14977_s7 + $0x5b0] ss:$48 sps:$4 sm:$0xff]  }
 0x829   : > { %6344 = vmatpush1.bf16.msra.mxu0 %v11394_v31  ;;  %v11474_v31 = vld [vmem:[%s14977_s7 + $0x854] ss:$48 sps:$4 sm:$0xff]  }
 0x82a   : > { %6387 = vmatpush1.bf16.msra.mxu1 %v11397_v6  ;;  %6345 = vmatprep.subr.bf16.mxu0 %v11402_v59  ;;  %v11477_v6 = vld [vmem:[%s14977_s7 + $0x554] ss:$48 sps:$4 sm:$0xff]   ;;  %v11472_v59 = vld [vmem:[%s14977_s7 + $0x850] ss:$48 sps:$4 sm:$0xff]  }
 0x82b   : > { %6388 = vmatprep.subr.bf16.mxu1 %v11405_v3  ;;  %v11475_v3 = vld [vmem:[%s14977_s7 + $0x550] ss:$48 sps:$4 sm:$0xff]  }
 0x82d   : > { %6346 = vmatpush1.bf16.msra.mxu0 %v11400_v5  ;;  %v11480_v5 = vld [vmem:[%s14977_s7 + $0x7f4] ss:$48 sps:$4 sm:$0xff]  }
 0x82e   : > { %6389 = vmatpush1.bf16.msra.mxu1 %v11403_v11  ;;  %6347 = vmatprep.subr.bf16.mxu0 %v11408_v0  ;;  %v11483_v11 = vld [vmem:[%s14977_s7 + $0x4f4] ss:$48 sps:$4 sm:$0xff]   ;;  %v11478_v0 = vld [vmem:[%s14977_s7 + $0x7f0] ss:$48 sps:$4 sm:$0xff]  }
 0x82f   : > { %6390 = vmatprep.subr.bf16.mxu1 %v11411_v1  ;;  %v11481_v1 = vld [vmem:[%s14977_s7 + $0x4f0] ss:$48 sps:$4 sm:$0xff]  }
 0x831   : > { %6348 = vmatpush1.bf16.msra.mxu0 %v11406_v16  ;;  %v11486_v16 = vld [vmem:[%s14977_s7 + $0x794] ss:$48 sps:$4 sm:$0xff]  }
 0x832   : > { %6391 = vmatpush1.bf16.msra.mxu1 %v11409_v35  ;;  %6349 = vmatprep.subr.bf16.mxu0 %v11414_v20  ;;  %v11489_v35 = vld [vmem:[%s14977_s7 + $0x494] ss:$48 sps:$4 sm:$0xff]   ;;  %v11484_v20 = vld [vmem:[%s14977_s7 + $0x790] ss:$48 sps:$4 sm:$0xff]  }
 0x833   : > { %6392 = vmatprep.subr.bf16.mxu1 %v11417_v23  ;;  %v11487_v23 = vld [vmem:[%s14977_s7 + $0x490] ss:$48 sps:$4 sm:$0xff]  }
 0x835   : > { %6350 = vmatpush1.bf16.msra.mxu0 %v11412_v15  ;;  %v11492_v15 = vld [vmem:[%s14977_s7 + $0x734] ss:$48 sps:$4 sm:$0xff]  }
 0x836   : > { %6393 = vmatpush1.bf16.msra.mxu1 %v11415_v25  ;;  %6351 = vmatprep.subr.bf16.mxu0 %v11420_v55  ;;  %v11495_v25 = vld [vmem:[%s14977_s7 + $0x434] ss:$48 sps:$4 sm:$0xff]   ;;  %v11490_v55 = vld [vmem:[%s14977_s7 + $0x730] ss:$48 sps:$4 sm:$0xff]  }
 0x837   : > { %6421 = vmatprep.subr.bf16.mxu1 %v11423_v27  ;;  %v11493_v27 = vld [vmem:[%s14977_s7 + $0x430] ss:$48 sps:$4 sm:$0xff]  }
 0x839   : > { %6352 = vmatpush2.bf16.msra.mxu0 %v11418_v9  ;;  %6411 = vmatmul.mubr.bf16.vlgmr.msra.gmra.mxu1 %v14041_v47  ;;  %v11498_v9 = vld [vmem:[%s14977_s7 + $0x6d4] ss:$48 sps:$4 sm:$0xff]  }
 0x83a   : > { %6422 = vmatpush1.bf16.msra.mxu1 %v11421_v28  ;;  %6453 = vmatprep.mubr.bf16.mxu1 %v14039_v19  ;;  %v11501_v28 = vld [vmem:[%s14977_s7 + $0x3d4] ss:$48 sps:$4 sm:$0xff]  }
 0x83b   : > { %6353 = vmatprep.subr.bf16.mxu0 %v11426_v8  ;;  %6423 = vmatprep.subr.bf16.mxu1 %v11429_v2  ;;  %v11496_v8 = vld [vmem:[%s14977_s7 + $0x6d0] ss:$48 sps:$4 sm:$0xff]  }
 0x83c   : > { %v11499_v2 = vld [vmem:[%s14977_s7 + $0x3d0] ss:$48 sps:$4 sm:$0xff]  }
 0x83d   : > { %6354 = vmatpush2.bf16.msra.mxu0 %v11424_v13  ;;  %v11504_v13 = vld [vmem:[%s14977_s7 + $0x674] ss:$48 sps:$4 sm:$0xff]  }
 0x83e   : > { %6424 = vmatpush1.bf16.msra.mxu1 %v11427_v14  ;;  %6355 = vmatprep.subr.bf16.mxu0 %v11432_v52  ;;  %v11507_v14 = vld [vmem:[%s14977_s7 + $0x374] ss:$48 sps:$4 sm:$0xff]   ;;  %v11502_v52 = vld [vmem:[%s14977_s7 + $0x670] ss:$48 sps:$4 sm:$0xff]  }
 0x83f   : > { %6425 = vmatprep.subr.bf16.mxu1 %v11435_v10  ;;  %v11505_v10 = vld [vmem:[%s14977_s7 + $0x370] ss:$48 sps:$4 sm:$0xff]  }
 0x841   : > { %6356 = vmatpush2.bf16.msra.mxu0 %v11430_v26  ;;  %v11510_v26 = vld [vmem:[%s14977_s7 + $0x614] ss:$48 sps:$4 sm:$0xff]  }
 0x842   : > { %6426 = vmatpush1.bf16.msra.mxu1 %v11433_v44  ;;  %6357 = vmatprep.subr.bf16.mxu0 %v11438_v12  ;;  %v11513_v44 = vld [vmem:[%s14977_s7 + $0x314] ss:$48 sps:$4 sm:$0xff]   ;;  %v11508_v12 = vld [vmem:[%s14977_s7 + $0x610] ss:$48 sps:$4 sm:$0xff]  }
 0x843   : > { %6427 = vmatprep.subr.bf16.mxu1 %v11441_v18  ;;  %v11511_v18 = vld [vmem:[%s14977_s7 + $0x310] ss:$48 sps:$4 sm:$0xff]  }
 0x845   : > { %6358 = vmatpush2.bf16.msra.mxu0 %v11436_v34  ;;  %v11516_v34 = vld [vmem:[%s14977_s7 + $0x2bc] ss:$48 sps:$4 sm:$0xff]  }
 0x846   : > { %6428 = vmatpush1.bf16.msra.mxu1 %v11439_v36  ;;  %6359 = vmatprep.subr.bf16.mxu0 %v11444_v37  ;;  %v11519_v36 = vld [vmem:[%s14977_s7 + $0x8bc] ss:$48 sps:$4 sm:$0xff]   ;;  %v11514_v37 = vld [vmem:[%s14977_s7 + $0x2b8] ss:$48 sps:$4 sm:$0xff]  }
 0x847   : > { %6429 = vmatprep.subr.bf16.mxu1 %v11447_v40  ;;  %v11517_v40 = vld [vmem:[%s14977_s7 + $0x8b8] ss:$48 sps:$4 sm:$0xff]  }
 0x849   : > { %6360 = vmatpush2.bf16.msra.mxu0 %v11442_v7  ;;  %v11522_v7 = vld [vmem:[%s14977_s7 + $0x25c] ss:$48 sps:$4 sm:$0xff]  }
 0x84a   : > { %6430 = vmatpush1.bf16.msra.mxu1 %v11445_v41  ;;  %6361 = vmatprep.subr.bf16.mxu0 %v11450_v46  ;;  %v11525_v41 = vld [vmem:[%s14977_s7 + $0x85c] ss:$48 sps:$4 sm:$0xff]   ;;  %v11520_v46 = vld [vmem:[%s14977_s7 + $0x258] ss:$48 sps:$4 sm:$0xff]  }
 0x84b   : > { %6431 = vmatprep.subr.bf16.mxu1 %v11453_v43  ;;  %v11523_v43 = vld [vmem:[%s14977_s7 + $0x858] ss:$48 sps:$4 sm:$0xff]  }
 0x84d   : > { %6362 = vmatpush2.bf16.msra.mxu0 %v11448_v48  ;;  %v11528_v48 = vld [vmem:[%s14977_s7 + $0x1fc] ss:$48 sps:$4 sm:$0xff]  }
 0x84e   : > { %6432 = vmatpush1.bf16.msra.mxu1 %v11451_v49  ;;  %6363 = vmatprep.subr.bf16.mxu0 %v11456_v54  ;;  %v11531_v49 = vld [vmem:[%s14977_s7 + $0x7fc] ss:$48 sps:$4 sm:$0xff]   ;;  %v11526_v54 = vld [vmem:[%s14977_s7 + $0x1f8] ss:$48 sps:$4 sm:$0xff]  }
 0x84f   : > { %6433 = vmatprep.subr.bf16.mxu1 %v11459_v45  ;;  %v11529_v45 = vld [vmem:[%s14977_s7 + $0x7f8] ss:$48 sps:$4 sm:$0xff]  }
 0x851   : > { %6364 = vmatpush2.bf16.msra.mxu0 %v11454_v51  ;;  %v11534_v51 = vld [vmem:[%s14977_s7 + $0x19c] ss:$48 sps:$4 sm:$0xff]  }
 0x852   : > { %6434 = vmatpush1.bf16.msra.mxu1 %v11457_v57  ;;  %6365 = vmatprep.subr.bf16.mxu0 %v11462_v62  ;;  %v11537_v57 = vld [vmem:[%s14977_s7 + $0x79c] ss:$48 sps:$4 sm:$0xff]   ;;  %v11532_v62 = vld [vmem:[%s14977_s7 + $0x198] ss:$48 sps:$4 sm:$0xff]  }
 0x853   : > { %6435 = vmatprep.subr.bf16.mxu1 %v11465_v61  ;;  %v11535_v61 = vld [vmem:[%s14977_s7 + $0x798] ss:$48 sps:$4 sm:$0xff]  }
 0x855   : > { %6366 = vmatpush2.bf16.msra.mxu0 %v11460_v50  ;;  %v11540_v50 = vld [vmem:[%s14977_s7 + $0x13c] ss:$48 sps:$4 sm:$0xff]  }
 0x856   : > { %6436 = vmatpush1.bf16.msra.mxu1 %v11463_v58  ;;  %6464 = vmatprep.subr.bf16.mxu0 %v11468_v60  ;;  %v11543_v58 = vld [vmem:[%s14977_s7 + $0x73c] ss:$48 sps:$4 sm:$0xff]   ;;  %v11538_v60 = vld [vmem:[%s14977_s7 + $0x138] ss:$48 sps:$4 sm:$0xff]  }
 0x857   : > { %6437 = vmatprep.subr.bf16.mxu1 %v11471_v30  ;;  %v11541_v30 = vld [vmem:[%s14977_s7 + $0x738] ss:$48 sps:$4 sm:$0xff]  }
 0x858   : > { %6368 = vmatmul.mubr.bf16.vlgmr.msra.gmra.mxu0 %v14046_v42 }
 0x859   : > { %6465 = vmatpush1.bf16.msra.mxu0 %v11466_v21  ;;  %6496 = vmatprep.mubr.bf16.mxu0 %v12261_v24  ;;  %v11546_v21 = vld [vmem:[%s14977_s7 + $0xdc] ss:$48 sps:$4 sm:$0xff]  }
 0x85a   : > { %6438 = vmatpush2.bf16.msra.mxu1 %v11469_v29  ;;  %6466 = vmatprep.subr.bf16.mxu0 %v11474_v31  ;;  %v11549_v29 = vld [vmem:[%s14977_s7 + $0x6dc] ss:$48 sps:$4 sm:$0xff]   ;;  %v11544_v31 = vld [vmem:[%s14977_s7 + $0xd8] ss:$48 sps:$4 sm:$0xff]  }
 0x85b   : > { %6439 = vmatprep.subr.bf16.mxu1 %v11477_v6  ;;  %v11547_v6 = vld [vmem:[%s14977_s7 + $0x6d8] ss:$48 sps:$4 sm:$0xff]  }
 0x85d   : > { %6467 = vmatpush1.bf16.msra.mxu0 %v11472_v59  ;;  %v11552_v59 = vld [vmem:[%s14977_s7 + $0x7c] ss:$48 sps:$4 sm:$0xff]  }
 0x85e   : > { %6440 = vmatpush2.bf16.msra.mxu1 %v11475_v3  ;;  %6468 = vmatprep.subr.bf16.mxu0 %v11480_v5  ;;  %v11555_v3 = vld [vmem:[%s14977_s7 + $0x67c] ss:$48 sps:$4 sm:$0xff]   ;;  %v11550_v5 = vld [vmem:[%s14977_s7 + $0x78] ss:$48 sps:$4 sm:$0xff]  }
 0x85f   : > { %6441 = vmatprep.subr.bf16.mxu1 %v11483_v11  ;;  %v11553_v11 = vld [vmem:[%s14977_s7 + $0x678] ss:$48 sps:$4 sm:$0xff]  }
 0x861   : > { %6469 = vmatpush1.bf16.msra.mxu0 %v11478_v0  ;;  %v11558_v0 = vld [vmem:[%s14977_s7 + $0x1c] ss:$48 sps:$4 sm:$0xff]  }
 0x862   : > { %6442 = vmatpush2.bf16.msra.mxu1 %v11481_v1  ;;  %6470 = vmatprep.subr.bf16.mxu0 %v11486_v16  ;;  %v11561_v1 = vld [vmem:[%s14977_s7 + $0x61c] ss:$48 sps:$4 sm:$0xff]   ;;  %v11556_v16 = vld [vmem:[%s14977_s7 + $0x18] ss:$48 sps:$4 sm:$0xff]  }
 0x863   : > { %6443 = vmatprep.subr.bf16.mxu1 %v11489_v35  ;;  %v11559_v35 = vld [vmem:[%s14977_s7 + $0x618] ss:$48 sps:$4 sm:$0xff]  }
 0x865   : > { %6471 = vmatpush1.bf16.msra.mxu0 %v11484_v20  ;;  %v11564_v20 = vld [vmem:[%s14977_s7 + $0x5bc] ss:$48 sps:$4 sm:$0xff]  }
 0x866   : > { %6444 = vmatpush2.bf16.msra.mxu1 %v11487_v23  ;;  %6472 = vmatprep.subr.bf16.mxu0 %v11492_v15  ;;  %v11567_v23 = vld [vmem:[%s14977_s7 + $0x2c4] ss:$48 sps:$4 sm:$0xff]   ;;  %v11562_v15 = vld [vmem:[%s14977_s7 + $0x5b8] ss:$48 sps:$4 sm:$0xff]  }
 0x867   : > { %6445 = vmatprep.subr.bf16.mxu1 %v11495_v25  ;;  %v11565_v25 = vld [vmem:[%s14977_s7 + $0x2c0] ss:$48 sps:$4 sm:$0xff]  }
 0x869   : > { %6473 = vmatpush1.bf16.msra.mxu0 %v11490_v55  ;;  %v11570_v55 = vld [vmem:[%s14977_s7 + $0x55c] ss:$48 sps:$4 sm:$0xff]  }
 0x86a   : > { %6446 = vmatpush2.bf16.msra.mxu1 %v11493_v27  ;;  %6474 = vmatprep.subr.bf16.mxu0 %v11498_v9  ;;  %v11573_v27 = vld [vmem:[%s14977_s7 + $0x264] ss:$48 sps:$4 sm:$0xff]   ;;  %v11568_v9 = vld [vmem:[%s14977_s7 + $0x558] ss:$48 sps:$4 sm:$0xff]  }
 0x86b   : > { %6447 = vmatprep.subr.bf16.mxu1 %v11501_v28  ;;  %v11571_v28 = vld [vmem:[%s14977_s7 + $0x260] ss:$48 sps:$4 sm:$0xff]  }
 0x86d   : > { %6475 = vmatpush1.bf16.msra.mxu0 %v11496_v8  ;;  %v11576_v8 = vld [vmem:[%s14977_s7 + $0x4fc] ss:$48 sps:$4 sm:$0xff]  }
 0x86e   : > { %6448 = vmatpush2.bf16.msra.mxu1 %v11499_v2  ;;  %6476 = vmatprep.subr.bf16.mxu0 %v11504_v13  ;;  %v11579_v2 = vld [vmem:[%s14977_s7 + $0x204] ss:$48 sps:$4 sm:$0xff]   ;;  %v11574_v13 = vld [vmem:[%s14977_s7 + $0x4f8] ss:$48 sps:$4 sm:$0xff]  }
 0x86f   : > { %6449 = vmatprep.subr.bf16.mxu1 %v11507_v14  ;;  %v11577_v14 = vld [vmem:[%s14977_s7 + $0x200] ss:$48 sps:$4 sm:$0xff]  }
 0x871   : > { %6477 = vmatpush1.bf16.msra.mxu0 %v11502_v52  ;;  %v11582_v52 = vld [vmem:[%s14977_s7 + $0x49c] ss:$48 sps:$4 sm:$0xff]  }
 0x872   : > { %6450 = vmatpush2.bf16.msra.mxu1 %v11505_v10  ;;  %6478 = vmatprep.subr.bf16.mxu0 %v11510_v26  ;;  %v11585_v10 = vld [vmem:[%s14977_s7 + $0x1a4] ss:$48 sps:$4 sm:$0xff]   ;;  %v11580_v26 = vld [vmem:[%s14977_s7 + $0x498] ss:$48 sps:$4 sm:$0xff]  }
 0x873   : > { %6451 = vmatprep.subr.bf16.mxu1 %v11513_v44  ;;  %v11583_v44 = vld [vmem:[%s14977_s7 + $0x1a0] ss:$48 sps:$4 sm:$0xff]  }
 0x875   : > { %6479 = vmatpush1.bf16.msra.mxu0 %v11508_v12  ;;  %v11588_v12 = vld [vmem:[%s14977_s7 + $0x43c] ss:$48 sps:$4 sm:$0xff]  }
 0x876   : > { %6452 = vmatpush2.bf16.msra.mxu1 %v11511_v18  ;;  %6507 = vmatprep.subr.bf16.mxu0 %v11516_v34  ;;  %v11591_v18 = vld [vmem:[%s14977_s7 + $0x144] ss:$48 sps:$4 sm:$0xff]   ;;  %v11586_v34 = vld [vmem:[%s14977_s7 + $0x438] ss:$48 sps:$4 sm:$0xff]  }
 0x877   : > { %6550 = vmatprep.subr.bf16.mxu1 %v11519_v36  ;;  %v11589_v36 = vld [vmem:[%s14977_s7 + $0x140] ss:$48 sps:$4 sm:$0xff]  }
 0x878   : > { %6497 = vmatmul.mubr.bf16.vlgmr.msra.gmra.mxu0 %v14041_v47 }
 0x879   : > { %6454 = vmatmul.mubr.bf16.vlgmr.msra.gmra.mxu1 %v14046_v42  ;;  %6508 = vmatpush1.bf16.msra.mxu0 %v11514_v37  ;;  %v11594_v37 = vld [vmem:[%s14977_s7 + $0x3dc] ss:$48 sps:$4 sm:$0xff]  }
 0x87a   : > { %6539 = vmatprep.mubr.bf16.mxu0 %v14039_v19  ;;  %6551 = vmatpush1.bf16.msra.mxu1 %v11517_v40  ;;  %v11597_v40 = vld [vmem:[%s14977_s7 + $0xe4] ss:$48 sps:$4 sm:$0xff]  }
 0x87b   : > { %6509 = vmatprep.subr.bf16.mxu0 %v11522_v7  ;;  %6552 = vmatprep.subr.bf16.mxu1 %v11525_v41  ;;  %v11592_v7 = vld [vmem:[%s14977_s7 + $0x3d8] ss:$48 sps:$4 sm:$0xff]   ;;  %v11595_v41 = vld [vmem:[%s14977_s7 + $0xe0] ss:$48 sps:$4 sm:$0xff]  }
 0x87c   : > { %6582 = vmatprep.mubr.bf16.mxu1 %v12261_v24 }
 0x87d   : > { %6510 = vmatpush1.bf16.msra.mxu0 %v11520_v46  ;;  %v11600_v46 = vld [vmem:[%s14977_s7 + $0x37c] ss:$48 sps:$4 sm:$0xff]  }
 0x87e   : > { %6553 = vmatpush1.bf16.msra.mxu1 %v11523_v43  ;;  %6511 = vmatprep.subr.bf16.mxu0 %v11528_v48  ;;  %v11603_v43 = vld [vmem:[%s14977_s7 + $0x84] ss:$48 sps:$4 sm:$0xff]   ;;  %v11598_v48 = vld [vmem:[%s14977_s7 + $0x378] ss:$48 sps:$4 sm:$0xff]  }
 0x87f   : > { %6554 = vmatprep.subr.bf16.mxu1 %v11531_v49  ;;  %v11601_v49 = vld [vmem:[%s14977_s7 + $0x80] ss:$48 sps:$4 sm:$0xff]  }
 0x881   : > { %6512 = vmatpush1.bf16.msra.mxu0 %v11526_v54  ;;  %v11606_v54 = vld [vmem:[%s14977_s7 + $0x31c] ss:$48 sps:$4 sm:$0xff]  }
 0x882   : > { %6555 = vmatpush1.bf16.msra.mxu1 %v11529_v45  ;;  %6513 = vmatprep.subr.bf16.mxu0 %v11534_v51  ;;  %v11609_v45 = vld [vmem:[%s14977_s7 + $0x24] ss:$48 sps:$4 sm:$0xff]   ;;  %v11604_v51 = vld [vmem:[%s14977_s7 + $0x318] ss:$48 sps:$4 sm:$0xff]  }
 0x883   : > { %6556 = vmatprep.subr.bf16.mxu1 %v11537_v57  ;;  %v11607_v57 = vld [vmem:[%s14977_s7 + $0x20] ss:$48 sps:$4 sm:$0xff]  }
 0x885   : > { %6514 = vmatpush1.bf16.msra.mxu0 %v11532_v62  ;;  %v11612_v62 = vld [vmem:[%s14977_s7 + $0x8c4] ss:$48 sps:$4 sm:$0xff]  }
 0x886   : > { %6557 = vmatpush1.bf16.msra.mxu1 %v11535_v61  ;;  %6515 = vmatprep.subr.bf16.mxu0 %v11540_v50  ;;  %v11615_v61 = vld [vmem:[%s14977_s7 + $0x5c4] ss:$48 sps:$4 sm:$0xff]   ;;  %v11610_v50 = vld [vmem:[%s14977_s7 + $0x8c0] ss:$48 sps:$4 sm:$0xff]  }
 0x887   : > { %6558 = vmatprep.subr.bf16.mxu1 %v11543_v58  ;;  %v11613_v58 = vld [vmem:[%s14977_s7 + $0x5c0] ss:$48 sps:$4 sm:$0xff]  }
 0x889   : > { %6516 = vmatpush1.bf16.msra.mxu0 %v11538_v60  ;;  %v11618_v60 = vld [vmem:[%s14977_s7 + $0x864] ss:$48 sps:$4 sm:$0xff]  }
 0x88a   : > { %6559 = vmatpush1.bf16.msra.mxu1 %v11541_v30  ;;  %6517 = vmatprep.subr.bf16.mxu0 %v11546_v21  ;;  %v11621_v30 = vld [vmem:[%s14977_s7 + $0x564] ss:$48 sps:$4 sm:$0xff]   ;;  %v11616_v21 = vld [vmem:[%s14977_s7 + $0x860] ss:$48 sps:$4 sm:$0xff]  }
 0x88b   : > { %6560 = vmatprep.subr.bf16.mxu1 %v11549_v29  ;;  %v11619_v29 = vld [vmem:[%s14977_s7 + $0x560] ss:$48 sps:$4 sm:$0xff]  }
 0x88d   : > { %6518 = vmatpush1.bf16.msra.mxu0 %v11544_v31  ;;  %v11624_v31 = vld [vmem:[%s14977_s7 + $0x804] ss:$48 sps:$4 sm:$0xff]  }
 0x88e   : > { %6561 = vmatpush1.bf16.msra.mxu1 %v11547_v6  ;;  %6519 = vmatprep.subr.bf16.mxu0 %v11552_v59  ;;  %v11627_v6 = vld [vmem:[%s14977_s7 + $0x504] ss:$48 sps:$4 sm:$0xff]   ;;  %v11622_v59 = vld [vmem:[%s14977_s7 + $0x800] ss:$48 sps:$4 sm:$0xff]  }
 0x88f   : > { %6562 = vmatprep.subr.bf16.mxu1 %v11555_v3  ;;  %v11625_v3 = vld [vmem:[%s14977_s7 + $0x500] ss:$48 sps:$4 sm:$0xff]  }
 0x891   : > { %6520 = vmatpush1.bf16.msra.mxu0 %v11550_v5  ;;  %v11630_v5 = vld [vmem:[%s14977_s7 + $0x7a4] ss:$48 sps:$4 sm:$0xff]  }
 0x892   : > { %6563 = vmatpush1.bf16.msra.mxu1 %v11553_v11  ;;  %6521 = vmatprep.subr.bf16.mxu0 %v11558_v0  ;;  %v11633_v11 = vld [vmem:[%s14977_s7 + $0x4a4] ss:$48 sps:$4 sm:$0xff]   ;;  %v11628_v0 = vld [vmem:[%s14977_s7 + $0x7a0] ss:$48 sps:$4 sm:$0xff]  }
 0x893   : > { %6564 = vmatprep.subr.bf16.mxu1 %v11561_v1  ;;  %v11631_v1 = vld [vmem:[%s14977_s7 + $0x4a0] ss:$48 sps:$4 sm:$0xff]  }
 0x895   : > { %6522 = vmatpush1.bf16.msra.mxu0 %v11556_v16  ;;  %v11636_v16 = vld [vmem:[%s14977_s7 + $0x744] ss:$48 sps:$4 sm:$0xff]  }
 0x896   : > { %6565 = vmatpush1.bf16.msra.mxu1 %v11559_v35  ;;  %6523 = vmatprep.subr.bf16.mxu0 %v11564_v20  ;;  %v11639_v35 = vld [vmem:[%s14977_s7 + $0x444] ss:$48 sps:$4 sm:$0xff]   ;;  %v11634_v20 = vld [vmem:[%s14977_s7 + $0x740] ss:$48 sps:$4 sm:$0xff]  }
 0x897   : > { %6593 = vmatprep.subr.bf16.mxu1 %v11567_v23  ;;  %v11637_v23 = vld [vmem:[%s14977_s7 + $0x440] ss:$48 sps:$4 sm:$0xff]  }
 0x899   : > { %6524 = vmatpush2.bf16.msra.mxu0 %v11562_v15  ;;  %6583 = vmatmul.mubr.bf16.vlgmr.msra.gmra.mxu1 %v14041_v47  ;;  %v11642_v15 = vld [vmem:[%s14977_s7 + $0x6e4] ss:$48 sps:$4 sm:$0xff]  }
 0x89a   : > { %6594 = vmatpush1.bf16.msra.mxu1 %v11565_v25  ;;  %6625 = vmatprep.mubr.bf16.mxu1 %v14039_v19  ;;  %v11645_v25 = vld [vmem:[%s14977_s7 + $0x3e4] ss:$48 sps:$4 sm:$0xff]  }
 0x89b   : > { %6525 = vmatprep.subr.bf16.mxu0 %v11570_v55  ;;  %6595 = vmatprep.subr.bf16.mxu1 %v11573_v27  ;;  %v11640_v55 = vld [vmem:[%s14977_s7 + $0x6e0] ss:$48 sps:$4 sm:$0xff]  }
 0x89c   : > { %v11643_v27 = vld [vmem:[%s14977_s7 + $0x3e0] ss:$48 sps:$4 sm:$0xff]  }
 0x89d   : > { %6526 = vmatpush2.bf16.msra.mxu0 %v11568_v9  ;;  %v11648_v9 = vld [vmem:[%s14977_s7 + $0x684] ss:$48 sps:$4 sm:$0xff]  }
 0x89e   : > { %6596 = vmatpush1.bf16.msra.mxu1 %v11571_v28  ;;  %6527 = vmatprep.subr.bf16.mxu0 %v11576_v8  ;;  %v11651_v28 = vld [vmem:[%s14977_s7 + $0x384] ss:$48 sps:$4 sm:$0xff]   ;;  %v11646_v8 = vld [vmem:[%s14977_s7 + $0x680] ss:$48 sps:$4 sm:$0xff]  }
 0x89f   : > { %6597 = vmatprep.subr.bf16.mxu1 %v11579_v2  ;;  %v11649_v2 = vld [vmem:[%s14977_s7 + $0x380] ss:$48 sps:$4 sm:$0xff]  }
 0x8a1   : > { %6528 = vmatpush2.bf16.msra.mxu0 %v11574_v13  ;;  %v11654_v13 = vld [vmem:[%s14977_s7 + $0x624] ss:$48 sps:$4 sm:$0xff]  }
 0x8a2   : > { %6598 = vmatpush1.bf16.msra.mxu1 %v11577_v14  ;;  %6529 = vmatprep.subr.bf16.mxu0 %v11582_v52  ;;  %v11657_v14 = vld [vmem:[%s14977_s7 + $0x324] ss:$48 sps:$4 sm:$0xff]   ;;  %v11652_v52 = vld [vmem:[%s14977_s7 + $0x620] ss:$48 sps:$4 sm:$0xff]  }
 0x8a3   : > { %6599 = vmatprep.subr.bf16.mxu1 %v11585_v10  ;;  %v11655_v10 = vld [vmem:[%s14977_s7 + $0x320] ss:$48 sps:$4 sm:$0xff]  }
 0x8a5   : > { %6530 = vmatpush2.bf16.msra.mxu0 %v11580_v26  ;;  %v11660_v26 = vld [vmem:[%s14977_s7 + $0x2cc] ss:$48 sps:$4 sm:$0xff]  }
 0x8a6   : > { %6600 = vmatpush1.bf16.msra.mxu1 %v11583_v44  ;;  %6531 = vmatprep.subr.bf16.mxu0 %v11588_v12  ;;  %v11663_v44 = vld [vmem:[%s14977_s7 + $0x8cc] ss:$48 sps:$4 sm:$0xff]   ;;  %v14638_v12 = vld [vmem:[%s14978_s8] sm:$0xff] }
 0x8a7   : > { %6601 = vmatprep.subr.bf16.mxu1 %v11591_v18  ;;  %v11658_v18 = vld [vmem:[%s14977_s7 + $0x2c8] ss:$48 sps:$4 sm:$0xff]  }
 0x8a9   : > { %6532 = vmatpush2.bf16.msra.mxu0 %v11586_v34  ;;  %v11661_v34 = vld [vmem:[%s14977_s7 + $0x8c8] ss:$48 sps:$4 sm:$0xff]  }
 0x8aa   : > { %6602 = vmatpush1.bf16.msra.mxu1 %v11589_v36  ;;  %6533 = vmatprep.subr.bf16.mxu0 %v11594_v37  ;;  %v4752_v36 = vrot.slane %v14638_v12, %v13806_v53  ;;  %v11666_v37 = vld [vmem:[%s14977_s7 + $0x26c] ss:$48 sps:$4 sm:$0xff]  }
 0x8ab   : > { %6603 = vmatprep.subr.bf16.mxu1 %v11597_v40  ;;  %v11669_v40 = vld [vmem:[%s14977_s7 + $0x86c] ss:$48 sps:$4 sm:$0xff]  }
 0x8ad   : > { %6534 = vmatpush2.bf16.msra.mxu0 %v11592_v7 }
 0x8ae   : > { %6604 = vmatpush1.bf16.msra.mxu1 %v11595_v41  ;;  %6535 = vmatprep.subr.bf16.mxu0 %v11600_v46  ;;  %v11664_v46 = vld [vmem:[%s14977_s7 + $0x268] ss:$48 sps:$4 sm:$0xff]  }
 0x8af   : > { %6605 = vmatprep.subr.bf16.mxu1 %v11603_v43 }
 0x8b1   : > { %6536 = vmatpush2.bf16.msra.mxu0 %v11598_v48  ;;  %v11667_v48 = vld [vmem:[%s14977_s7 + $0x868] ss:$48 sps:$4 sm:$0xff]  }
 0x8b2   : > { %6606 = vmatpush1.bf16.msra.mxu1 %v11601_v49  ;;  %6537 = vmatprep.subr.bf16.mxu0 %v11606_v54  ;;  %v11672_v49 = vld [vmem:[%s14977_s7 + $0x20c] ss:$48 sps:$4 sm:$0xff]  }
 0x8b3   : > { %6607 = vmatprep.subr.bf16.mxu1 %v11609_v45 }
 0x8b5   : > { %6538 = vmatpush2.bf16.msra.mxu0 %v11604_v51  ;;  %v11675_v51 = vld [vmem:[%s14977_s7 + $0x80c] ss:$48 sps:$4 sm:$0xff]  }
 0x8b6   : > { %6608 = vmatpush1.bf16.msra.mxu1 %v11607_v57  ;;  %6636 = vmatprep.subr.bf16.mxu0 %v11612_v62  ;;  %v11670_v62 = vld [vmem:[%s14977_s7 + $0x208] ss:$48 sps:$4 sm:$0xff]  }
 0x8b7   : > { %6609 = vmatprep.subr.bf16.mxu1 %v11615_v61 }
 0x8b8   : > { %6540 = vmatmul.mubr.bf16.vlgmr.msra.gmra.mxu0 %v14046_v42 }
 0x8b9   : > { %6637 = vmatpush1.bf16.msra.mxu0 %v11610_v50  ;;  %6668 = vmatprep.mubr.bf16.mxu0 %v12261_v24  ;;  %v11673_v50 = vld [vmem:[%s14977_s7 + $0x808] ss:$48 sps:$4 sm:$0xff]  }
 0x8ba   : > { %6610 = vmatpush2.bf16.msra.mxu1 %v11613_v58  ;;  %6638 = vmatprep.subr.bf16.mxu0 %v11618_v60  ;;  %v11678_v58 = vld [vmem:[%s14977_s7 + $0x1ac] ss:$48 sps:$4 sm:$0xff]  }
 0x8bb   : > { %6611 = vmatprep.subr.bf16.mxu1 %v11621_v30 }
 0x8bd   : > { %6639 = vmatpush1.bf16.msra.mxu0 %v11616_v21  ;;  %v11676_v21 = vld [vmem:[%s14977_s7 + $0x1a8] ss:$48 sps:$4 sm:$0xff]  }
 0x8be   : > { %6612 = vmatpush2.bf16.msra.mxu1 %v11619_v29  ;;  %6640 = vmatprep.subr.bf16.mxu0 %v11624_v31 }
 0x8bf   : > { %6613 = vmatprep.subr.bf16.mxu1 %v11627_v6  ;;  %v11679_v6 = vld [vmem:[%s14977_s7 + $0x7a8] ss:$48 sps:$4 sm:$0xff]  }
 0x8c1   : > { %6641 = vmatpush1.bf16.msra.mxu0 %v11622_v59  ;;  %v11684_v59 = vld [vmem:[%s14977_s7 + $0x14c] ss:$48 sps:$4 sm:$0xff]  }
 0x8c2   : > { %6614 = vmatpush2.bf16.msra.mxu1 %v11625_v3  ;;  %6642 = vmatprep.subr.bf16.mxu0 %v11630_v5  ;;  %v11687_v3 = vld [vmem:[%s14977_s7 + $0x74c] ss:$48 sps:$4 sm:$0xff]  }
 0x8c3   : > { %6615 = vmatprep.subr.bf16.mxu1 %v11633_v11  ;;  %v11682_v11 = vld [vmem:[%s14977_s7 + $0x148] ss:$48 sps:$4 sm:$0xff]  }
 0x8c5   : > { %6643 = vmatpush1.bf16.msra.mxu0 %v11628_v0  ;;  %v11685_v0 = vld [vmem:[%s14977_s7 + $0x748] ss:$48 sps:$4 sm:$0xff]  }
 0x8c6   : > { %6616 = vmatpush2.bf16.msra.mxu1 %v11631_v1  ;;  %6644 = vmatprep.subr.bf16.mxu0 %v11636_v16  ;;  %v11690_v1 = vld [vmem:[%s14977_s7 + $0xec] ss:$48 sps:$4 sm:$0xff]  }
 0x8c7   : > { %6617 = vmatprep.subr.bf16.mxu1 %v11639_v35  ;;  %v11693_v16 = vld [vmem:[%s14977_s7 + $0x6ec] ss:$48 sps:$4 sm:$0xff]  }
 0x8c9   : > { %6645 = vmatpush1.bf16.msra.mxu0 %v11634_v20  ;;  %v11688_v20 = vld [vmem:[%s14977_s7 + $0xe8] ss:$48 sps:$4 sm:$0xff]  }
 0x8ca   : > { %6618 = vmatpush2.bf16.msra.mxu1 %v11637_v23  ;;  %6646 = vmatprep.subr.bf16.mxu0 %v11642_v15  ;;  %v4756_v23 = vrot.slane %v14638_v12, %v13803_v56  ;;  %v11691_v15 = vld [vmem:[%s14977_s7 + $0x6e8] ss:$48 sps:$4 sm:$0xff]  }
 0x8cb   : > { %6619 = vmatprep.subr.bf16.mxu1 %v11645_v25  ;;  %v11696_v25 = vld [vmem:[%s14977_s7 + $0x8c] ss:$48 sps:$4 sm:$0xff]  }
 0x8cd   : > { %6647 = vmatpush1.bf16.msra.mxu0 %v11640_v55  ;;  %v11699_v55 = vld [vmem:[%s14977_s7 + $0x68c] ss:$48 sps:$4 sm:$0xff]  }
 0x8ce   : > { %6620 = vmatpush2.bf16.msra.mxu1 %v11643_v27  ;;  %6648 = vmatprep.subr.bf16.mxu0 %v11648_v9  ;;  %v11694_v9 = vld [vmem:[%s14977_s7 + $0x88] ss:$48 sps:$4 sm:$0xff]  }
 0x8cf   : > { %6621 = vmatprep.subr.bf16.mxu1 %v11651_v28 }
 0x8d1   : > { %6649 = vmatpush1.bf16.msra.mxu0 %v11646_v8  ;;  %v11697_v8 = vld [vmem:[%s14977_s7 + $0x688] ss:$48 sps:$4 sm:$0xff]  }
 0x8d2   : > { %6622 = vmatpush2.bf16.msra.mxu1 %v11649_v2  ;;  %6650 = vmatprep.subr.bf16.mxu0 %v11654_v13  ;;  %v11702_v2 = vld [vmem:[%s14977_s7 + $0x2c] ss:$48 sps:$4 sm:$0xff]  }
 0x8d3   : > { %6623 = vmatprep.subr.bf16.mxu1 %v11657_v14  ;;  %v11705_v14 = vld [vmem:[%s14977_s7 + $0x62c] ss:$48 sps:$4 sm:$0xff]  }
 0x8d5   : > { %6651 = vmatpush1.bf16.msra.mxu0 %v11652_v52 }
 0x8d6   : > { %6624 = vmatpush2.bf16.msra.mxu1 %v11655_v10  ;;  %6679 = vmatprep.subr.bf16.mxu0 %v11660_v26  ;;  %v11700_v10 = vld [vmem:[%s14977_s7 + $0x28] ss:$48 sps:$4 sm:$0xff]  }
 0x8d7   : > { %6722 = vmatprep.subr.bf16.mxu1 %v11663_v44  ;;  %v11703_v44 = vld [vmem:[%s14977_s7 + $0x628] ss:$48 sps:$4 sm:$0xff]  }
 0x8d8   : > { %6669 = vmatmul.mubr.bf16.vlgmr.msra.gmra.mxu0 %v14041_v47  ;;  %v6326_v7 = vpop.f32.mrf.mxu0 }
 0x8d9   : > { %6626 = vmatmul.mubr.bf16.vlgmr.msra.gmra.mxu1 %v14046_v42  ;;  %6680 = vmatpush1.bf16.msra.mxu0 %v11658_v18  ;;  %v6283_v41 = vpop.f32.mrf.mxu1  ;;  %v11708_v18 = vld [vmem:[%s14977_s7 + $0x5cc] ss:$48 sps:$4 sm:$0xff]  }
 0x8da   : > { %6711 = vmatprep.mubr.bf16.mxu0 %v14039_v19  ;;  %v6284_v43 = vadd.f32 %v6283_v41, %v4752_v36  ;;  %6723 = vmatpush1.bf16.msra.mxu1 %v11661_v34  ;;  %v6328_v54 = vpop.f32.mrf.mxu0  ;;  %v11711_v34 = vld [vmem:[#allocation4 + $0xac] ss:$12 sps:$4 sm:$0xff]   ;;  %v11714_v41 = vld [vmem:[%s14977_s7 + $0x56c] ss:$48 sps:$4 sm:$0xff]  }
 0x8db   : > { %v6285_v45 = vpop.f32.mrf.mxu1  ;;  %6681 = vmatprep.subr.bf16.mxu0 %v11666_v37  ;;  %6724 = vmatprep.subr.bf16.mxu1 %v11669_v40  ;;  %v11706_v37 = vld [vmem:[%s14977_s7 + $0x5c8] ss:$48 sps:$4 sm:$0xff]  }
 0x8dc   : > { %v6327_v57 = vadd.f32 %v6326_v7, %v6284_v43  ;;  %6754 = vmatprep.mubr.bf16.mxu1 %v12261_v24  ;;  %v6330_v60 = vpop.f32.mrf.mxu0  ;;  %v11681_v24 = vld [vmem:[%s14977_s7 + $0x7ac] ss:$48 sps:$4 sm:$0xff]   ;;  %v6286_v28 = vadd.f32 %v6285_v45, %v4756_v23  ;;  %v11723_v45 = vld [vmem:[#allocation4 + $0x7c] ss:$12 sps:$4 sm:$0xff]  }
 0x8dd   : > { %6682 = vmatpush1.bf16.msra.mxu0 %v11664_v46  ;;  %v6287_v19 = vpop.f32.mrf.mxu1  ;;  %v11709_v7 = vld [vmem:[#allocation4 + $0xa8] ss:$12 sps:$4 sm:$0xff]  }
 0x8de   : > { %v6288_v61 = vadd.f32 %v6287_v19, %v4752_v36  ;;  %6725 = vmatpush1.bf16.msra.mxu1 %v11667_v48  ;;  %6683 = vmatprep.subr.bf16.mxu0 %v11672_v49  ;;  %v6765_v29 = vmax.f32 %v6327_v57, 0.0  ;;  %v6332_v13 = vpop.f32.mrf.mxu0  ;;  %v6329_v26 = vadd.f32 %v6328_v54, %v6286_v28  ;;  %v11717_v46 = vld [vmem:[#allocation4 + $0x94] ss:$12 sps:$4 sm:$0xff]   ;;  %v11715_v49 = vld [vmem:[#allocation4 + $0x90] ss:$12 sps:$4 sm:$0xff]  }
 0x8df   : > { %6726 = vmatprep.subr.bf16.mxu1 %v11675_v51  ;;  %v6289_v35 = vpop.f32.mrf.mxu1  ;;  %v11712_v48 = vld [vmem:[%s14977_s7 + $0x568] ss:$48 sps:$4 sm:$0xff]   ;;  %v11720_v54 = vld [vmem:[%s14977_s7 + $0x50c] ss:$48 sps:$4 sm:$0xff]  }
 0x8e0   : > { %v6331_v30 = vadd.f32 %v6330_v60, %v6288_v61  ;;  %v6290_v27 = vadd.f32 %v6289_v35, %v4756_v23  ;;  %v6766_v40 = vmax.f32 %v6329_v26, 0.0  ;;  %v11721_v51 = vld [vmem:[#allocation4 + $0x78] ss:$12 sps:$4 sm:$0xff]   ;;  %v11727_v61 = vld [vmem:[#allocation4 + $0x60] ss:$12 sps:$4 sm:$0xff]  }
 0x8e1   : > { %6684 = vmatpush1.bf16.msra.mxu0 %v11670_v62  ;;  %v11726_v57 = vld [vmem:[%s14977_s7 + $0x4ac] ss:$48 sps:$4 sm:$0xff]   ;;  %v11724_v62 = vld [vmem:[%s14977_s7 + $0x4a8] ss:$48 sps:$4 sm:$0xff]   ;;  %v11759_v23 = vld [vmem:[#allocation4 + $0x16c] ss:$12 sps:$4 sm:$0xff]  }
 0x8e2   : > { %v6777_v31 = vmax.f32 %v6331_v30, 0.0  ;;  %6727 = vmatpush1.bf16.msra.mxu1 %v11673_v50  ;;  %6685 = vmatprep.subr.bf16.mxu0 %v11678_v58  ;;  %v6333_v52 = vadd.f32 %v6332_v13, %v6290_v27  ;;  %v11729_v19 = vld [vmem:[#allocation4 + $0x64] ss:$12 sps:$4 sm:$0xff]   ;;  %v11735_v58 = vld [vmem:[#allocation4 + $0x4c] ss:$12 sps:$4 sm:$0xff]  }
 0x8e3   : > { %6728 = vmatprep.subr.bf16.mxu1 %v11681_v24  ;;  %v11732_v50 = vld [vmem:[%s14977_s7 + $0x44c] ss:$48 sps:$4 sm:$0xff]   ;;  %v11730_v60 = vld [vmem:[%s14977_s7 + $0x448] ss:$48 sps:$4 sm:$0xff]   ;;  %v11768_v26 = vld [vmem:[#allocation4 + $0x1fc] ss:$12 sps:$4 sm:$0xff]  }
 0x8e4   : > { %v14694_v5 = vpack.c.bf16 %v6777_v31, %v6765_v29  ;;  %v6778_v36 = vmax.f32 %v6333_v52, 0.0  ;;  %v11733_v24 = vld [vmem:[#allocation4 + $0x48] ss:$12 sps:$4 sm:$0xff]   ;;  %v11736_v29 = vld [vmem:[%s14977_s7 + $0x3e8] ss:$48 sps:$4 sm:$0xff]  }
 0x8e5   : > { %6686 = vmatpush1.bf16.msra.mxu0 %v11676_v21  ;;  %v11738_v30 = vld [vmem:[%s14977_s7 + $0x3ec] ss:$48 sps:$4 sm:$0xff]   ;;  %v11739_v31 = vld [vmem:[#allocation4 + $0x30] ss:$12 sps:$4 sm:$0xff]   ;;  %v11751_v35 = vld [vmem:[#allocation4] ss:$12 sps:$4 sm:$0xff]  }
 0x8e6   : > { %6729 = vmatpush1.bf16.msra.mxu1 %v11679_v6  ;;  %6687 = vmatprep.subr.bf16.mxu0 %v11684_v59  ;;  %v14749_v43 = vpack.c.bf16 %v6778_v36, %v6766_v40  ;;  %v11741_v21 = vld [vmem:[#allocation4 + $0x34] ss:$12 sps:$4 sm:$0xff]   ;;  %v11747_v59 = vld [vmem:[#allocation4 + $0x1c] ss:$12 sps:$4 sm:$0xff]  }
 0x8e7   : > { %6730 = vmatprep.subr.bf16.mxu1 %v11687_v3  ;;  %v11744_v6 = vld [vmem:[%s14977_s7 + $0x38c] ss:$48 sps:$4 sm:$0xff]   ;;  %v11742_v3 = vld [vmem:[%s14977_s7 + $0x388] ss:$48 sps:$4 sm:$0xff]  }
 0x8e8   : > { %v11757_v27 = vld [vmem:[#allocation4 + $0x168] ss:$12 sps:$4 sm:$0xff]  }
 0x8e9   : > { %6688 = vmatpush1.bf16.msra.mxu0 %v11682_v11  ;;  %v11745_v11 = vld [vmem:[#allocation4 + $0x18] ss:$12 sps:$4 sm:$0xff]  }
 0x8ea   : > { %6731 = vmatpush1.bf16.msra.mxu1 %v11685_v0  ;;  %6689 = vmatprep.subr.bf16.mxu0 %v11690_v1  ;;  %v11750_v0 = vld [vmem:[%s14977_s7 + $0x32c] ss:$48 sps:$4 sm:$0xff]  }
 0x8eb   : > { %6732 = vmatprep.subr.bf16.mxu1 %v11693_v16  ;;  %v11753_v1 = vld [vmem:[#allocation4 + $0x4] ss:$12 sps:$4 sm:$0xff]  }
 0x8ec   : > { %v11748_v16 = vld [vmem:[%s14977_s7 + $0x328] ss:$48 sps:$4 sm:$0xff]  }
 0x8ed   : > { %6690 = vmatpush1.bf16.msra.mxu0 %v11688_v20  ;;  %v11756_v20 = vld [vmem:[#allocation4 + $0x22c] ss:$12 sps:$4 sm:$0xff]  }
 0x8ee   : > { %6733 = vmatpush1.bf16.msra.mxu1 %v11691_v15  ;;  %6691 = vmatprep.subr.bf16.mxu0 %v11696_v25  ;;  %v4763_v15 = vsub.s32 3, %v13438_v63 }
 0x8ef   : > { %6734 = vmatprep.subr.bf16.mxu1 %v11699_v55  ;;  %v11754_v55 = vld [vmem:[#allocation4 + $0x228] ss:$12 sps:$4 sm:$0xff]  }
 0x8f0   : > { %v4764_v28 = vrot.slane %v14638_v12, %v4763_v15 }
 0x8f1   : > { %6692 = vmatpush1.bf16.msra.mxu0 %v11694_v9  ;;  %v11762_v9 = vld [vmem:[#allocation4 + $0x214] ss:$12 sps:$4 sm:$0xff]  }
 0x8f2   : > { %6735 = vmatpush1.bf16.msra.mxu1 %v11697_v8  ;;  %6693 = vmatprep.subr.bf16.mxu0 %v11702_v2  ;;  %v11765_v8 = vld [vmem:[#allocation4 + $0x154] ss:$12 sps:$4 sm:$0xff]  }
 0x8f3   : > { %6736 = vmatprep.subr.bf16.mxu1 %v11705_v14  ;;  %v11760_v14 = vld [vmem:[#allocation4 + $0x210] ss:$12 sps:$4 sm:$0xff]  }
 0x8f5   : > { %6694 = vmatpush1.bf16.msra.mxu0 %v11700_v10  ;;  %v11763_v10 = vld [vmem:[#allocation4 + $0x150] ss:$12 sps:$4 sm:$0xff]  }
 0x8f6   : > { %6737 = vmatpush1.bf16.msra.mxu1 %v11703_v44  ;;  %6695 = vmatprep.subr.bf16.mxu0 %v11708_v18  ;;  %v11771_v18 = vld [vmem:[#allocation4 + $0x13c] ss:$12 sps:$4 sm:$0xff]  }
 0x8f7   : > { %8738 = vmatprep.subr.bf16.mxu1 %v11711_v34 }
 0x8f9   : > { %6696 = vmatpush2.bf16.msra.mxu0 %v11706_v37  ;;  %6755 = vmatmul.mubr.bf16.vlgmr.msra.gmra.mxu1 %v14041_v47  ;;  %v11718_v47 = vld [vmem:[%s14977_s7 + $0x508] ss:$48 sps:$4 sm:$0xff]   ;;  %v14793_v25 = vpop.f32.mrf.mxu1  ;;  %v11766_v37 = vld [vmem:[#allocation4 + $0x1f8] ss:$12 sps:$4 sm:$0xff]  }
 0x8fa   : > { %8739 = vmatpush1.bf16.msra.mxu1 %v11709_v7  ;;  %8770 = vmatprep.mubr.bf16.mxu1 %v14749_v43  ;;  %v11774_v7 = vld [vmem:[#allocation4 + $0x1e4] ss:$12 sps:$4 sm:$0xff]  }
 0x8fb   : > { %6697 = vmatprep.subr.bf16.mxu0 %v11714_v41  ;;  %8740 = vmatprep.subr.bf16.mxu1 %v11717_v46  ;;  %v6414_v2 = vpop.f32.mrf.mxu1 }
 0x8fd   : > { %6698 = vmatpush2.bf16.msra.mxu0 %v11712_v48  ;;  %v14801_v34 = vpop.f32.mrf.mxu1  ;;  %v11777_v48 = vld [vmem:[#allocation4 + $0x124] ss:$12 sps:$4 sm:$0xff]  }
 0x8fe   : > { %8741 = vmatpush1.bf16.msra.mxu1 %v11715_v49  ;;  %6699 = vmatprep.subr.bf16.mxu0 %v11720_v54 }
 0x8ff   : > { %8742 = vmatprep.subr.bf16.mxu1 %v11723_v45  ;;  %v6418_v49 = vpop.f32.mrf.mxu1  ;;  %v11772_v45 = vld [vmem:[#allocation4 + $0x1e0] ss:$12 sps:$4 sm:$0xff]  }
 0x901   : > { %6700 = vmatpush2.bf16.msra.mxu0 %v11718_v47  ;;  %v11775_v47 = vld [vmem:[#allocation4 + $0x120] ss:$12 sps:$4 sm:$0xff]  }
 0x902   : > { %8743 = vmatpush1.bf16.msra.mxu1 %v11721_v51  ;;  %6701 = vmatprep.subr.bf16.mxu0 %v11726_v57  ;;  %v11780_v51 = vld [vmem:[#allocation4 + $0x1cc] ss:$12 sps:$4 sm:$0xff]  }
 0x903   : > { %8744 = vmatprep.subr.bf16.mxu1 %v11729_v19 }
 0x905   : > { %6702 = vmatpush2.bf16.msra.mxu0 %v11724_v62  ;;  %v11783_v62 = vld [vmem:[#allocation4 + $0x10c] ss:$12 sps:$4 sm:$0xff]  }
 0x906   : > { %8745 = vmatpush1.bf16.msra.mxu1 %v11727_v61  ;;  %6703 = vmatprep.subr.bf16.mxu0 %v11732_v50  ;;  %v11778_v50 = vld [vmem:[#allocation4 + $0x1c8] ss:$12 sps:$4 sm:$0xff]  }
 0x907   : > { %8746 = vmatprep.subr.bf16.mxu1 %v11735_v58  ;;  %v11781_v58 = vld [vmem:[#allocation4 + $0x108] ss:$12 sps:$4 sm:$0xff]  }
 0x909   : > { %6704 = vmatpush2.bf16.msra.mxu0 %v11730_v60  ;;  %v11786_v60 = vld [vmem:[#allocation4 + $0x1b4] ss:$12 sps:$4 sm:$0xff]  }
 0x90a   : > { %8747 = vmatpush1.bf16.msra.mxu1 %v11733_v24  ;;  %6705 = vmatprep.subr.bf16.mxu0 %v11738_v30  ;;  %v11789_v24 = vld [vmem:[#allocation4 + $0xf4] ss:$12 sps:$4 sm:$0xff]   ;;  %v11784_v30 = vld [vmem:[#allocation4 + $0x1b0] ss:$12 sps:$4 sm:$0xff]  }
 0x90b   : > { %8748 = vmatprep.subr.bf16.mxu1 %v11741_v21  ;;  %v11787_v21 = vld [vmem:[#allocation4 + $0xf0] ss:$12 sps:$4 sm:$0xff]  }
 0x90d   : > { %6706 = vmatpush2.bf16.msra.mxu0 %v11736_v29  ;;  %v11792_v29 = vld [vmem:[#allocation4 + $0x19c] ss:$12 sps:$4 sm:$0xff]  }
 0x90e   : > { %8749 = vmatpush1.bf16.msra.mxu1 %v11739_v31  ;;  %6707 = vmatprep.subr.bf16.mxu0 %v11744_v6  ;;  %v11795_v31 = vld [vmem:[#allocation4 + $0xdc] ss:$12 sps:$4 sm:$0xff]   ;;  %v11790_v6 = vld [vmem:[#allocation4 + $0x198] ss:$12 sps:$4 sm:$0xff]  }
 0x90f   : > { %8750 = vmatprep.subr.bf16.mxu1 %v11747_v59  ;;  %v11793_v59 = vld [vmem:[#allocation4 + $0xd8] ss:$12 sps:$4 sm:$0xff]  }
 0x911   : > { %6708 = vmatpush2.bf16.msra.mxu0 %v11742_v3  ;;  %v11798_v3 = vld [vmem:[#allocation4 + $0x184] ss:$12 sps:$4 sm:$0xff]  }
 0x912   : > { %8751 = vmatpush1.bf16.msra.mxu1 %v11745_v11  ;;  %6709 = vmatprep.subr.bf16.mxu0 %v11750_v0  ;;  %v11801_v11 = vld [vmem:[#allocation4 + $0xc4] ss:$12 sps:$4 sm:$0xff]   ;;  %v11796_v0 = vld [vmem:[#allocation4 + $0x180] ss:$12 sps:$4 sm:$0xff]  }
 0x913   : > { %8752 = vmatprep.subr.bf16.mxu1 %v11753_v1  ;;  %v11799_v1 = vld [vmem:[#allocation4 + $0xc0] ss:$12 sps:$4 sm:$0xff]  }
 0x915   : > { %6710 = vmatpush2.bf16.msra.mxu0 %v11748_v16  ;;  %v11804_v16 = vld [vmem:[#allocation4 + $0x2ec] ss:$12 sps:$4 sm:$0xff]  }
 0x916   : > { %8753 = vmatpush1.bf16.msra.mxu1 %v11751_v35  ;;  %8781 = vmatprep.subr.bf16.mxu0 %v11756_v20  ;;  %v11807_v35 = vld [vmem:[#allocation4 + $0x3ac] ss:$12 sps:$4 sm:$0xff]   ;;  %v4771_v20 = vsub.s32 5, %v13438_v63 }
 0x917   : > { %8754 = vmatprep.subr.bf16.mxu1 %v11759_v23  ;;  %v11802_v23 = vld [vmem:[#allocation4 + $0x2e8] ss:$12 sps:$4 sm:$0xff]  }
 0x918   : > { %v14798_v13 = vpop.f32.mrf.mxu0  ;;  %6712 = vmatmul.mubr.bf16.vlgmr.msra.gmra.mxu0 %v14046_v42  ;;  %v11769_v42 = vld [vmem:[#allocation4 + $0x138] ss:$12 sps:$4 sm:$0xff]  }
 0x919   : > { %8782 = vmatpush1.bf16.msra.mxu0 %v11754_v55  ;;  %v11805_v55 = vld [vmem:[#allocation4 + $0x3a8] ss:$12 sps:$4 sm:$0xff]  }
 0x91a   : > { %v6371_v52 = vpop.f32.mrf.mxu0  ;;  %8755 = vmatpush2.bf16.msra.mxu1 %v11757_v27  ;;  %8783 = vmatprep.subr.bf16.mxu0 %v11762_v9  ;;  %v11810_v27 = vld [vmem:[#allocation4 + $0x2d4] ss:$12 sps:$4 sm:$0xff]  }
 0x91b   : > { %v6372_v44 = vadd.f32 %v6371_v52, %v4764_v28  ;;  %8756 = vmatprep.subr.bf16.mxu1 %v11765_v8  ;;  %v11813_v9 = vld [vmem:[#allocation4 + $0x394] ss:$12 sps:$4 sm:$0xff]   ;;  %v4772_v8 = vrot.slane %v14638_v12, %v4771_v20 }
 0x91c   : > { %v14803_v36 = vpop.f32.mrf.mxu0 }
 0x91d   : > { %8784 = vmatpush1.bf16.msra.mxu0 %v11760_v14  ;;  %v6415_v41 = vadd.f32 %v6414_v2, %v6372_v44  ;;  %v11808_v14 = vld [vmem:[#allocation4 + $0x2d0] ss:$12 sps:$4 sm:$0xff]  }
 0x91e   : > { %v6375_v40 = vpop.f32.mrf.mxu0  ;;  %8757 = vmatpush2.bf16.msra.mxu1 %v11763_v10  ;;  %8785 = vmatprep.subr.bf16.mxu0 %v11768_v26  ;;  %v11811_v10 = vld [vmem:[#allocation4 + $0x390] ss:$12 sps:$4 sm:$0xff]  }
 0x91f   : > { %v6376_v46 = vadd.f32 %v6375_v40, %v4764_v28  ;;  %8758 = vmatprep.subr.bf16.mxu1 %v11771_v18  ;;  %v6768_v57 = vmax.f32 %v6415_v41, 0.0  ;;  %v11816_v26 = vld [vmem:[#allocation4 + $0x2bc] ss:$12 sps:$4 sm:$0xff]   ;;  %v11817_v41 = vld [vmem:[#allocation4 + $0x378] ss:$12 sps:$4 sm:$0xff]  }
 0x920   : > { %v11819_v18 = vld [vmem:[#allocation4 + $0x37c] ss:$12 sps:$4 sm:$0xff]  }
 0x921   : > { %v6419_v54 = vadd.f32 %v6418_v49, %v6376_v46  ;;  %8786 = vmatpush1.bf16.msra.mxu0 %v11766_v37  ;;  %v11822_v46 = vld [vmem:[#allocation4 + $0x2a4] ss:$12 sps:$4 sm:$0xff]  }
 0x922   : > { %8759 = vmatpush2.bf16.msra.mxu1 %v11769_v42  ;;  %8787 = vmatprep.subr.bf16.mxu0 %v11774_v7  ;;  %v11814_v7 = vld [vmem:[#allocation4 + $0x2b8] ss:$12 sps:$4 sm:$0xff]  }
 0x923   : > { %v6780_v19 = vmax.f32 %v6419_v54, 0.0  ;;  %8760 = vmatprep.subr.bf16.mxu1 %v11777_v48  ;;  %v11825_v49 = vld [vmem:[#allocation4 + $0x364] ss:$12 sps:$4 sm:$0xff]  }
 0x925   : > { %8788 = vmatpush1.bf16.msra.mxu0 %v11772_v45  ;;  %v14805_v61 = vpack.c.bf16 %v6780_v19, %v6768_v57  ;;  %v11823_v19 = vld [vmem:[#allocation4 + $0x360] ss:$12 sps:$4 sm:$0xff]  }
 0x926   : > { %8761 = vmatpush2.bf16.msra.mxu1 %v11775_v47  ;;  %8789 = vmatprep.subr.bf16.mxu0 %v11780_v51  ;;  %v11820_v51 = vld [vmem:[#allocation4 + $0x2a0] ss:$12 sps:$4 sm:$0xff]  }
 0x927   : > { %8813 = vmatprep.mubr.bf16.mxu0 %v14805_v61  ;;  %8762 = vmatprep.subr.bf16.mxu1 %v11783_v62  ;;  %v11828_v62 = vld [vmem:[#allocation4 + $0x28c] ss:$12 sps:$4 sm:$0xff]  }
 0x929   : > { %8790 = vmatpush1.bf16.msra.mxu0 %v11778_v50  ;;  %v11831_v50 = vld [vmem:[#allocation4 + $0x34c] ss:$12 sps:$4 sm:$0xff]  }
 0x92a   : > { %8763 = vmatpush2.bf16.msra.mxu1 %v11781_v58  ;;  %8791 = vmatprep.subr.bf16.mxu0 %v11786_v60 }
 0x92b   : > { %8764 = vmatprep.subr.bf16.mxu1 %v11789_v24  ;;  %v11826_v24 = vld [vmem:[#allocation4 + $0x288] ss:$12 sps:$4 sm:$0xff]  }
 0x92d   : > { %8792 = vmatpush1.bf16.msra.mxu0 %v11784_v30 }
 0x92e   : > { %8765 = vmatpush2.bf16.msra.mxu1 %v11787_v21  ;;  %8793 = vmatprep.subr.bf16.mxu0 %v11792_v29  ;;  %v11829_v21 = vld [vmem:[#allocation4 + $0x348] ss:$12 sps:$4 sm:$0xff]  }
 0x92f   : > { %8766 = vmatprep.subr.bf16.mxu1 %v11795_v31  ;;  %v11834_v29 = vld [vmem:[#allocation4 + $0x274] ss:$12 sps:$4 sm:$0xff]  }
 0x930   : > { %v11837_v31 = vld [vmem:[#allocation4 + $0x334] ss:$12 sps:$4 sm:$0xff]  }
 0x931   : > { %8794 = vmatpush1.bf16.msra.mxu0 %v11790_v6  ;;  %v4760_v6 = vrot.slane %v14638_v12, %v13814_v4 }
 0x932   : > { %8767 = vmatpush2.bf16.msra.mxu1 %v11793_v59  ;;  %8795 = vmatprep.subr.bf16.mxu0 %v11798_v3  ;;  %v11832_v59 = vld [vmem:[#allocation4 + $0x270] ss:$12 sps:$4 sm:$0xff]  }
 0x933   : > { %8768 = vmatprep.subr.bf16.mxu1 %v11801_v11  ;;  %v6374_v3 = vadd.f32 %v14803_v36, %v4760_v6  ;;  %v11835_v11 = vld [vmem:[#allocation4 + $0x330] ss:$12 sps:$4 sm:$0xff]  }
 0x935   : > { %8796 = vmatpush1.bf16.msra.mxu0 %v11796_v0  ;;  %v11840_v0 = vld [vmem:[#allocation4 + $0x25c] ss:$12 sps:$4 sm:$0xff]   ;;  %v6417_v20 = vadd.f32 %v14801_v34, %v6374_v3 }
 0x936   : > { %8769 = vmatpush2.bf16.msra.mxu1 %v11799_v1  ;;  %8797 = vmatprep.subr.bf16.mxu0 %v11804_v16  ;;  %v11843_v1 = vld [vmem:[#allocation4 + $0x31c] ss:$12 sps:$4 sm:$0xff]   ;;  %v6370_v16 = vadd.f32 %v14798_v13, %v4760_v6  ;;  %v11855_v13 = vld [vmem:[#allocation4 + $0x46c] ss:$12 sps:$4 sm:$0xff]  }
 0x937   : > { %8824 = vmatprep.subr.bf16.mxu1 %v11807_v35  ;;  %v11838_v35 = vld [vmem:[#allocation4 + $0x258] ss:$12 sps:$4 sm:$0xff]   ;;  %v11850_v34 = vld [vmem:[#allocation4 + $0x528] ss:$12 sps:$4 sm:$0xff]  }
 0x938   : > { %v14809_v28 = vpop.f32.mrf.mxu0  ;;  %v6413_v36 = vadd.f32 %v14793_v25, %v6370_v16  ;;  %v11861_v25 = vld [vmem:[#allocation4 + $0x454] ss:$12 sps:$4 sm:$0xff]   ;;  %v11888_v6 = vld [vmem:[#allocation4 + $0x49c] ss:$12 sps:$4 sm:$0xff]   ;;  %v11894_v16 = vld [vmem:[#allocation4 + $0x484] ss:$12 sps:$4 sm:$0xff]  }
 0x939   : > { %v14812_v2 = vpop.f32.mrf.mxu1  ;;  %8771 = vmatmul.mubr.bf16.vlgmr.msra.gmra.mxu1 %v14694_v5  ;;  %8798 = vmatpush2.bf16.msra.mxu0 %v11802_v23  ;;  %v11841_v23 = vld [vmem:[#allocation4 + $0x318] ss:$12 sps:$4 sm:$0xff]   ;;  %v11891_v3 = vld [vmem:[#allocation4 + $0x3dc] ss:$12 sps:$4 sm:$0xff]  }
 0x93a   : > { %v6500_v52 = vpop.f32.mrf.mxu0  ;;  %8825 = vmatpush1.bf16.msra.mxu1 %v11805_v55  ;;  %8799 = vmatprep.subr.bf16.mxu0 %v11810_v27  ;;  %v11846_v55 = vld [vmem:[#allocation4 + $0x244] ss:$12 sps:$4 sm:$0xff]  }
 0x93b   : > { %v6457_v44 = vpop.f32.mrf.mxu1  ;;  %8826 = vmatprep.subr.bf16.mxu1 %v11813_v9  ;;  %v11849_v27 = vld [vmem:[#allocation4 + $0x304] ss:$12 sps:$4 sm:$0xff]   ;;  %v11844_v9 = vld [vmem:[#allocation4 + $0x240] ss:$12 sps:$4 sm:$0xff]  }
 0x93c   : > { %v6458_v37 = vadd.f32 %v6457_v44, %v4772_v8  ;;  %v14815_v40 = vpop.f32.mrf.mxu0  ;;  %v11853_v44 = vld [vmem:[#allocation4 + $0x468] ss:$12 sps:$4 sm:$0xff]  }
 0x93d   : > { %v14817_v42 = vpop.f32.mrf.mxu1  ;;  %8800 = vmatpush2.bf16.msra.mxu0 %v11808_v14  ;;  %v11847_v14 = vld [vmem:[#allocation4 + $0x300] ss:$12 sps:$4 sm:$0xff]  }
 0x93e   : > { %8827 = vmatpush1.bf16.msra.mxu1 %v11811_v10  ;;  %8801 = vmatprep.subr.bf16.mxu0 %v11816_v26  ;;  %v6501_v54 = vadd.f32 %v6500_v52, %v6458_v37  ;;  %v6504_v47 = vpop.f32.mrf.mxu0  ;;  %v11852_v52 = vld [vmem:[#allocation4 + $0x52c] ss:$12 sps:$4 sm:$0xff]   ;;  %v6767_v10 = vmax.f32 %v6413_v36, 0.0  ;;  %v11856_v37 = vld [vmem:[#allocation4 + $0x510] ss:$12 sps:$4 sm:$0xff]  }
 0x93f   : > { %v6461_v48 = vpop.f32.mrf.mxu1  ;;  %8828 = vmatprep.subr.bf16.mxu1 %v11819_v18  ;;  %v11858_v18 = vld [vmem:[#allocation4 + $0x514] ss:$12 sps:$4 sm:$0xff]  }
 0x940   : > { %v6462_v45 = vadd.f32 %v6461_v48, %v4772_v8  ;;  %v6770_v58 = vmax.f32 %v6501_v54, 0.0  ;;  %v6779_v8 = vmax.f32 %v6417_v20, 0.0  ;;  %v11862_v48 = vld [vmem:[#allocation4 + $0x4f8] ss:$12 sps:$4 sm:$0xff]  }
 0x941   : > { %8802 = vmatpush2.bf16.msra.mxu0 %v11814_v7  ;;  %v11859_v7 = vld [vmem:[#allocation4 + $0x450] ss:$12 sps:$4 sm:$0xff]  }
 0x942   : > { %v6505_v57 = vadd.f32 %v6504_v47, %v6462_v45  ;;  %8829 = vmatpush1.bf16.msra.mxu1 %v11817_v41  ;;  %8803 = vmatprep.subr.bf16.mxu0 %v11822_v46  ;;  %v14828_v26 = vpack.c.bf16 %v6779_v8, %v6767_v10  ;;  %v11864_v41 = vld [vmem:[#allocation4 + $0x4fc] ss:$12 sps:$4 sm:$0xff]   ;;  %v11870_v54 = vld [vmem:[#allocation4 + $0x4e4] ss:$12 sps:$4 sm:$0xff]   ;;  %v11868_v47 = vld [vmem:[#allocation4 + $0x4e0] ss:$12 sps:$4 sm:$0xff]  }
 0x943   : > { %8830 = vmatprep.subr.bf16.mxu1 %v11825_v49  ;;  %v11867_v46 = vld [vmem:[#allocation4 + $0x43c] ss:$12 sps:$4 sm:$0xff]   ;;  %v11865_v49 = vld [vmem:[#allocation4 + $0x438] ss:$12 sps:$4 sm:$0xff]  }
 0x944   : > { %v6782_v60 = vmax.f32 %v6505_v57, 0.0  ;;  %v11873_v45 = vld [vmem:[#allocation4 + $0x424] ss:$12 sps:$4 sm:$0xff]   ;;  %v11876_v57 = vld [vmem:[#allocation4 + $0x4cc] ss:$12 sps:$4 sm:$0xff]  }
 0x945   : > { %8804 = vmatpush2.bf16.msra.mxu0 %v11820_v51  ;;  %v11871_v51 = vld [vmem:[#allocation4 + $0x420] ss:$12 sps:$4 sm:$0xff]   ;;  %v11897_v20 = vld [vmem:[#allocation4 + $0x3c4] ss:$12 sps:$4 sm:$0xff]  }
 0x946   : > { %8831 = vmatpush1.bf16.msra.mxu1 %v11823_v19  ;;  %8805 = vmatprep.subr.bf16.mxu0 %v11828_v62  ;;  %v14819_v30 = vpack.c.bf16 %v6782_v60, %v6770_v58  ;;  %v11879_v19 = vld [vmem:[#allocation4 + $0x40c] ss:$12 sps:$4 sm:$0xff]   ;;  %v4767_v62 = vsub.s32 4, %v13438_v63  ;;  %v11877_v58 = vld [vmem:[#allocation4 + $0x408] ss:$12 sps:$4 sm:$0xff]  }
 0x947   : > { %8832 = vmatprep.subr.bf16.mxu1 %v11831_v50  ;;  %v11874_v50 = vld [vmem:[#allocation4 + $0x4c8] ss:$12 sps:$4 sm:$0xff]  }
 0x948   : > { %8856 = vmatprep.mubr.bf16.mxu1 %v14819_v30  ;;  %v11882_v60 = vld [vmem:[#allocation4 + $0x4b4] ss:$12 sps:$4 sm:$0xff]  }
 0x949   : > { %8806 = vmatpush2.bf16.msra.mxu0 %v11826_v24  ;;  %v11885_v24 = vld [vmem:[#allocation4 + $0x3f4] ss:$12 sps:$4 sm:$0xff]  }
 0x94a   : > { %8833 = vmatpush1.bf16.msra.mxu1 %v11829_v21  ;;  %8807 = vmatprep.subr.bf16.mxu0 %v11834_v29  ;;  %v4768_v21 = vrot.slane %v14638_v12, %v4767_v62  ;;  %v11880_v29 = vld [vmem:[#allocation4 + $0x4b0] ss:$12 sps:$4 sm:$0xff]  }
 0x94b   : > { %8834 = vmatprep.subr.bf16.mxu1 %v11837_v31  ;;  %v11883_v31 = vld [vmem:[#allocation4 + $0x3f0] ss:$12 sps:$4 sm:$0xff]  }
 0x94d   : > { %8808 = vmatpush2.bf16.msra.mxu0 %v11832_v59  ;;  %v6460_v59 = vadd.f32 %v14817_v42, %v4768_v21  ;;  %v11895_v42 = vld [vmem:[#allocation4 + $0x3c0] ss:$12 sps:$4 sm:$0xff]  }
 0x94e   : > { %8835 = vmatpush1.bf16.msra.mxu1 %v11835_v11  ;;  %8809 = vmatprep.subr.bf16.mxu0 %v11840_v0  ;;  %v6456_v11 = vadd.f32 %v14812_v2, %v4768_v21  ;;  %v11886_v0 = vld [vmem:[#allocation4 + $0x498] ss:$12 sps:$4 sm:$0xff]   ;;  %v11919_v21 = vld [vmem:[#allocation4 + $0x660] ss:$12 sps:$4 sm:$0xff]  }
 0x94f   : > { %8836 = vmatprep.subr.bf16.mxu1 %v11843_v1  ;;  %v11889_v1 = vld [vmem:[#allocation4 + $0x3d8] ss:$12 sps:$4 sm:$0xff]  }
 0x950   : > { %v11903_v2 = vld [vmem:[#allocation4 + $0x6ac] ss:$12 sps:$4 sm:$0xff]  }
 0x951   : > { %8810 = vmatpush2.bf16.msra.mxu0 %v11838_v35  ;;  %v6503_v35 = vadd.f32 %v14815_v40, %v6460_v59  ;;  %v11898_v40 = vld [vmem:[#allocation4 + $0x5e8] ss:$12 sps:$4 sm:$0xff]   ;;  %v11927_v59 = vld [vmem:[#allocation4 + $0x64c] ss:$12 sps:$4 sm:$0xff]  }
 0x952   : > { %8837 = vmatpush1.bf16.msra.mxu1 %v11841_v23  ;;  %8811 = vmatprep.subr.bf16.mxu0 %v11846_v55  ;;  %v6499_v23 = vadd.f32 %v14809_v28, %v6456_v11  ;;  %v11892_v55 = vld [vmem:[#allocation4 + $0x480] ss:$12 sps:$4 sm:$0xff]  }
 0x953   : > { %8838 = vmatprep.subr.bf16.mxu1 %v11849_v27  ;;  %v11900_v27 = vld [vmem:[#allocation4 + $0x5ec] ss:$12 sps:$4 sm:$0xff]   ;;  %v6781_v36 = vmax.f32 %v6503_v35, 0.0  ;;  %v11906_v28 = vld [vmem:[#allocation4 + $0x5d4] ss:$12 sps:$4 sm:$0xff]  }
 0x954   : > { %v11933_v35 = vld [vmem:[#allocation4 + $0x634] ss:$12 sps:$4 sm:$0xff]  }
 0x955   : > { %8812 = vmatpush2.bf16.msra.mxu0 %v11844_v9  ;;  %v4779_v9 = vsub.s32 7, %v13438_v63 }
 0x956   : > { %8839 = vmatpush1.bf16.msra.mxu1 %v11847_v14  ;;  %8867 = vmatprep.subr.bf16.mxu0 %v11852_v52  ;;  %v6769_v14 = vmax.f32 %v6499_v23, 0.0  ;;  %v11901_v52 = vld [vmem:[#allocation4 + $0x6a8] ss:$12 sps:$4 sm:$0xff]   ;;  %v11928_v23 = vld [vmem:[#allocation4 + $0x570] ss:$12 sps:$4 sm:$0xff]  }
 0x957   : > { %8840 = vmatprep.subr.bf16.mxu1 %v11855_v13  ;;  %v4780_v10 = vrot.slane %v14638_v12, %v4779_v9  ;;  %v11934_v9 = vld [vmem:[#allocation4 + $0x558] ss:$12 sps:$4 sm:$0xff]  }
 0x958   : > { %8814 = vmatmul.mubr.bf16.vlgmr.msra.gmra.mxu0 %v14828_v26  ;;  %v14840_v13 = vpack.c.bf16 %v6781_v36, %v6769_v14  ;;  %v11939_v36 = vld [vmem:[#allocation4 + $0x61c] ss:$12 sps:$4 sm:$0xff]  }
 0x959   : > { %8868 = vmatpush1.bf16.msra.mxu0 %v11850_v34  ;;  %v14838_v8 = vpop.f32.mrf.mxu1  ;;  %v11909_v34 = vld [vmem:[#allocation4 + $0x694] ss:$12 sps:$4 sm:$0xff]  }
 0x95a   : > { %8841 = vmatpush2.bf16.msra.mxu1 %v11853_v44  ;;  %8869 = vmatprep.subr.bf16.mxu0 %v11858_v18 }
 0x95b   : > { %8842 = vmatprep.subr.bf16.mxu1 %v11861_v25  ;;  %v6586_v44 = vpop.f32.mrf.mxu1  ;;  %v11904_v25 = vld [vmem:[#allocation4 + $0x5d0] ss:$12 sps:$4 sm:$0xff]  }
 0x95d   : > { %8870 = vmatpush1.bf16.msra.mxu0 %v11856_v37 }
 0x95e   : > { %8843 = vmatpush2.bf16.msra.mxu1 %v11859_v7  ;;  %8871 = vmatprep.subr.bf16.mxu0 %v11864_v41  ;;  %v11907_v7 = vld [vmem:[#allocation4 + $0x690] ss:$12 sps:$4 sm:$0xff]  }
 0x95f   : > { %8844 = vmatprep.subr.bf16.mxu1 %v11867_v46  ;;  %v11912_v41 = vld [vmem:[#allocation4 + $0x5bc] ss:$12 sps:$4 sm:$0xff]  }
 0x961   : > { %8872 = vmatpush1.bf16.msra.mxu0 %v11862_v48  ;;  %v11915_v48 = vld [vmem:[#allocation4 + $0x67c] ss:$12 sps:$4 sm:$0xff]  }
 0x962   : > { %8845 = vmatpush2.bf16.msra.mxu1 %v11865_v49  ;;  %8873 = vmatprep.subr.bf16.mxu0 %v11870_v54  ;;  %v6588_v49 = vpop.f32.mrf.mxu1 }
 0x963   : > { %8846 = vmatprep.subr.bf16.mxu1 %v11873_v45  ;;  %v11910_v45 = vld [vmem:[#allocation4 + $0x5b8] ss:$12 sps:$4 sm:$0xff]  }
 0x965   : > { %8874 = vmatpush1.bf16.msra.mxu0 %v11868_v47 }
 0x966   : > { %8847 = vmatpush2.bf16.msra.mxu1 %v11871_v51  ;;  %8875 = vmatprep.subr.bf16.mxu0 %v11876_v57  ;;  %v11913_v51 = vld [vmem:[#allocation4 + $0x678] ss:$12 sps:$4 sm:$0xff]  }
 0x967   : > { %8848 = vmatprep.subr.bf16.mxu1 %v11879_v19  ;;  %v11918_v57 = vld [vmem:[#allocation4 + $0x5a4] ss:$12 sps:$4 sm:$0xff]  }
 0x969   : > { %8876 = vmatpush1.bf16.msra.mxu0 %v11874_v50  ;;  %v11921_v50 = vld [vmem:[#allocation4 + $0x664] ss:$12 sps:$4 sm:$0xff]  }
 0x96a   : > { %8849 = vmatpush2.bf16.msra.mxu1 %v11877_v58  ;;  %8877 = vmatprep.subr.bf16.mxu0 %v11882_v60  ;;  %v6590_v58 = vpop.f32.mrf.mxu1 }
 0x96b   : > { %8850 = vmatprep.subr.bf16.mxu1 %v11885_v24  ;;  %v11916_v24 = vld [vmem:[#allocation4 + $0x5a0] ss:$12 sps:$4 sm:$0xff]  }
 0x96d   : > { %8878 = vmatpush1.bf16.msra.mxu0 %v11880_v29  ;;  %v11924_v29 = vld [vmem:[#allocation4 + $0x58c] ss:$12 sps:$4 sm:$0xff]  }
 0x96e   : > { %8851 = vmatpush2.bf16.msra.mxu1 %v11883_v31  ;;  %8879 = vmatprep.subr.bf16.mxu0 %v11888_v6 }
 0x96f   : > { %8852 = vmatprep.subr.bf16.mxu1 %v11891_v3  ;;  %v4775_v3 = vsub.s32 6, %v13438_v63 }
 0x971   : > { %8880 = vmatpush1.bf16.msra.mxu0 %v11886_v0  ;;  %v11922_v0 = vld [vmem:[#allocation4 + $0x588] ss:$12 sps:$4 sm:$0xff]  }
 0x972   : > { %8853 = vmatpush2.bf16.msra.mxu1 %v11889_v1  ;;  %8881 = vmatprep.subr.bf16.mxu0 %v11894_v16  ;;  %v11925_v1 = vld [vmem:[#allocation4 + $0x648] ss:$12 sps:$4 sm:$0xff]  }
 0x973   : > { %8854 = vmatprep.subr.bf16.mxu1 %v11897_v20  ;;  %v11930_v16 = vld [vmem:[#allocation4 + $0x574] ss:$12 sps:$4 sm:$0xff]   ;;  %v4776_v20 = vrot.slane %v14638_v12, %v4775_v3  ;;  %v11957_v3 = vld [vmem:[#allocation4 + $0x724] ss:$12 sps:$4 sm:$0xff]  }
 0x975   : > { %8882 = vmatpush1.bf16.msra.mxu0 %v11892_v55 }
 0x976   : > { %8855 = vmatpush2.bf16.msra.mxu1 %v11895_v42  ;;  %8883 = vmatprep.subr.bf16.mxu0 %v11900_v27  ;;  %v11931_v42 = vld [vmem:[#allocation4 + $0x630] ss:$12 sps:$4 sm:$0xff]  }
 0x977   : > { %8910 = vmatprep.subr.bf16.mxu1 %v11903_v2  ;;  %v11936_v27 = vld [vmem:[#allocation4 + $0x55c] ss:$12 sps:$4 sm:$0xff]  }
 0x978   : > { %v6541_v18 = vpop.f32.mrf.mxu0 }
 0x979   : > { %8857 = vmatmul.mubr.bf16.vlgmr.msra.gmra.mxu1 %v14840_v13  ;;  %8884 = vmatpush2.bf16.msra.mxu0 %v11898_v40  ;;  %v6542_v2 = vadd.f32 %v6541_v18, %v4776_v20  ;;  %v11937_v40 = vld [vmem:[#allocation4 + $0x618] ss:$12 sps:$4 sm:$0xff]  }
 0x97a   : > { %v6543_v37 = vpop.f32.mrf.mxu0  ;;  %8911 = vmatpush1.bf16.msra.mxu1 %v11901_v52  ;;  %8885 = vmatprep.subr.bf16.mxu0 %v11906_v28  ;;  %v11942_v52 = vld [vmem:[#allocation4 + $0x544] ss:$12 sps:$4 sm:$0xff]   ;;  %v11948_v18 = vld [vmem:[#allocation4 + $0x76c] ss:$12 sps:$4 sm:$0xff]  }
 0x97b   : > { %v6544_v46 = vadd.f32 %v6543_v37, %v4780_v10  ;;  %8912 = vmatprep.subr.bf16.mxu1 %v11909_v34  ;;  %v11945_v28 = vld [vmem:[#allocation4 + $0x604] ss:$12 sps:$4 sm:$0xff]   ;;  %v6585_v12 = vadd.f32 %v14838_v8, %v6542_v2  ;;  %v11982_v2 = vld [vmem:[#allocation4 + $0x7c8] ss:$12 sps:$4 sm:$0xff]  }
 0x97c   : > { %v6545_v54 = vpop.f32.mrf.mxu0  ;;  %v14855_v8 = vld [vmem:[%s14978_s8 + $0x8] sm:$0xf] }
 0x97d   : > { %8886 = vmatpush2.bf16.msra.mxu0 %v11904_v25  ;;  %v6587_v19 = vadd.f32 %v6586_v44, %v6544_v46  ;;  %v6546_v55 = vadd.f32 %v6545_v54, %v4776_v20  ;;  %v11943_v44 = vld [vmem:[#allocation4 + $0x600] ss:$12 sps:$4 sm:$0xff]   ;;  %v6771_v37 = vmax.f32 %v6585_v12, 0.0  ;;  %v11946_v46 = vld [vmem:[#allocation4 + $0x768] ss:$12 sps:$4 sm:$0xff]  }
 0x97e   : > { %v6547_v47 = vpop.f32.mrf.mxu0  ;;  %8913 = vmatpush1.bf16.msra.mxu1 %v11907_v7  ;;  %8887 = vmatprep.subr.bf16.mxu0 %v11912_v41  ;;  %v11960_v25 = vld [vmem:[#allocation4 + $0x82c] ss:$12 sps:$4 sm:$0xff]   ;;  %v11958_v7 = vld [vmem:[#allocation4 + $0x828] ss:$12 sps:$4 sm:$0xff]   ;;  %v11987_v12 = vld [vmem:[#allocation4 + $0x7b0] ss:$12 sps:$4 sm:$0xff]  }
 0x97f   : > { %v6548_v62 = vadd.f32 %v6547_v47, %v4780_v10  ;;  %8914 = vmatprep.subr.bf16.mxu1 %v11915_v48  ;;  %v6772_v31 = vmax.f32 %v6587_v19, 0.0  ;;  %v6589_v14 = vadd.f32 %v6588_v49, %v6546_v55  ;;  %v11940_v10 = vld [vmem:[#allocation4 + $0x540] ss:$12 sps:$4 sm:$0xff]   ;;  %v11949_v19 = vld [vmem:[#allocation4 + $0x750] ss:$12 sps:$4 sm:$0xff]  }
 0x980   : > { %v11966_v48 = vld [vmem:[#allocation4 + $0x814] ss:$12 sps:$4 sm:$0xff]   ;;  %v11984_v55 = vld [vmem:[#allocation4 + $0x7cc] ss:$12 sps:$4 sm:$0xff]  }
 0x981   : > { %v6591_v60 = vadd.f32 %v6590_v58, %v6548_v62  ;;  %8888 = vmatpush2.bf16.msra.mxu0 %v11910_v45  ;;  %v6783_v34 = vmax.f32 %v6589_v14, 0.0  ;;  %v11951_v49 = vld [vmem:[#allocation4 + $0x754] ss:$12 sps:$4 sm:$0xff]   ;;  %v4788_v45 = vrot.slane %v14855_v8, %v13803_v56  ;;  %v11972_v62 = vld [vmem:[#allocation4 + $0x7fc] ss:$12 sps:$4 sm:$0xff]  }
 0x982   : > { %8915 = vmatpush1.bf16.msra.mxu1 %v11913_v51  ;;  %8889 = vmatprep.subr.bf16.mxu0 %v11918_v57  ;;  %v11964_v51 = vld [vmem:[#allocation4 + $0x810] ss:$12 sps:$4 sm:$0xff]   ;;  %v11961_v14 = vld [vmem:[#allocation4 + $0x708] ss:$12 sps:$4 sm:$0xff]  }
 0x983   : > { %v6784_v6 = vmax.f32 %v6591_v60, 0.0  ;;  %8916 = vmatprep.subr.bf16.mxu1 %v11921_v50  ;;  %v14850_v41 = vpack.c.bf16 %v6783_v34, %v6771_v37  ;;  %v11954_v58 = vld [vmem:[#allocation4 + $0x73c] ss:$12 sps:$4 sm:$0xff]   ;;  %v11992_v37 = vld [vmem:[#allocation4 + $0x798] ss:$12 sps:$4 sm:$0xff]  }
 0x984   : > { %v11994_v34 = vld [vmem:[#allocation4 + $0x79c] ss:$12 sps:$4 sm:$0xff]  }
 0x985   : > { %8890 = vmatpush2.bf16.msra.mxu0 %v11916_v24  ;;  %v14845_v11 = vpack.c.bf16 %v6784_v6, %v6772_v31  ;;  %v11952_v31 = vld [vmem:[#allocation4 + $0x738] ss:$12 sps:$4 sm:$0xff]  }
 0x986   : > { %8917 = vmatpush1.bf16.msra.mxu1 %v11919_v21  ;;  %8891 = vmatprep.subr.bf16.mxu0 %v11924_v29  ;;  %v11970_v29 = vld [vmem:[#allocation4 + $0x7f8] ss:$12 sps:$4 sm:$0xff]  }
 0x987   : > { %8899 = vmatprep.mubr.bf16.mxu0 %v14845_v11  ;;  %8918 = vmatprep.subr.bf16.mxu1 %v11927_v59  ;;  %v11978_v6 = vld [vmem:[#allocation4 + $0x7e4] ss:$12 sps:$4 sm:$0xff]  }
 0x989   : > { %8892 = vmatpush2.bf16.msra.mxu0 %v11922_v0 }
 0x98a   : > { %8919 = vmatpush1.bf16.msra.mxu1 %v11925_v1  ;;  %8893 = vmatprep.subr.bf16.mxu0 %v11930_v16 }
 0x98b   : > { %8920 = vmatprep.subr.bf16.mxu1 %v11933_v35  ;;  %v11976_v35 = vld [vmem:[#allocation4 + $0x7e0] ss:$12 sps:$4 sm:$0xff]  }
 0x98d   : > { %8894 = vmatpush2.bf16.msra.mxu0 %v11928_v23  ;;  %v11955_v23 = vld [vmem:[#allocation4 + $0x720] ss:$12 sps:$4 sm:$0xff]  }
 0x98e   : > { %8921 = vmatpush1.bf16.msra.mxu1 %v11931_v42  ;;  %8895 = vmatprep.subr.bf16.mxu0 %v11936_v27  ;;  %v11963_v42 = vld [vmem:[#allocation4 + $0x70c] ss:$12 sps:$4 sm:$0xff]  }
 0x98f   : > { %8922 = vmatprep.subr.bf16.mxu1 %v11939_v36 }
 0x991   : > { %8896 = vmatpush2.bf16.msra.mxu0 %v11934_v9 }
 0x992   : > { %8923 = vmatpush1.bf16.msra.mxu1 %v11937_v40  ;;  %8897 = vmatprep.subr.bf16.mxu0 %v11942_v52  ;;  %v11989_v40 = vld [vmem:[#allocation4 + $0x7b4] ss:$12 sps:$4 sm:$0xff]  }
 0x993   : > { %8924 = vmatprep.subr.bf16.mxu1 %v11945_v28  ;;  %v11969_v52 = vld [vmem:[#allocation4 + $0x6f4] ss:$12 sps:$4 sm:$0xff]   ;;  %v4784_v28 = vrot.slane %v14855_v8, %v13806_v53 }
 0x995   : > { %8898 = vmatpush2.bf16.msra.mxu0 %v11940_v10  ;;  %v11967_v10 = vld [vmem:[#allocation4 + $0x6f0] ss:$12 sps:$4 sm:$0xff]  }
 0x996   : > { %8925 = vmatpush1.bf16.msra.mxu1 %v11943_v44  ;;  %8953 = vmatprep.subr.bf16.mxu0 %v11960_v25  ;;  %v11975_v25 = vld [vmem:[#allocation4 + $0x6dc] ss:$12 sps:$4 sm:$0xff]  }
 0x997   : > { %8926 = vmatprep.subr.bf16.mxu1 %v11948_v18 }
 0x998   : > { %v14857_v54 = vpop.f32.mrf.mxu0  ;;  %8900 = vmatmul.mubr.bf16.vlgmr.msra.gmra.mxu0 %v14850_v41 }
 0x999   : > { %v6627_v47 = vpop.f32.mrf.mxu1  ;;  %8954 = vmatpush1.bf16.msra.mxu0 %v11958_v7  ;;  %v11973_v7 = vld [vmem:[#allocation4 + $0x6d8] ss:$12 sps:$4 sm:$0xff]  }
 0x99a   : > { %v6672_v57 = vpop.f32.mrf.mxu0  ;;  %8927 = vmatpush2.bf16.msra.mxu1 %v11946_v46  ;;  %8955 = vmatprep.subr.bf16.mxu0 %v11966_v48  ;;  %v6628_v18 = vadd.f32 %v6627_v47, %v4784_v28  ;;  %v11999_v46 = vld [vmem:[#allocation4 + $0x784] ss:$12 sps:$4 sm:$0xff]  }
 0x99b   : > { %v6629_v50 = vpop.f32.mrf.mxu1  ;;  %8928 = vmatprep.subr.bf16.mxu1 %v11951_v49  ;;  %v11981_v49 = vld [vmem:[#allocation4 + $0x6c4] ss:$12 sps:$4 sm:$0xff]  }
 0x99c   : > { %v6630_v60 = vadd.f32 %v6629_v50, %v4788_v45  ;;  %v6674_v24 = vpop.f32.mrf.mxu0  ;;  %v11985_v47 = vld [vmem:[#allocation4 + $0x170] ss:$12 sps:$4 sm:$0xff]  }
 0x99d   : > { %v6631_v21 = vpop.f32.mrf.mxu1  ;;  %8956 = vmatpush1.bf16.msra.mxu0 %v11964_v51  ;;  %v11997_v51 = vld [vmem:[#allocation4 + $0x780] ss:$12 sps:$4 sm:$0xff]  }
 0x99e   : > { %8929 = vmatpush2.bf16.msra.mxu1 %v11949_v19  ;;  %8957 = vmatprep.subr.bf16.mxu0 %v11972_v62  ;;  %v6673_v0 = vadd.f32 %v6672_v57, %v6630_v60  ;;  %v6676_v16 = vpop.f32.mrf.mxu0  ;;  %v6632_v44 = vadd.f32 %v6631_v21, %v4784_v28  ;;  %v11979_v57 = vld [vmem:[#allocation4 + $0x6c0] ss:$12 sps:$4 sm:$0xff]   ;;  %v11986_v60 = vld [vmem:[#allocation4 + $0xb0] ss:$12 sps:$4 sm:$0xff]   ;;  %v11990_v21 = vld [vmem:[#allocation4 + $0x158] ss:$12 sps:$4 sm:$0xff]  }
 0x99f   : > { %v6633_v59 = vpop.f32.mrf.mxu1  ;;  %8930 = vmatprep.subr.bf16.mxu1 %v11954_v58  ;;  %v12004_v19 = vld [vmem:[#allocation4 + $0x8ec] ss:$12 sps:$4 sm:$0xff]   ;;  %v12002_v58 = vld [vmem:[#allocation4 + $0x8e8] ss:$12 sps:$4 sm:$0xff]  }
 0x9a0   : > { %v6634_v1 = vadd.f32 %v6633_v59, %v4788_v45  ;;  %v6774_v27 = vmax.f32 %v6673_v0, 0.0  ;;  %v6675_v48 = vadd.f32 %v6674_v24, %v6632_v44  ;;  %v6671_v45 = vadd.f32 %v14857_v54, %v6628_v18  ;;  %v12009_v54 = vld [vmem:[#allocation4 + $0x8d4] ss:$12 sps:$4 sm:$0xff]   ;;  %v12032_v28 = vld [vmem:[#allocation4 + $0x858] ss:$12 sps:$4 sm:$0xff]  }
 0x9a1   : > { %8958 = vmatpush1.bf16.msra.mxu0 %v11970_v29  ;;  %v12007_v29 = vld [vmem:[#allocation4 + $0x8d0] ss:$12 sps:$4 sm:$0xff]   ;;  %v11995_v59 = vld [vmem:[#allocation4 + $0x140] ss:$12 sps:$4 sm:$0xff]  }
 0x9a2   : > { %v6677_v20 = vadd.f32 %v6676_v16, %v6634_v1  ;;  %8931 = vmatpush2.bf16.msra.mxu1 %v11952_v31  ;;  %8959 = vmatprep.subr.bf16.mxu0 %v11978_v6  ;;  %v6785_v62 = vmax.f32 %v6675_v48, 0.0  ;;  %v6773_v50 = vmax.f32 %v6671_v45, 0.0  ;;  %v11991_v31 = vld [vmem:[#allocation4 + $0x98] ss:$12 sps:$4 sm:$0xff]   ;;  %v12014_v6 = vld [vmem:[#allocation4 + $0x8bc] ss:$12 sps:$4 sm:$0xff]   ;;  %v4796_v48 = vrot.slane %v14855_v8, %v4763_v15 }
 0x9a3   : > { %8932 = vmatprep.subr.bf16.mxu1 %v11957_v3  ;;  %v12012_v3 = vld [vmem:[#allocation4 + $0x8b8] ss:$12 sps:$4 sm:$0xff]   ;;  %v11996_v0 = vld [vmem:[#allocation4 + $0x80] ss:$12 sps:$4 sm:$0xff]   ;;  %v12000_v16 = vld [vmem:[#allocation4 + $0x128] ss:$12 sps:$4 sm:$0xff]  }
 0x9a4   : > { %v6786_v36 = vmax.f32 %v6677_v20, 0.0  ;;  %v14868_v24 = vpack.c.bf16 %v6785_v62, %v6773_v50  ;;  %v12019_v1 = vld [vmem:[#allocation4 + $0x8a4] ss:$12 sps:$4 sm:$0xff]   ;;  %v12001_v20 = vld [vmem:[#allocation4 + $0x68] ss:$12 sps:$4 sm:$0xff]  }
 0x9a5   : > { %8960 = vmatpush1.bf16.msra.mxu0 %v11976_v35  ;;  %v12017_v35 = vld [vmem:[#allocation4 + $0x8a0] ss:$12 sps:$4 sm:$0xff]   ;;  %v12042_v18 = vld [vmem:[#allocation4 + $0x2f0] ss:$12 sps:$4 sm:$0xff]   ;;  %v12031_v62 = vld [vmem:[#allocation4 + $0x398] ss:$12 sps:$4 sm:$0xff]  }
 0x9a6   : > { %8933 = vmatpush2.bf16.msra.mxu1 %v11955_v23  ;;  %v14862_v9 = vpack.c.bf16 %v6786_v36, %v6774_v27  ;;  %8961 = vmatprep.subr.bf16.mxu0 %v11984_v55  ;;  %v12024_v23 = vld [vmem:[#allocation4 + $0x88c] ss:$12 sps:$4 sm:$0xff]   ;;  %v12022_v55 = vld [vmem:[#allocation4 + $0x888] ss:$12 sps:$4 sm:$0xff]  }
 0x9a7   : > { %8934 = vmatprep.subr.bf16.mxu1 %v11963_v42  ;;  %v12006_v42 = vld [vmem:[#allocation4 + $0x50] ss:$12 sps:$4 sm:$0xff]   ;;  %v12029_v27 = vld [vmem:[#allocation4 + $0x874] ss:$12 sps:$4 sm:$0xff]   ;;  %v12010_v36 = vld [vmem:[#allocation4 + $0xf8] ss:$12 sps:$4 sm:$0xff]  }
 0x9a8   : > { %8942 = vmatprep.mubr.bf16.mxu1 %v14862_v9  ;;  %v12037_v44 = vld [vmem:[#allocation4 + $0x840] ss:$12 sps:$4 sm:$0xff]  }
 0x9a9   : > { %8962 = vmatpush1.bf16.msra.mxu0 %v11982_v2  ;;  %v12027_v2 = vld [vmem:[#allocation4 + $0x870] ss:$12 sps:$4 sm:$0xff]   ;;  %v12035_v50 = vld [vmem:[#allocation4 + $0x440] ss:$12 sps:$4 sm:$0xff]  }
 0x9aa   : > { %8935 = vmatpush2.bf16.msra.mxu1 %v11961_v14  ;;  %8963 = vmatprep.subr.bf16.mxu0 %v11989_v40  ;;  %v12011_v14 = vld [vmem:[#allocation4 + $0x38] ss:$12 sps:$4 sm:$0xff]   ;;  %v12034_v40 = vld [vmem:[#allocation4 + $0x85c] ss:$12 sps:$4 sm:$0xff]  }
 0x9ab   : > { %8936 = vmatprep.subr.bf16.mxu1 %v11969_v52  ;;  %v12015_v52 = vld [vmem:[#allocation4 + $0xe0] ss:$12 sps:$4 sm:$0xff]  }
 0x9ad   : > { %8964 = vmatpush1.bf16.msra.mxu0 %v11987_v12  ;;  %v12016_v12 = vld [vmem:[#allocation4 + $0x20] ss:$12 sps:$4 sm:$0xff]  }
 0x9ae   : > { %8937 = vmatpush2.bf16.msra.mxu1 %v11967_v10  ;;  %8965 = vmatprep.subr.bf16.mxu0 %v11994_v34  ;;  %v12039_v10 = vld [vmem:[#allocation4 + $0x844] ss:$12 sps:$4 sm:$0xff]   ;;  %v12020_v34 = vld [vmem:[#allocation4 + $0xc8] ss:$12 sps:$4 sm:$0xff]  }
 0x9af   : > { %8938 = vmatprep.subr.bf16.mxu1 %v11975_v25  ;;  %v12021_v25 = vld [vmem:[#allocation4 + $0x8] ss:$12 sps:$4 sm:$0xff]  }
 0x9b1   : > { %8966 = vmatpush1.bf16.msra.mxu0 %v11992_v37  ;;  %v12025_v37 = vld [vmem:[#allocation4 + $0x470] ss:$12 sps:$4 sm:$0xff]  }
 0x9b2   : > { %8939 = vmatpush2.bf16.msra.mxu1 %v11973_v7  ;;  %8967 = vmatprep.subr.bf16.mxu0 %v11999_v46  ;;  %v12026_v46 = vld [vmem:[#allocation4 + $0x3b0] ss:$12 sps:$4 sm:$0xff]  }
 0x9b3   : > { %8940 = vmatprep.subr.bf16.mxu1 %v11981_v49  ;;  %v12030_v49 = vld [vmem:[#allocation4 + $0x458] ss:$12 sps:$4 sm:$0xff]  }
 0x9b5   : > { %8968 = vmatpush1.bf16.msra.mxu0 %v11997_v51  ;;  %v4792_v51 = vrot.slane %v14855_v8, %v13814_v4 }
 0x9b6   : > { %8941 = vmatpush2.bf16.msra.mxu1 %v11979_v57  ;;  %8969 = vmatprep.subr.bf16.mxu0 %v12004_v19 }
 0x9b7   : > { %10453 = vmatprep.subr.bf16.mxu1 %v11985_v47 }
 0x9b9   : > { %8943 = vmatmul.mubr.bf16.vlgmr.msra.gmra.mxu1 %v14868_v24  ;;  %8970 = vmatpush2.bf16.msra.mxu0 %v12002_v58  ;;  %v6756_v7 = vpop.f32.mrf.mxu1 }
 0x9ba   : > { %10454 = vmatpush3.bf16.msra.mxu1 %v11986_v60  ;;  %9028 = vmatprep.mubr.bf16.mxu1 %v14749_v43  ;;  %v12005_v43 = vld [vmem:[#allocation4 + $0x110] ss:$12 sps:$4 sm:$0xff]  }
 0x9bb   : > { %10455 = vmatprep.subr.bf16.mxu1 %v11990_v21  ;;  %8971 = vmatprep.subr.bf16.mxu0 %v12009_v54  ;;  %v6758_v45 = vpop.f32.mrf.mxu1  ;;  %v12036_v54 = vld [vmem:[#allocation4 + $0x380] ss:$12 sps:$4 sm:$0xff]  }
 0x9bd   : > { %8972 = vmatpush2.bf16.msra.mxu0 %v12007_v29  ;;  %v6760_v58 = vpop.f32.mrf.mxu1 }
 0x9be   : > { %10456 = vmatpush3.bf16.msra.mxu1 %v11991_v31  ;;  %8973 = vmatprep.subr.bf16.mxu0 %v12014_v6 }
 0x9bf   : > { %10457 = vmatprep.subr.bf16.mxu1 %v11995_v59  ;;  %v6762_v6 = vpop.f32.mrf.mxu1 }
 0x9c1   : > { %8974 = vmatpush2.bf16.msra.mxu0 %v12012_v3 }
 0x9c2   : > { %10458 = vmatpush3.bf16.msra.mxu1 %v11996_v0  ;;  %8975 = vmatprep.subr.bf16.mxu0 %v12019_v1  ;;  %v12041_v0 = vld [vmem:[#allocation4 + $0x368] ss:$12 sps:$4 sm:$0xff]  }
 0x9c3   : > { %10459 = vmatprep.subr.bf16.mxu1 %v12000_v16 }
 0x9c5   : > { %8976 = vmatpush2.bf16.msra.mxu0 %v12017_v35  ;;  %v12044_v35 = vld [vmem:[#allocation4 + $0x410] ss:$12 sps:$4 sm:$0xff]  }
 0x9c6   : > { %10460 = vmatpush3.bf16.msra.mxu1 %v12001_v20  ;;  %8977 = vmatprep.subr.bf16.mxu0 %v12024_v23 }
 0x9c7   : > { %10461 = vmatprep.subr.bf16.mxu1 %v12005_v43  ;;  %v12043_v43 = vld [vmem:[#allocation4 + $0x230] ss:$12 sps:$4 sm:$0xff]  }
 0x9c9   : > { %8978 = vmatpush2.bf16.msra.mxu0 %v12022_v55 }
 0x9ca   : > { %10462 = vmatpush3.bf16.msra.mxu1 %v12006_v42  ;;  %8979 = vmatprep.subr.bf16.mxu0 %v12029_v27  ;;  %v12045_v42 = vld [vmem:[#allocation4 + $0x350] ss:$12 sps:$4 sm:$0xff]   ;;  %v12046_v27 = vld [vmem:[#allocation4 + $0x2d8] ss:$12 sps:$4 sm:$0xff]  }
 0x9cb   : > { %10463 = vmatprep.subr.bf16.mxu1 %v12010_v36  ;;  %v12048_v36 = vld [vmem:[#allocation4 + $0x3f8] ss:$12 sps:$4 sm:$0xff]  }
 0x9cd   : > { %8980 = vmatpush2.bf16.msra.mxu0 %v12027_v2  ;;  %v12047_v2 = vld [vmem:[#allocation4 + $0x218] ss:$12 sps:$4 sm:$0xff]  }
 0x9ce   : > { %10464 = vmatpush3.bf16.msra.mxu1 %v12011_v14  ;;  %8981 = vmatprep.subr.bf16.mxu0 %v12034_v40  ;;  %v12049_v14 = vld [vmem:[#allocation4 + $0x338] ss:$12 sps:$4 sm:$0xff]   ;;  %v12050_v40 = vld [vmem:[#allocation4 + $0x2c0] ss:$12 sps:$4 sm:$0xff]  }
 0x9cf   : > { %10465 = vmatprep.subr.bf16.mxu1 %v12015_v52  ;;  %v12052_v52 = vld [vmem:[#allocation4 + $0x3e0] ss:$12 sps:$4 sm:$0xff]  }
 0x9d1   : > { %8982 = vmatpush2.bf16.msra.mxu0 %v12032_v28  ;;  %v12051_v28 = vld [vmem:[#allocation4 + $0x200] ss:$12 sps:$4 sm:$0xff]  }
 0x9d2   : > { %10466 = vmatpush3.bf16.msra.mxu1 %v12016_v12  ;;  %8983 = vmatprep.subr.bf16.mxu0 %v12039_v10  ;;  %v12053_v12 = vld [vmem:[#allocation4 + $0x320] ss:$12 sps:$4 sm:$0xff]   ;;  %v12054_v10 = vld [vmem:[#allocation4 + $0x2a8] ss:$12 sps:$4 sm:$0xff]  }
 0x9d3   : > { %10467 = vmatprep.subr.bf16.mxu1 %v12020_v34  ;;  %v12056_v34 = vld [vmem:[#allocation4 + $0x3c8] ss:$12 sps:$4 sm:$0xff]  }
 0x9d5   : > { %8984 = vmatpush2.bf16.msra.mxu0 %v12037_v44  ;;  %v12055_v44 = vld [vmem:[#allocation4 + $0x1e8] ss:$12 sps:$4 sm:$0xff]  }
 0x9d6   : > { %10468 = vmatpush3.bf16.msra.mxu1 %v12021_v25  ;;  %10475 = vmatprep.subr.bf16.mxu0 %v12042_v18  ;;  %v12058_v25 = vld [vmem:[#allocation4 + $0x290] ss:$12 sps:$4 sm:$0xff]  }
 0x9d7   : > { %10497 = vmatprep.subr.bf16.mxu1 %v12025_v37  ;;  %v12060_v18 = vld [vmem:[#allocation4 + $0x770] ss:$12 sps:$4 sm:$0xff]  }
 0x9d8   : > { %v6713_v57 = vpop.f32.mrf.mxu0  ;;  %v12059_v37 = vld [vmem:[#allocation4 + $0x1d0] ss:$12 sps:$4 sm:$0xff]  }
 0x9d9   : > { %9029 = vmatmul.mubr.bf16.vlgmr.msra.gmra.mxu1 %v14694_v5  ;;  %v6714_v63 = vadd.f32 %v6713_v57, %v4792_v51  ;;  %v12040_v5 = vld [vmem:[#allocation4 + $0x428] ss:$12 sps:$4 sm:$0xff]   ;;  %v12068_v57 = vld [vmem:[#allocation4 + $0x740] ss:$12 sps:$4 sm:$0xff]  }
 0x9da   : > { %v6715_v19 = vpop.f32.mrf.mxu0  ;;  %10498 = vmatpush3.bf16.msra.mxu1 %v12026_v46  ;;  %9110 = vmatprep.mubr.bf16.mxu1 %v14819_v30  ;;  %v12062_v46 = vld [vmem:[#allocation4 + $0x278] ss:$12 sps:$4 sm:$0xff]  }
 0x9db   : > { %v6716_v47 = vadd.f32 %v6715_v19, %v4796_v48  ;;  %10499 = vmatprep.subr.bf16.mxu1 %v12030_v49  ;;  %v6757_v59 = vadd.f32 %v6756_v7, %v6714_v63  ;;  %v12061_v7 = vld [vmem:[#allocation4 + $0x6b0] ss:$12 sps:$4 sm:$0xff]   ;;  %v12063_v49 = vld [vmem:[#allocation4 + $0x1b8] ss:$12 sps:$4 sm:$0xff]   ;;  %v12067_v19 = vld [vmem:[#allocation4 + $0x1a0] ss:$12 sps:$4 sm:$0xff]  }
 0x9dc   : > { %v6717_v60 = vpop.f32.mrf.mxu0  ;;  %v12074_v63 = vld [vmem:[#allocation4 + $0x5f0] ss:$12 sps:$4 sm:$0xff]  }
 0x9dd   : > { %v6718_v15 = vadd.f32 %v6717_v60, %v4792_v51  ;;  %v6759_v29 = vadd.f32 %v6758_v45, %v6716_v47  ;;  %v6775_v20 = vmax.f32 %v6757_v59, 0.0  ;;  %v12065_v45 = vld [vmem:[#allocation4 + $0x698] ss:$12 sps:$4 sm:$0xff]   ;;  %v12066_v51 = vld [vmem:[#allocation4 + $0x260] ss:$12 sps:$4 sm:$0xff]  }
 0x9de   : > { %v6719_v21 = vpop.f32.mrf.mxu0  ;;  %10500 = vmatpush3.bf16.msra.mxu1 %v12031_v62  ;;  %v12069_v62 = vld [vmem:[#allocation4 + $0x680] ss:$12 sps:$4 sm:$0xff]   ;;  %v12070_v47 = vld [vmem:[#allocation4 + $0x248] ss:$12 sps:$4 sm:$0xff]   ;;  %v12075_v60 = vld [vmem:[#allocation4 + $0x530] ss:$12 sps:$4 sm:$0xff]  }
 0x9df   : > { %v6761_v8 = vadd.f32 %v6760_v58, %v6718_v15  ;;  %v6720_v31 = vadd.f32 %v6719_v21, %v4796_v48  ;;  %10501 = vmatprep.subr.bf16.mxu1 %v12035_v50  ;;  %v6776_v1 = vmax.f32 %v6759_v29, 0.0  ;;  %v12064_v48 = vld [vmem:[#allocation4 + $0x758] ss:$12 sps:$4 sm:$0xff]   ;;  %v12072_v50 = vld [vmem:[#allocation4 + $0x728] ss:$12 sps:$4 sm:$0xff]  }
 0x9e0   : > { %v12071_v58 = vld [vmem:[#allocation4 + $0x188] ss:$12 sps:$4 sm:$0xff]   ;;  %v12077_v15 = vld [vmem:[#allocation4 + $0x650] ss:$12 sps:$4 sm:$0xff]   ;;  %v12078_v21 = vld [vmem:[#allocation4 + $0x5d8] ss:$12 sps:$4 sm:$0xff]  }
 0x9e1   : > { %v6763_v3 = vadd.f32 %v6762_v6, %v6720_v31  ;;  %v6787_v30 = vmax.f32 %v6761_v8, 0.0  ;;  %v12079_v29 = vld [vmem:[#allocation4 + $0x518] ss:$12 sps:$4 sm:$0xff]   ;;  %v12082_v31 = vld [vmem:[#allocation4 + $0x5c0] ss:$12 sps:$4 sm:$0xff]  }
 0x9e2   : > { %10502 = vmatpush3.bf16.msra.mxu1 %v12036_v54  ;;  %v12080_v54 = vld [vmem:[#allocation4 + $0x6f8] ss:$12 sps:$4 sm:$0xff]   ;;  %v12083_v6 = vld [vmem:[#allocation4 + $0x500] ss:$12 sps:$4 sm:$0xff]  }
 0x9e3   : > { %v6788_v16 = vmax.f32 %v6763_v3, 0.0  ;;  %10503 = vmatprep.subr.bf16.mxu1 %v12040_v5  ;;  %v14881_v55 = vpack.c.bf16 %v6787_v30, %v6775_v20  ;;  %v12081_v8 = vld [vmem:[#allocation4 + $0x638] ss:$12 sps:$4 sm:$0xff]   ;;  %v12084_v5 = vld [vmem:[#allocation4 + $0x6e0] ss:$12 sps:$4 sm:$0xff]  }
 0x9e4   : > { %v12085_v59 = vld [vmem:[#allocation4 + $0x620] ss:$12 sps:$4 sm:$0xff]   ;;  %v12086_v3 = vld [vmem:[#allocation4 + $0x5a8] ss:$12 sps:$4 sm:$0xff]  }
 0x9e5   : > { %v14879_v23 = vpack.c.bf16 %v6788_v16, %v6776_v1  ;;  %v12088_v30 = vld [vmem:[#allocation4 + $0x6c8] ss:$12 sps:$4 sm:$0xff]   ;;  %v12091_v1 = vld [vmem:[#allocation4 + $0x4d0] ss:$12 sps:$4 sm:$0xff]   ;;  %v12092_v16 = vld [vmem:[#allocation4 + $0x578] ss:$12 sps:$4 sm:$0xff]  }
 0x9e6   : > { %10504 = vmatpush3.bf16.msra.mxu1 %v12041_v0  ;;  %v12090_v0 = vld [vmem:[#allocation4 + $0x590] ss:$12 sps:$4 sm:$0xff]   ;;  %v12094_v20 = vld [vmem:[#allocation4 + $0x560] ss:$12 sps:$4 sm:$0xff]  }
 0x9e7   : > { %8985 = vmatprep.mubr.bf16.mxu0 %v14879_v23  ;;  %10505 = vmatprep.subr.bf16.mxu1 %v12044_v35  ;;  %v12093_v35 = vld [vmem:[#allocation4 + $0x4b8] ss:$12 sps:$4 sm:$0xff]  }
 0x9e8   : > { %8986 = vmatmul.mubr.bf16.vlgmr.msra.gmra.mxu0 %v14881_v55 }
 0x9e9   : > { %10476 = vmatpush3.bf16.msra.mxu0 %v12043_v43  ;;  %9069 = vmatprep.mubr.bf16.mxu0 %v14805_v61  ;;  %v12057_v61 = vld [vmem:[#allocation4 + $0x308] ss:$12 sps:$4 sm:$0xff]   ;;  %v12095_v43 = vld [vmem:[#allocation4 + $0x4a0] ss:$12 sps:$4 sm:$0xff]  }
 0x9ea   : > { %10506 = vmatpush3.bf16.msra.mxu1 %v12045_v42  ;;  %10477 = vmatprep.subr.bf16.mxu0 %v12046_v27  ;;  %v12096_v42 = vld [vmem:[#allocation4 + $0x548] ss:$12 sps:$4 sm:$0xff]  }
 0x9eb   : > { %10507 = vmatprep.subr.bf16.mxu1 %v12048_v36  ;;  %v12097_v27 = vld [vmem:[#allocation4 + $0x488] ss:$12 sps:$4 sm:$0xff]   ;;  %v12098_v36 = vld [vmem:[#allocation4 + $0x8f0] ss:$12 sps:$4 sm:$0xff]  }
 0x9ed   : > { %10478 = vmatpush3.bf16.msra.mxu0 %v12047_v2  ;;  %v12099_v2 = vld [vmem:[#allocation4 + $0x830] ss:$12 sps:$4 sm:$0xff]  }
 0x9ee   : > { %10508 = vmatpush3.bf16.msra.mxu1 %v12049_v14  ;;  %10479 = vmatprep.subr.bf16.mxu0 %v12050_v40  ;;  %v12100_v14 = vld [vmem:[#allocation4 + $0x8d8] ss:$12 sps:$4 sm:$0xff]   ;;  %v12102_v40 = vld [vmem:[#allocation4 + $0x8c0] ss:$12 sps:$4 sm:$0xff]  }
 0x9ef   : > { %10509 = vmatprep.subr.bf16.mxu1 %v12052_v52  ;;  %v12103_v52 = vld [vmem:[#allocation4 + $0x800] ss:$12 sps:$4 sm:$0xff]  }
 0x9f1   : > { %10480 = vmatpush3.bf16.msra.mxu0 %v12051_v28  ;;  %v12104_v28 = vld [vmem:[#allocation4 + $0x8a8] ss:$12 sps:$4 sm:$0xff]  }
 0x9f2   : > { %10510 = vmatpush3.bf16.msra.mxu1 %v12053_v12  ;;  %10481 = vmatprep.subr.bf16.mxu0 %v12054_v10  ;;  %v12105_v12 = vld [vmem:[#allocation4 + $0x7e8] ss:$12 sps:$4 sm:$0xff]   ;;  %v12106_v10 = vld [vmem:[#allocation4 + $0x890] ss:$12 sps:$4 sm:$0xff]  }
 0x9f3   : > { %10511 = vmatprep.subr.bf16.mxu1 %v12056_v34  ;;  %v12107_v34 = vld [vmem:[#allocation4 + $0x7d0] ss:$12 sps:$4 sm:$0xff]  }
 0x9f5   : > { %10482 = vmatpush3.bf16.msra.mxu0 %v12055_v44  ;;  %v12108_v44 = vld [vmem:[#allocation4 + $0x878] ss:$12 sps:$4 sm:$0xff]  }
 0x9f6   : > { %10512 = vmatpush3.bf16.msra.mxu1 %v12057_v61  ;;  %10483 = vmatprep.subr.bf16.mxu0 %v12058_v25  ;;  %v12110_v61 = vld [vmem:[#allocation4 + $0x860] ss:$12 sps:$4 sm:$0xff]   ;;  %v12112_v25 = vld [vmem:[#allocation4 + $0x848] ss:$12 sps:$4 sm:$0xff]  }
 0x9f7   : > { %10541 = vmatprep.subr.bf16.mxu1 %v12060_v18  ;;  %v12113_v18 = vld [vmem:[#allocation4 + $0x788] ss:$12 sps:$4 sm:$0xff]  }
 0x9f9   : > { %10484 = vmatpush3.bf16.msra.mxu0 %v12059_v37  ;;  %9111 = vmatmul.mubr.bf16.vlgmr.msra.gmra.mxu1 %v14840_v13  ;;  %v12073_v13 = vld [vmem:[#allocation4 + $0x668] ss:$12 sps:$4 sm:$0xff]   ;;  %v8772_v37 = vpop.f32.mrf.mxu1 }
 0x9fa   : > { %10542 = vmatpush3.bf16.msra.mxu1 %v12061_v7  ;;  %9192 = vmatprep.mubr.bf16.mxu1 %v14862_v9  ;;  %v12076_v9 = vld [vmem:[#allocation4 + $0x710] ss:$12 sps:$4 sm:$0xff]  }
 0x9fb   : > { %10485 = vmatprep.subr.bf16.mxu0 %v12062_v46  ;;  %10543 = vmatprep.subr.bf16.mxu1 %v12064_v48  ;;  %v8774_v7 = vpop.f32.mrf.mxu1 }
 0x9fd   : > { %10486 = vmatpush3.bf16.msra.mxu0 %v12063_v49  ;;  %v8776_v46 = vpop.f32.mrf.mxu1 }
 0x9fe   : > { %10544 = vmatpush3.bf16.msra.mxu1 %v12065_v45  ;;  %10487 = vmatprep.subr.bf16.mxu0 %v12066_v51 }
 0x9ff   : > { %10545 = vmatprep.subr.bf16.mxu1 %v12068_v57  ;;  %v8778_v49 = vpop.f32.mrf.mxu1 }
 0xa01   : > { %10488 = vmatpush3.bf16.msra.mxu0 %v12067_v19 }
 0xa02   : > { %10546 = vmatpush3.bf16.msra.mxu1 %v12069_v62  ;;  %10489 = vmatprep.subr.bf16.mxu0 %v12070_v47  ;;  %v14897_v62 = vld [vmem:[%s14980_s10] sm:$0x7] }
 0xa03   : > { %10547 = vmatprep.subr.bf16.mxu1 %v12072_v50 }
 0xa05   : > { %10490 = vmatpush3.bf16.msra.mxu0 %v12071_v58 }
 0xa06   : > { %10548 = vmatpush3.bf16.msra.mxu1 %v12073_v13  ;;  %10519 = vmatprep.subr.bf16.mxu0 %v12074_v63  ;;  %v7194_v63 = vrot.slane %v14897_v62, %v13803_v56 }
 0xa07   : > { %10549 = vmatprep.subr.bf16.mxu1 %v12076_v9 }
 0xa08   : > { %9070 = vmatmul.mubr.bf16.vlgmr.msra.gmra.mxu0 %v14828_v26  ;;  %v12087_v26 = vld [vmem:[#allocation4 + $0x4e8] ss:$12 sps:$4 sm:$0xff]  }
 0xa09   : > { %10520 = vmatpush3.bf16.msra.mxu0 %v12075_v60  ;;  %9151 = vmatprep.mubr.bf16.mxu0 %v14845_v11  ;;  %v12089_v11 = vld [vmem:[#allocation4 + $0x608] ss:$12 sps:$4 sm:$0xff]  }
 0xa0a   : > { %10550 = vmatpush3.bf16.msra.mxu1 %v12077_v15  ;;  %10521 = vmatprep.subr.bf16.mxu0 %v12078_v21  ;;  %v8775_v21 = vadd.f32 %v8774_v7, %v7194_v63 }
 0xa0b   : > { %10551 = vmatprep.subr.bf16.mxu1 %v12080_v54 }
 0xa0d   : > { %10522 = vmatpush3.bf16.msra.mxu0 %v12079_v29 }
 0xa0e   : > { %10552 = vmatpush3.bf16.msra.mxu1 %v12081_v8  ;;  %10523 = vmatprep.subr.bf16.mxu0 %v12082_v31 }
 0xa0f   : > { %10553 = vmatprep.subr.bf16.mxu1 %v12084_v5 }
 0xa11   : > { %10524 = vmatpush3.bf16.msra.mxu0 %v12083_v6 }
 0xa12   : > { %10554 = vmatpush3.bf16.msra.mxu1 %v12085_v59  ;;  %10525 = vmatprep.subr.bf16.mxu0 %v12086_v3  ;;  %v8779_v59 = vadd.f32 %v8778_v49, %v7194_v63 }
 0xa13   : > { %10555 = vmatprep.subr.bf16.mxu1 %v12088_v30 }
 0xa15   : > { %10526 = vmatpush3.bf16.msra.mxu0 %v12087_v26 }
 0xa16   : > { %10556 = vmatpush3.bf16.msra.mxu1 %v12089_v11  ;;  %10527 = vmatprep.subr.bf16.mxu0 %v12090_v0 }
 0xa18   : > { %v8815_v48 = vpop.f32.mrf.mxu0 }
 0xa19   : > { %10528 = vmatpush3.bf16.msra.mxu0 %v12091_v1  ;;  %9193 = vmatmul.mubr.bf16.vlgmr.msra.gmra.mxu1 %v14868_v24  ;;  %v12101_v24 = vld [vmem:[#allocation4 + $0x818] ss:$12 sps:$4 sm:$0xff]  }
 0xa1a   : > { %10529 = vmatprep.subr.bf16.mxu0 %v12092_v16  ;;  %v8817_v45 = vpop.f32.mrf.mxu0 }
 0xa1b   : > { %v8818_v5 = vadd.f32 %v8817_v45, %v8775_v21 }
 0xa1c   : > { %v8819_v57 = vpop.f32.mrf.mxu0 }
 0xa1d   : > { %10530 = vmatpush3.bf16.msra.mxu0 %v12093_v35 }
 0xa1e   : > { %10531 = vmatprep.subr.bf16.mxu0 %v12094_v20  ;;  %v8821_v47 = vpop.f32.mrf.mxu0 }
 0xa1f   : > { %v8822_v0 = vadd.f32 %v8821_v47, %v8779_v59 }
 0xa21   : > { %10532 = vmatpush3.bf16.msra.mxu0 %v12095_v43 }
 0xa22   : > { %10533 = vmatprep.subr.bf16.mxu0 %v12096_v42 }
 0xa25   : > { %10534 = vmatpush3.bf16.msra.mxu0 %v12097_v27 }
 0xa26   : > { %10563 = vmatprep.subr.bf16.mxu0 %v12098_v36 }
 0xa28   : > { %9152 = vmatmul.mubr.bf16.vlgmr.msra.gmra.mxu0 %v14850_v41  ;;  %v12109_v41 = vld [vmem:[#allocation4 + $0x7b8] ss:$12 sps:$4 sm:$0xff]  }
 0xa29   : > { %10564 = vmatpush3.bf16.msra.mxu0 %v12099_v2  ;;  %9233 = vmatprep.mubr.bf16.mxu0 %v14879_v23  ;;  %v12111_v23 = vld [vmem:[#allocation4 + $0x7a0] ss:$12 sps:$4 sm:$0xff]  }
 0xa2a   : > { %10565 = vmatprep.subr.bf16.mxu0 %v12100_v14 }
 0xa2d   : > { %10566 = vmatpush3.bf16.msra.mxu0 %v12101_v24 }
 0xa2e   : > { %10567 = vmatprep.subr.bf16.mxu0 %v12102_v40 }
 0xa31   : > { %10568 = vmatpush3.bf16.msra.mxu0 %v12103_v52 }
 0xa32   : > { %10569 = vmatprep.subr.bf16.mxu0 %v12104_v28 }
 0xa35   : > { %10570 = vmatpush3.bf16.msra.mxu0 %v12105_v12 }
 0xa36   : > { %10571 = vmatprep.subr.bf16.mxu0 %v12106_v10 }
 0xa39   : > { %10572 = vmatpush3.bf16.msra.mxu0 %v12107_v34  ;;  %v8858_v51 = vpop.f32.mrf.mxu1 }
 0xa3a   : > { %10573 = vmatprep.subr.bf16.mxu0 %v12108_v44 }
 0xa3b   : > { %v8860_v19 = vpop.f32.mrf.mxu1 }
 0xa3c   : > { %v8861_v30 = vadd.f32 %v8860_v19, %v8818_v5 }
 0xa3d   : > { %10574 = vmatpush3.bf16.msra.mxu0 %v12109_v41  ;;  %v8862_v50 = vpop.f32.mrf.mxu1 }
 0xa3e   : > { %10575 = vmatprep.subr.bf16.mxu0 %v12110_v61 }
 0xa3f   : > { %v8864_v13 = vpop.f32.mrf.mxu1 }
 0xa40   : > { %v8865_v20 = vadd.f32 %v8864_v13, %v8822_v0 }
 0xa41   : > { %10576 = vmatpush3.bf16.msra.mxu0 %v12111_v23 }
 0xa42   : > { %10577 = vmatprep.subr.bf16.mxu0 %v12112_v25 }
 0xa45   : > { %10578 = vmatpush3.bf16.msra.mxu0 %v12113_v18 }
 0xa48   : > { %9234 = vmatmul.mubr.bf16.vlgmr.msra.gmra.mxu0 %v14881_v55  ;;  %v7190_v55 = vrot.slane %v14897_v62, %v13806_v53 }
 0xa4a   : > { %v8773_v15 = vadd.f32 %v8772_v37, %v7190_v55  ;;  %v8777_v31 = vadd.f32 %v8776_v46, %v7190_v55 }
 0xa4c   : > { %v8816_v54 = vadd.f32 %v8815_v48, %v8773_v15  ;;  %v8820_v3 = vadd.f32 %v8819_v57, %v8777_v31 }
 0xa4e   : > { %v8859_v6 = vadd.f32 %v8858_v51, %v8816_v54  ;;  %v8863_v56 = vadd.f32 %v8862_v50, %v8820_v3 }
 0xa58   : > { %v8901_v58 = vpop.f32.mrf.mxu0 }
 0xa59   : > { %v8902_v26 = vadd.f32 %v8901_v58, %v8859_v6 }
 0xa5a   : > { %v8903_v9 = vpop.f32.mrf.mxu0 }
 0xa5b   : > { %v8904_v1 = vadd.f32 %v8903_v9, %v8861_v30 }
 0xa5c   : > { %v8905_v29 = vpop.f32.mrf.mxu0 }
 0xa5d   : > { %v8906_v43 = vadd.f32 %v8905_v29, %v8863_v56 }
 0xa5e   : > { %v8907_v53 = vpop.f32.mrf.mxu0 }
 0xa5f   : > { %v8908_v14 = vadd.f32 %v8907_v53, %v8865_v20 }
 0xa79   : > { %v8944_v60 = vpop.f32.mrf.mxu1 }
 0xa7a   : > { %v8945_v16 = vadd.f32 %v8944_v60, %v8902_v26 }
 0xa7b   : > { %v8946_v8 = vpop.f32.mrf.mxu1 }
 0xa7c   : > { %v8947_v42 = vadd.f32 %v8946_v8, %v8904_v1 }
 0xa7d   : > { %v8948_v11 = vpop.f32.mrf.mxu1 }
 0xa7e   : > { %v8949_v24 = vadd.f32 %v8948_v11, %v8906_v43 }
 0xa7f   : > { %v8950_v36 = vpop.f32.mrf.mxu1 }
 0xa80   : > { %v8951_v12 = vadd.f32 %v8950_v36, %v8908_v14 }
 0xa99   : > { %v10469_v23 = vpop.f32.mrf.mxu1 }
 0xa9b   : > { %v10470_v25 = vpop.f32.mrf.mxu1 }
 0xa9c   : > { %v10471_v19 = vadd.f32 %v10470_v25, %v10469_v23 }
 0xa9d   : > { %v10472_v18 = vpop.f32.mrf.mxu1 }
 0xa9f   : > { %v10473_v7 = vpop.f32.mrf.mxu1 }
 0xaa0   : > { %v10474_v13 = vadd.f32 %v10473_v7, %v10472_v18 }
 0xaa8   : > { %v8987_v35 = vpop.f32.mrf.mxu0 }
 0xaa9   : > { %v8988_v27 = vadd.f32 %v8987_v35, %v8945_v16 }
 0xaaa   : > { %v8989_v2 = vpop.f32.mrf.mxu0 }
 0xaab   : > { %v9242_v40 = vadd.f32 %v8988_v27, %v13822_v22  ;;  %v8990_v52 = vadd.f32 %v8989_v2, %v8947_v42 }
 0xaac   : > { %v8991_v28 = vpop.f32.mrf.mxu0 }
 0xaad   : > { %9248 = vst [vmem:[%s14905_s14] sm:$0xff] %v9242_v40  ;;  %v9243_v10 = vadd.f32 %v8990_v52, %v13820_v17  ;;  %v8992_v34 = vadd.f32 %v8991_v28, %v8949_v24 }
 0xaae   : > { %v8993_v44 = vpop.f32.mrf.mxu0 }
 0xaaf   : > { %9249 = vst [vmem:[%s14905_s14 + $0x8] sm:$0xff] %v9243_v10  ;;  %v9245_v41 = vadd.f32 %v8992_v34, %v13830_v39  ;;  %v8994_v61 = vadd.f32 %v8993_v44, %v8951_v12  ;;  %v7198_v39 = vrot.slane %v14897_v62, %v13814_v4 }
 0xab1   : > { %9251 = vst [vmem:[%s14905_s14 + $0x18] sm:$0xff] %v9245_v41  ;;  %v9246_v22 = vadd.f32 %v8994_v61, %v13824_v32  ;;  %v9031_v55 = vadd.f32 %v10471_v19, %v7198_v39  ;;  %v9034_v21 = vadd.f32 %v10474_v13, %v7198_v39 }
 0xab3   : > { %9252 = vst [vmem:[%s14905_s14 + $0x20] sm:$0xff] %v9246_v22 }
 0xab9   : > { %v10513_v48 = vpop.f32.mrf.mxu1 }
 0xabb   : > { %v10514_v45 = vpop.f32.mrf.mxu1 }
 0xabc   : > { %v10515_v54 = vadd.f32 %v10514_v45, %v10513_v48 }
 0xabd   : > { %v10516_v51 = vpop.f32.mrf.mxu1 }
 0xabf   : > { %v10517_v47 = vpop.f32.mrf.mxu1 }
 0xac0   : > { %v10518_v4 = vadd.f32 %v10517_v47, %v10516_v51 }
 0xac8   : > { %v10491_v37 = vpop.f32.mrf.mxu0 }
 0xaca   : > { %v10492_v46 = vpop.f32.mrf.mxu0 }
 0xacb   : > { %v10493_v32 = vadd.f32 %v10492_v46, %v10491_v37 }
 0xacc   : > { %v10494_v49 = vpop.f32.mrf.mxu0 }
 0xacd   : > { %v9072_v9 = vadd.f32 %v10493_v32, %v9031_v55 }
 0xace   : > { %v10495_v17 = vpop.f32.mrf.mxu0 }
 0xacf   : > { %v10496_v60 = vadd.f32 %v10495_v17, %v10494_v49  ;;  %v9113_v5 = vadd.f32 %v10515_v54, %v9072_v9 }
 0xad1   : > { %v9075_v31 = vadd.f32 %v10496_v60, %v9034_v21 }
 0xad3   : > { %v9116_v26 = vadd.f32 %v10518_v4, %v9075_v31 }
 0xad9   : > { %v10557_v58 = vpop.f32.mrf.mxu1 }
 0xadb   : > { %v10558_v15 = vpop.f32.mrf.mxu1 }
 0xadc   : > { %v10559_v30 = vadd.f32 %v10558_v15, %v10557_v58 }
 0xadd   : > { %v10560_v6 = vpop.f32.mrf.mxu1 }
 0xadf   : > { %v10561_v53 = vpop.f32.mrf.mxu1 }
 0xae0   : > { %v10562_v35 = vadd.f32 %v10561_v53, %v10560_v6 }
 0xae8   : > { %v10535_v57 = vpop.f32.mrf.mxu0 }
 0xaea   : > { %v10536_v50 = vpop.f32.mrf.mxu0 }
 0xaeb   : > { %v10537_v29 = vadd.f32 %v10536_v50, %v10535_v57 }
 0xaec   : > { %v10538_v63 = vpop.f32.mrf.mxu0 }
 0xaed   : > { %v9154_v62 = vadd.f32 %v10537_v29, %v9113_v5 }
 0xaee   : > { %v10539_v8 = vpop.f32.mrf.mxu0 }
 0xaef   : > { %v10540_v59 = vadd.f32 %v10539_v8, %v10538_v63  ;;  %v9195_v56 = vadd.f32 %v10559_v30, %v9154_v62 }
 0xaf1   : > { %v9157_v0 = vadd.f32 %v10540_v59, %v9116_v26 }
 0xaf3   : > { %v9198_v27 = vadd.f32 %v10562_v35, %v9157_v0 }
 0xb08   : > { %v10579_v3 = vpop.f32.mrf.mxu0 }
 0xb0a   : > { %v10580_v11 = vpop.f32.mrf.mxu0 }
 0xb0b   : > { %v10581_v1 = vadd.f32 %v10580_v11, %v10579_v3 }
 0xb0c   : > { %v10582_v16 = vpop.f32.mrf.mxu0 }
 0xb0d   : > { %v9236_v20 = vadd.f32 %v10581_v1, %v9195_v56 }
 0xb0e   : > { %v10583_v43 = vpop.f32.mrf.mxu0 }
 0xb0f   : > { %v9244_v42 = vadd.f32 %v9236_v20, %v13826_v33  ;;  %v10584_v36 = vadd.f32 %v10583_v43, %v10582_v16 }
 0xb11   : > { %9250 = vst [vmem:[%s14905_s14 + $0x10] sm:$0xff] %v9244_v42  ;;  %v9239_v2 = vadd.f32 %v10584_v36, %v9198_v27 }
 0xb13   : > { %v9247_v14 = vadd.f32 %v9239_v2, %v13833_v38 }
 0xb15   : > { %9253 = vst [vmem:[%s14905_s14 + $0x28] sm:$0xff] %v9247_v14 }
 0xb16   : > { %12205 = shalt.err (!%p12202_p2)
}
 0xb17   : > { %s12206_s13 = scalar_lea.hbm %s14925_s16, 768  ;;  %s12210_s29 = scalar_lea.hbm %s14981_s11, 1536 }
 0xb18   : > { %p12207_p3 = scmp.ne.s32.totalorder %s14925_s16, %s12206_s13  ;;  %p12211_p8 = scmp.lt.s32.totalorder %s14925_s16, %s14981_s11 }
 0xb19   : > { %p12212_p5 = scmp.lt.s32.totalorder %s12210_s29, %s12206_s13 }
 0xb1a   : > { %p12208_p4 = pnand %p12207_p3, %p14993_p10 }
 0xb1b   : > { %p12213_p6 = por %p12212_p5, %p12211_p8 }
 0xb1c   : > { %p12209_p7 = pneg %p12208_p4 }
 0xb1e   : > { %p12214_p11 = pnand %p12213_p6, %p12209_p7 }
 0xb20   : > { %12217 = shalt.err (!%p12214_p11)
}
 0xb21   : > { %s12267_s22 = smov 384   ;;  %s12268_s24 = smov 24  }
 0xb22   : > { %10687 = dma.vmem_to_hbm [thread:$0]  (%p14993_p10), %s14919_s26, 768, %s14925_s16, %s9255_s21, %s12267_s22, %s12267_s22, %s12268_s24  }
 0xb23 PF: > { %s14994_s27 = sld [smem:[#allocation12_spill]]  ;;  %s9284_s25 = sand.u32 1, %s12244_s17  }
 0xb24   : > { %s9285_s13 = scalar_lea.sflag [#allocation6], %s9284_s25 }
 0xb29   : > { %p14995_p12 = scmp.ne.s32.totalorder %s14994_s27, 0 }
 0xb2b   : > { %p10694_p13 = pnand %p9368_p9, %p14995_p12 }
 0xb2d   : > { %p10695_p0 = pneg %p10694_p13 }
 0xb2f   : > { %12239 = dma.done.wait (%p10695_p0), %s9285_s13, 768  }
 0xb30   : > { %12241 = vsyncadd (%p10695_p0), %s9285_s13, 4294966528  ;;  %s14996_s20 = sld [smem:[#allocation10_spill]]  ;;  %s14998_s17 = smov %s12248_s18 }
 0xb31   : > { %s14997_s12 = sld [smem:[#allocation11_spill]]  ;;  %s14999_s18 = smov %s12252_s19 }
 0xb36   : > { %p22_p1 = scmp.ge.s32.totalorder %s14996_s20, 4  }
 0xb37   : > { %s15000_s19 = smov %s14997_s12 }
 0xb38   :  { %24 = sbr.rel (!%p22_p1) target bundleno = 4 (0x4), region = 144 }
 0xb3d   :  { %9290 = vsyncpa [#allocation5], 1 }
 0xb3e   :  { %9292 = vsyncpa [#allocation5 + $0x1], 1 }
 0xb3f   :  { %9293 = vsyncpa [#allocation6], 1 }
 0xb40   :  { %9295 = vsyncpa [#allocation6 + $0x1], 1 }

</bundles_post_ra>
